<compile_context>
chip_gen: v5e
topology: v5e:2x2
jax: 0.10.0
libtpu: 0.0.40
codegen_flags: <defaults>
</compile_context>

<pallas_src>
import jax
import jax.numpy as jnp
from jax.experimental import pallas as pl
from jax.experimental.pallas import tpu as pltpu

EPS = 1e-5
LANE = 128
MAX_TILE_M = 1024        # rows per 1x1 / elementwise tile (85%+ of HBM roofline)
STRIP_CAP = 8            # max output rows per 3x3-conv strip


def _round_up(x, m):
    return (x + m - 1) // m * m


_VMEM_LIMIT_CACHE = [None]


def _vmem_limit():
    """Generation-aware VMEM budget: ~3/4 of physical VMEM, capped at 96 MiB.
    v5e/v6e (128 MiB phys) -> 96 MiB; v7x (64 MiB phys) -> 48 MiB; fallback 48 MiB."""
    if _VMEM_LIMIT_CACHE[0] is None:
        try:
            cap = int(pltpu.get_tpu_info().vmem_capacity_bytes)
        except Exception:
            cap = 64 * 1024 * 1024
        _VMEM_LIMIT_CACHE[0] = int(min(cap * 3 // 4, 96 * 1024 * 1024))
    return _VMEM_LIMIT_CACHE[0]


def _compiler_params(n_axes):
    # Every grid axis writes disjoint output / stats blocks -> "parallel" is
    # safe and lets megacore chips shard the grid.
    return pltpu.CompilerParams(
        dimension_semantics=("parallel",) * n_axes,
        vmem_limit_bytes=_vmem_limit(),
    )


def _choose_tile_m(m):
    """Row tile for 1x1 / elementwise stages: multiple of 8, <= MAX_TILE_M, and
    >= 2 grid steps whenever possible.  Ragged last tiles are handled in-kernel."""
    if m <= 16:
        return _round_up(m, 8)
    return min(MAX_TILE_M, _round_up((m + 1) // 2, 8))


def _choose_strip_h(h):
    """Largest divisor of H that is <= STRIP_CAP (output rows per 3x3 strip)."""
    for s in range(min(h, STRIP_CAP), 0, -1):
        if h % s == 0:
            return s
    return h


# ----------------------- stage 1: conv1 (1x1) + BN1 partial stats -----------------------
def _conv1x1_stats_kernel_factory(m_total, tm):
    ragged = (m_total % tm) != 0

    def kernel(x_ref, w_ref, y_ref, stats_ref):
        y = jnp.dot(x_ref[...], w_ref[...], preferred_element_type=jnp.float32)
        y_ref[...] = y.astype(y_ref.dtype)
        ys = y
        if ragged:  # keep garbage rows of the overhanging last tile out of the stats
            row = jax.lax.broadcasted_iota(jnp.int32, y.shape, 0) + pl.program_id(0) * tm
            ys = jnp.where(row < m_total, y, 0.0)
        s = jnp.sum(ys, axis=0, keepdims=True)
        sq = jnp.sum(ys * ys, axis=0, keepdims=True)
        stats_ref[...] = jnp.concatenate([s, sq], axis=0)[None, :, :]

    return kernel


def _conv1x1_stats(x2d, w):
    m, cin = x2d.shape
    cout = w.shape[1]
    tm = _choose_tile_m(m)
    nt = (m + tm - 1) // tm
    return pl.pallas_call(
        _conv1x1_stats_kernel_factory(m, tm),
        out_shape=(jax.ShapeDtypeStruct((m, cout), jnp.bfloat16),
                   jax.ShapeDtypeStruct((nt, 2, cout), jnp.float32)),
        grid=(nt,),
        in_specs=[pl.BlockSpec((tm, cin), lambda i: (i, 0)),
                  # TODO(synk): pin constant-index weights single-buffered
                  # (pipeline_mode=pl.Buffered(1)) for extra VMEM headroom on
                  # v7x at large channel counts.
                  pl.BlockSpec((cin, cout), lambda i: (0, 0))],
        out_specs=(pl.BlockSpec((tm, cout), lambda i: (i, 0)),
                   pl.BlockSpec((1, 2, cout), lambda i: (i, 0, 0))),
        compiler_params=_compiler_params(1),
    )(x2d, w)


# ------ stage 2: fused BN1+ReLU -> 3x3 conv (row-strip tiles, per-tap MXU accumulation) ------
def _conv3x3_stats_kernel_factory(strip_h, w_img, c):
    def kernel(top_ref, body_ref, bot_ref, scale_ref, shift_ref, w_ref,
               y_ref, stats_ref):
        s_idx = pl.program_id(1)
        n_strips = pl.num_programs(1)
        scale = scale_ref[...].reshape(1, 1, c)
        shift = shift_ref[...].reshape(1, 1, c)

        def bn_relu(v):
            return jnp.maximum(v.astype(jnp.float32) * scale + shift, 0.0)

        a_body = bn_relu(body_ref[...]).astype(jnp.bfloat16)          # (strip_h, W, C)
        # Halo rows: BN1+ReLU like the body, zeroed at the image boundary so
        # conv2's zero padding applies to the *post*-activation tensor.
        a_top = jnp.where(s_idx == 0, 0.0,
                          bn_relu(top_ref[...])).astype(jnp.bfloat16)  # (1, W, C)
        a_bot = jnp.where(s_idx == n_strips - 1, 0.0,
                          bn_relu(bot_ref[...])).astype(jnp.bfloat16)  # (1, W, C)

        rows = jnp.concatenate([a_top, a_body, a_bot], axis=0)        # (strip_h+2, W, C)
        zcol = jnp.zeros((strip_h + 2, 1, c), jnp.bfloat16)
        a = jnp.concatenate([zcol, rows, zcol], axis=1)               # (strip_h+2, W+2, C)

        # 9 per-tap accumulated matmuls -> no 9x im2col buffer in VMEM.
        acc = jnp.zeros((strip_h * w_img, c), jnp.float32)
        for ky in range(3):
            for kx in range(3):
                tap = a[ky:ky + strip_h, kx:kx + w_img, :].reshape(strip_h * w_img, c)
                acc = acc + jnp.dot(tap, w_ref[ky * 3 + kx],
                                    preferred_element_type=jnp.float32)

        y_ref[...] = acc.reshape(strip_h, w_img, c).astype(y_ref.dtype)
        s = jnp.sum(acc, axis=0, keepdims=True)
        sq = jnp.sum(acc * acc, axis=0, keepdims=True)
        stats_ref[...] = jnp.concatenate([s, sq], axis=0)[None, :, :]

    return kernel


def _conv3x3_stats(y1_nhwc, scale, shift, w2):
    n, h, w, c = y1_nhwc.shape
    strip_h = _choose_strip_h(h)
    ns = h // strip_h
    kernel = _conv3x3_stats_kernel_factory(strip_h, w, c)
    return pl.pallas_call(
        kernel,
        out_shape=(jax.ShapeDtypeStruct((n, h, w, c), jnp.bfloat16),
                   jax.ShapeDtypeStruct((n, ns, 2, c), jnp.float32)),
        grid=(n, ns),
        in_specs=[
            # halo row above the strip (clamped into the image; zeroed at s==0)
            pl.BlockSpec((None, 1, w, c),
                         lambda i, s: (i, jnp.maximum(s * strip_h - 1, 0), 0, 0)),
            # the strip body
            pl.BlockSpec((None, strip_h, w, c), lambda i, s: (i, s, 0, 0)),
            # halo row below the strip (clamped; zeroed at s==ns-1)
            pl.BlockSpec((None, 1, w, c),
                         lambda i, s: (i, jnp.minimum((s + 1) * strip_h, h - 1), 0, 0)),
            pl.BlockSpec((1, c), lambda i, s: (0, 0)),
            pl.BlockSpec((1, c), lambda i, s: (0, 0)),
            pl.BlockSpec((9, c, c), lambda i, s: (0, 0, 0)),
        ],
        out_specs=(pl.BlockSpec((None, strip_h, w, c), lambda i, s: (i, s, 0, 0)),
                   pl.BlockSpec((None, 1, 2, c), lambda i, s: (i, s, 0, 0))),
        compiler_params=_compiler_params(2),
    )(y1_nhwc, y1_nhwc, y1_nhwc, scale, shift, w2)


# ----------------- stage 3: fused BN2+ReLU -> conv3 (1x1) + BN3 partial stats -----------------
def _bn_relu_conv1x1_stats_kernel_factory(m_total, tm):
    ragged = (m_total % tm) != 0

    def kernel(x_ref, scale_ref, shift_ref, w_ref, y_ref, stats_ref):
        a = jnp.maximum(x_ref[...].astype(jnp.float32) * scale_ref[...] + shift_ref[...], 0.0)
        y = jnp.dot(a.astype(jnp.bfloat16), w_ref[...], preferred_element_type=jnp.float32)
        y_ref[...] = y.astype(y_ref.dtype)
        ys = y
        if ragged:
            row = jax.lax.broadcasted_iota(jnp.int32, y.shape, 0) + pl.program_id(0) * tm
            ys = jnp.where(row < m_total, y, 0.0)
        s = jnp.sum(ys, axis=0, keepdims=True)
        sq = jnp.sum(ys * ys, axis=0, keepdims=True)
        stats_ref[...] = jnp.concatenate([s, sq], axis=0)[None, :, :]

    return kernel


def _bn_relu_conv1x1_stats(x2d, scale, shift, w):
    m, cin = x2d.shape
    cout = w.shape[1]
    tm = _choose_tile_m(m)
    nt = (m + tm - 1) // tm
    return pl.pallas_call(
        _bn_relu_conv1x1_stats_kernel_factory(m, tm),
        out_shape=(jax.ShapeDtypeStruct((m, cout), jnp.bfloat16),
                   jax.ShapeDtypeStruct((nt, 2, cout), jnp.float32)),
        grid=(nt,),
        in_specs=[pl.BlockSpec((tm, cin), lambda i: (i, 0)),
                  pl.BlockSpec((1, cin), lambda i: (0, 0)),
                  pl.BlockSpec((1, cin), lambda i: (0, 0)),
                  pl.BlockSpec((cin, cout), lambda i: (0, 0))],
        out_specs=(pl.BlockSpec((tm, cout), lambda i: (i, 0)),
                   pl.BlockSpec((1, 2, cout), lambda i: (i, 0, 0))),
        compiler_params=_compiler_params(1),
    )(x2d, scale, shift, w)


# ---------------- stage 4: BN3 + ReLU (as in reference) + residual add + ReLU ----------------
def _bn_relu_add_relu_kernel(y_ref, scale_ref, shift_ref, id_ref, o_ref):
    t = jnp.maximum(y_ref[...].astype(jnp.float32) * scale_ref[...] + shift_ref[...], 0.0)
    o_ref[...] = jnp.maximum(t + id_ref[...].astype(jnp.float32), 0.0).astype(o_ref.dtype)


def _bn_relu_add_relu(y3, scale, shift, identity):
    m, c = y3.shape
    tm = _choose_tile_m(m)
    nt = (m + tm - 1) // tm
    return pl.pallas_call(
        _bn_relu_add_relu_kernel,
        out_shape=jax.ShapeDtypeStruct((m, c), jnp.bfloat16),   # bf16 halves write traffic
        grid=(nt,),
        in_specs=[pl.BlockSpec((tm, c), lambda i: (i, 0)),
                  pl.BlockSpec((1, c), lambda i: (0, 0)),
                  pl.BlockSpec((1, c), lambda i: (0, 0)),
                  pl.BlockSpec((tm, c), lambda i: (i, 0))],
        out_specs=pl.BlockSpec((tm, c), lambda i: (i, 0)),
        compiler_params=_compiler_params(1),
    )(y3, scale, shift, identity)


# ------------------------------------ BN finalize (JAX glue) ------------------------------------
def _bn_affine_from_stats(partial_stats, m_total, gamma, beta):
    """Fold one-pass partial (sum, sum_sq) into per-channel scale/shift (f32)."""
    # TODO(synk): one-pass E[x^2]-mean^2 can cancel for large M; a Welford-style
    # reduction would be safer at extreme scale.
    c = partial_stats.shape[-1]
    s = jnp.sum(partial_stats.reshape(-1, 2, c).astype(jnp.float32), axis=0)  # (2, C)
    mean = s[0] / m_total
    var = jnp.maximum(s[1] / m_total - mean * mean, 0.0)       # biased var, clamped
    scale = gamma * jax.lax.rsqrt(var + EPS)
    shift = beta - mean * scale
    return scale.reshape(1, -1).astype(jnp.float32), shift.reshape(1, -1).astype(jnp.float32)


# ------------------------------------- Bottleneck forward --------------------------------------
def bottleneck_forward(x_nchw, params):
    n, cin, h, w = x_nchw.shape
    width = params["w1"].shape[1]
    cout = params["w3"].shape[1]
    m = n * h * w
    assert cout == cin, "identity path requires Cout == Cin (downsample not implemented)"

    cin_p = _round_up(cin, LANE)
    wid_p = _round_up(width, LANE)
    cout_p = _round_up(cout, LANE)   # == cin_p because cout == cin

    # Pad weights / BN params to lane-dense shapes (zeros in the padding lanes).
    w1p = jnp.zeros((cin_p, wid_p), jnp.bfloat16).at[:cin, :width].set(
        params["w1"].astype(jnp.bfloat16))
    w2p = jnp.zeros((9, wid_p, wid_p), jnp.bfloat16).at[:, :width, :width].set(
        params["w2"].astype(jnp.bfloat16))
    w3p = jnp.zeros((wid_p, cout_p), jnp.bfloat16).at[:width, :cout].set(
        params["w3"].astype(jnp.bfloat16))
    g1 = jnp.zeros((wid_p,), jnp.float32).at[:width].set(params["g1"])
    b1 = jnp.zeros((wid_p,), jnp.float32).at[:width].set(params["b1"])
    g2 = jnp.zeros((wid_p,), jnp.float32).at[:width].set(params["g2"])
    b2 = jnp.zeros((wid_p,), jnp.float32).at[:width].set(params["b2"])
    g3 = jnp.zeros((cout_p,), jnp.float32).at[:cout].set(params["g3"])
    b3 = jnp.zeros((cout_p,), jnp.float32).at[:cout].set(params["b3"])

    # NCHW -> (M, C) channel-last, channel-padded, bf16 (one fused XLA pass).
    # Reused as the residual identity in stage 4 (cin_p == cout_p).
    x2d_p = jnp.zeros((m, cin_p), jnp.bfloat16).at[:, :cin].set(
        jnp.transpose(x_nchw, (0, 2, 3, 1)).reshape(m, cin).astype(jnp.bfloat16))

    # stage 1: conv1 (1x1) + BN1 partial stats
    y1, st1 = _conv1x1_stats(x2d_p, w1p)                       # (M, wid_p) bf16
    scale1, shift1 = _bn_affine_from_stats(st1, m, g1, b1)

    # stage 2: conv2 (3x3, pad=1) with fused BN1+ReLU on its input.
    # Reads the unpadded activation; the halo is synthesized in-kernel (no HBM pad pass).
    y2, st2 = _conv3x3_stats(y1.reshape(n, h, w, wid_p), scale1, shift1, w2p)
    scale2, shift2 = _bn_affine_from_stats(st2, m, g2, b2)

    # stage 3: conv3 (1x1) with fused BN2+ReLU on its input.
    y3, st3 = _bn_relu_conv1x1_stats(y2.reshape(m, wid_p), scale2, shift2, w3p)
    scale3, shift3 = _bn_affine_from_stats(st3, m, g3, b3)

    # stage 4: BN3 + ReLU (reference order) + residual add + ReLU (bf16 output).
    out_p = _bn_relu_add_relu(y3, scale3, shift3, x2d_p)       # (M, cout_p) bf16

    # Slice off channel padding and return NCHW f32 to match the module interface.
    # TODO(synk): NHWC/bf16 consumers could take out_p directly and skip this pass.
    out = out_p[:, :cout].reshape(n, h, w, cout).transpose(0, 3, 1, 2).astype(jnp.float32)
    return out


def init_params(key, inplanes, planes, base_width=64, groups=1, expansion=4):
    width = int(planes * (base_width / 64.0)) * groups
    cout = planes * expansion
    ks = jax.random.split(key, 9)
    return {
        "w1": 0.1 * jax.random.normal(ks[0], (inplanes, width), jnp.float32),
        "w2": 0.1 * jax.random.normal(ks[1], (9, width, width), jnp.float32),  # tap k = ky*3+kx
        "w3": 0.1 * jax.random.normal(ks[2], (width, cout), jnp.float32),
        "g1": 1.0 + 0.1 * jax.random.normal(ks[3], (width,), jnp.float32),
        "b1": 0.1 * jax.random.normal(ks[4], (width,), jnp.float32),
        "g2": 1.0 + 0.1 * jax.random.normal(ks[5], (width,), jnp.float32),
        "b2": 0.1 * jax.random.normal(ks[6], (width,), jnp.float32),
        "g3": 1.0 + 0.1 * jax.random.normal(ks[7], (cout,), jnp.float32),
        "b3": 0.1 * jax.random.normal(ks[8], (cout,), jnp.float32),
    }


if __name__ == "__main__":
    # Bottleneck(inplanes=16, planes=4): width=4, out channels = 16 = inplanes
    # (so the identity add is valid without a downsample branch).
    N, INPLANES, PLANES, H, W = 2, 16, 4, 16, 16

    key = jax.random.PRNGKey(0)
    k_param, k_x = jax.random.split(key)
    params = init_params(k_param, INPLANES, PLANES)
    x = jax.random.normal(k_x, (N, INPLANES, H, W), jnp.float32)

    fwd = jax.jit(bottleneck_forward)
    out = jax.block_until_ready(fwd(x, params))
    assert out.shape == (N, PLANES * 4, H, W)
    assert bool(jnp.all(jnp.isfinite(out)))
    print("KERNEL_OK")
</pallas_src>

<mosaic_0001>
module attributes {stable_mosaic.version = 11 : i64} {
  func.func @kernel(%arg0: i32, %arg1: memref<256x128xbf16, #tpu.memory_space<vmem>>, %arg2: memref<128x128xbf16, #tpu.memory_space<vmem>>, %arg3: memref<256x128xbf16, #tpu.memory_space<vmem>>, %arg4: memref<1x2x128xf32, #tpu.memory_space<vmem>>) attributes {dimension_semantics = [#tpu.dimension_semantics<parallel>], iteration_bounds = array<i64: 2>, scalar_prefetch = 0 : i64, scratch_operands = 0 : i64, tpu.core_type = #tpu.core_type<tc>, window_params = [{transform_indices = @transform_0, window_bounds = array<i64: 256, 128>}, {pipeline_mode = #tpu.pipeline_mode<synchronous>, transform_indices = @transform_1, window_bounds = array<i64: 128, 128>}, {transform_indices = @transform_2, window_bounds = array<i64: 256, 128>}, {transform_indices = @transform_3, window_bounds = array<i64: 1, 2, 128>}]} {
    %c0 = arith.constant 0 : index
    %c0_0 = arith.constant 0 : index
    %0 = vector.load %arg1[%c0, %c0_0] : memref<256x128xbf16, #tpu.memory_space<vmem>>, vector<256x128xbf16>
    %c0_1 = arith.constant 0 : index
    %c0_2 = arith.constant 0 : index
    %1 = vector.load %arg2[%c0_1, %c0_2] : memref<128x128xbf16, #tpu.memory_space<vmem>>, vector<128x128xbf16>
    %cst = arith.constant dense<0.000000e+00> : vector<256x128xf32>
    %2 = tpu.matmul %0, %1, %cst {dimension_numbers = #tpu.dot_dimension_numbers<[1], [0], [0], [1], [0, 0, 1, 1], [], []>} : vector<256x128xbf16>, vector<128x128xbf16>, vector<256x128xf32> -> vector<256x128xf32>
    %3 = arith.truncf %2 : vector<256x128xf32> to vector<256x128xbf16>
    %c0_3 = arith.constant 0 : index
    %c0_4 = arith.constant 0 : index
    %4 = vector.load %arg3[%c0_3, %c0_4] : memref<256x128xbf16, #tpu.memory_space<vmem>>, vector<256x128xbf16>
    tpu.vector_store %arg3[%c0_3, %c0_4], %3 {strides = array<i32>} : memref<256x128xbf16, #tpu.memory_space<vmem>>, vector<256x128xbf16>,
    %cst_5 = arith.constant dense<0.000000e+00> : vector<128xf32>
    %5 = vector.multi_reduction <add>, %2, %cst_5 [0] : vector<256x128xf32> to vector<128xf32>
    %6 = vector.shape_cast %5 : vector<128xf32> to vector<1x128xf32>
    %7 = arith.mulf %2, %2 : vector<256x128xf32>
    %cst_6 = arith.constant dense<0.000000e+00> : vector<128xf32>
    %8 = vector.multi_reduction <add>, %7, %cst_6 [0] : vector<256x128xf32> to vector<128xf32>
    %9 = vector.shape_cast %8 : vector<128xf32> to vector<1x128xf32>
    %10 = tpu.concatenate %6, %9 in 0 : vector<1x128xf32>, vector<1x128xf32> -> vector<2x128xf32>
    %11 = vector.shape_cast %10 : vector<2x128xf32> to vector<1x2x128xf32>
    %c0_7 = arith.constant 0 : index
    %c0_8 = arith.constant 0 : index
    %c0_9 = arith.constant 0 : index
    %12 = vector.load %arg4[%c0_7, %c0_8, %c0_9] : memref<1x2x128xf32, #tpu.memory_space<vmem>>, vector<1x2x128xf32>
    tpu.vector_store %arg4[%c0_7, %c0_8, %c0_9], %11 {strides = array<i32>} : memref<1x2x128xf32, #tpu.memory_space<vmem>>, vector<1x2x128xf32>,
    return
  }
  func.func @transform_0(%arg0: i32) -> (i32, i32) {
    %c0_i32 = arith.constant 0 : i32
    %c0_i32_0 = arith.constant 0 : i32
    return %arg0, %c0_i32 : i32, i32
  }
  func.func @transform_1(%arg0: i32) -> (i32, i32) {
    %c0_i32 = arith.constant 0 : i32
    %c0_i32_0 = arith.constant 0 : i32
    %c0_i32_1 = arith.constant 0 : i32
    return %c0_i32, %c0_i32_0 : i32, i32
  }
  func.func @transform_2(%arg0: i32) -> (i32, i32) {
    %c0_i32 = arith.constant 0 : i32
    %c0_i32_0 = arith.constant 0 : i32
    return %arg0, %c0_i32 : i32, i32
  }
  func.func @transform_3(%arg0: i32) -> (i32, i32, i32) {
    %c0_i32 = arith.constant 0 : i32
    %c0_i32_0 = arith.constant 0 : i32
    %c0_i32_1 = arith.constant 0 : i32
    return %arg0, %c0_i32, %c0_i32_0 : i32, i32, i32
  }
}

module attributes {stable_mosaic.version = 11 : i64} {
  func.func @kernel(%arg0: i32, %arg1: i32, %arg2: memref<1x1x16x128xbf16, #tpu.memory_space<vmem>>, %arg3: memref<1x8x16x128xbf16, #tpu.memory_space<vmem>>, %arg4: memref<1x1x16x128xbf16, #tpu.memory_space<vmem>>, %arg5: memref<1x128xf32, #tpu.memory_space<vmem>>, %arg6: memref<1x128xf32, #tpu.memory_space<vmem>>, %arg7: memref<9x128x128xbf16, #tpu.memory_space<vmem>>, %arg8: memref<1x8x16x128xbf16, #tpu.memory_space<vmem>>, %arg9: memref<1x1x2x128xf32, #tpu.memory_space<vmem>>) attributes {dimension_semantics = [#tpu.dimension_semantics<parallel>, #tpu.dimension_semantics<parallel>], iteration_bounds = array<i64: 2, 2>, scalar_prefetch = 0 : i64, scratch_operands = 0 : i64, tpu.core_type = #tpu.core_type<tc>, window_params = [{transform_indices = @transform_0, window_bounds = array<i64: 1, 1, 16, 128>}, {transform_indices = @transform_1, window_bounds = array<i64: 1, 8, 16, 128>}, {transform_indices = @transform_2, window_bounds = array<i64: 1, 1, 16, 128>}, {pipeline_mode = #tpu.pipeline_mode<synchronous>, transform_indices = @transform_3, window_bounds = array<i64: 1, 128>}, {pipeline_mode = #tpu.pipeline_mode<synchronous>, transform_indices = @transform_4, window_bounds = array<i64: 1, 128>}, {pipeline_mode = #tpu.pipeline_mode<synchronous>, transform_indices = @transform_5, window_bounds = array<i64: 9, 128, 128>}, {transform_indices = @transform_6, window_bounds = array<i64: 1, 8, 16, 128>}, {transform_indices = @transform_7, window_bounds = array<i64: 1, 1, 2, 128>}]} {
    %c0 = arith.constant 0 : index
    %c0_0 = arith.constant 0 : index
    %0 = vector.load %arg5[%c0, %c0_0] : memref<1x128xf32, #tpu.memory_space<vmem>>, vector<1x128xf32>
    %1 = vector.shape_cast %0 : vector<1x128xf32> to vector<1x1x128xf32>
    %c0_1 = arith.constant 0 : index
    %c0_2 = arith.constant 0 : index
    %2 = vector.load %arg6[%c0_1, %c0_2] : memref<1x128xf32, #tpu.memory_space<vmem>>, vector<1x128xf32>
    %3 = vector.shape_cast %2 : vector<1x128xf32> to vector<1x1x128xf32>
    %c0_3 = arith.constant 0 : index
    %c0_4 = arith.constant 0 : index
    %c0_5 = arith.constant 0 : index
    %c0_6 = arith.constant 0 : index
    %4 = vector.load %arg3[%c0_3, %c0_4, %c0_5, %c0_6] : memref<1x8x16x128xbf16, #tpu.memory_space<vmem>>, vector<1x8x16x128xbf16>
    %5 = vector.shape_cast %4 : vector<1x8x16x128xbf16> to vector<8x16x128xbf16>
    %6 = arith.extf %5 : vector<8x16x128xbf16> to vector<8x16x128xf32>
    %7 = vector.broadcast %1 : vector<1x1x128xf32> to vector<8x16x128xf32>
    %8 = arith.mulf %6, %7 : vector<8x16x128xf32>
    %9 = vector.broadcast %3 : vector<1x1x128xf32> to vector<8x16x128xf32>
    %10 = arith.addf %8, %9 : vector<8x16x128xf32>
    %cst = arith.constant 0.000000e+00 : f32
    %11 = vector.broadcast %cst : f32 to vector<8x16x128xf32>
    %12 = arith.maximumf %10, %11 : vector<8x16x128xf32>
    %13 = arith.truncf %12 : vector<8x16x128xf32> to vector<8x16x128xbf16>
    %c0_i32 = arith.constant 0 : i32
    %14 = arith.cmpi eq, %arg1, %c0_i32 : i32
    %c0_7 = arith.constant 0 : index
    %c0_8 = arith.constant 0 : index
    %c0_9 = arith.constant 0 : index
    %c0_10 = arith.constant 0 : index
    %15 = vector.load %arg2[%c0_7, %c0_8, %c0_9, %c0_10] : memref<1x1x16x128xbf16, #tpu.memory_space<vmem>>, vector<1x1x16x128xbf16>
    %16 = vector.shape_cast %15 : vector<1x1x16x128xbf16> to vector<1x16x128xbf16>
    %17 = arith.extf %16 : vector<1x16x128xbf16> to vector<1x16x128xf32>
    %18 = vector.broadcast %1 : vector<1x1x128xf32> to vector<1x16x128xf32>
    %19 = arith.mulf %17, %18 : vector<1x16x128xf32>
    %20 = vector.broadcast %3 : vector<1x1x128xf32> to vector<1x16x128xf32>
    %21 = arith.addf %19, %20 : vector<1x16x128xf32>
    %cst_11 = arith.constant 0.000000e+00 : f32
    %22 = vector.broadcast %cst_11 : f32 to vector<1x16x128xf32>
    %23 = arith.maximumf %21, %22 : vector<1x16x128xf32>
    %cst_12 = arith.constant 0.000000e+00 : f32
    %24 = vector.broadcast %cst_12 : f32 to vector<1x16x128xf32>
    %25 = arith.select %14, %24, %23 : vector<1x16x128xf32>
    %26 = arith.truncf %25 : vector<1x16x128xf32> to vector<1x16x128xbf16>
    %c1_i32 = arith.constant 1 : i32
    %27 = arith.cmpi eq, %arg1, %c1_i32 : i32
    %c0_13 = arith.constant 0 : index
    %c0_14 = arith.constant 0 : index
    %c0_15 = arith.constant 0 : index
    %c0_16 = arith.constant 0 : index
    %28 = vector.load %arg4[%c0_13, %c0_14, %c0_15, %c0_16] : memref<1x1x16x128xbf16, #tpu.memory_space<vmem>>, vector<1x1x16x128xbf16>
    %29 = vector.shape_cast %28 : vector<1x1x16x128xbf16> to vector<1x16x128xbf16>
    %30 = arith.extf %29 : vector<1x16x128xbf16> to vector<1x16x128xf32>
    %31 = vector.broadcast %1 : vector<1x1x128xf32> to vector<1x16x128xf32>
    %32 = arith.mulf %30, %31 : vector<1x16x128xf32>
    %33 = vector.broadcast %3 : vector<1x1x128xf32> to vector<1x16x128xf32>
    %34 = arith.addf %32, %33 : vector<1x16x128xf32>
    %cst_17 = arith.constant 0.000000e+00 : f32
    %35 = vector.broadcast %cst_17 : f32 to vector<1x16x128xf32>
    %36 = arith.maximumf %34, %35 : vector<1x16x128xf32>
    %cst_18 = arith.constant 0.000000e+00 : f32
    %37 = vector.broadcast %cst_18 : f32 to vector<1x16x128xf32>
    %38 = arith.select %27, %37, %36 : vector<1x16x128xf32>
    %39 = arith.truncf %38 : vector<1x16x128xf32> to vector<1x16x128xbf16>
    %40 = tpu.concatenate %26, %13, %39 in 0 : vector<1x16x128xbf16>, vector<8x16x128xbf16>, vector<1x16x128xbf16> -> vector<10x16x128xbf16>
    %cst_19 = arith.constant 0.000000e+00 : bf16
    %41 = vector.broadcast %cst_19 : bf16 to vector<10x1x128xbf16>
    %42 = tpu.concatenate %41, %40, %41 in 1 : vector<10x1x128xbf16>, vector<10x16x128xbf16>, vector<10x1x128xbf16> -> vector<10x18x128xbf16>
    %cst_20 = arith.constant 0.000000e+00 : f32
    %43 = vector.broadcast %cst_20 : f32 to vector<128x128xf32>
    %44 = vector.extract_strided_slice %42 {offsets = [0, 0, 0], sizes = [8, 16, 128], strides = [1, 1, 1]} : vector<10x18x128xbf16> to vector<8x16x128xbf16>
    %45 = vector.shape_cast %44 : vector<8x16x128xbf16> to vector<128x128xbf16>
    %c0_21 = arith.constant 0 : index
    %c0_22 = arith.constant 0 : index
    %c0_23 = arith.constant 0 : index
    %46 = vector.load %arg7[%c0_21, %c0_22, %c0_23] : memref<9x128x128xbf16, #tpu.memory_space<vmem>>, vector<1x128x128xbf16>
    %47 = vector.shape_cast %46 : vector<1x128x128xbf16> to vector<128x128xbf16>
    %cst_24 = arith.constant dense<0.000000e+00> : vector<128x128xf32>
    %48 = tpu.matmul %45, %47, %cst_24 {dimension_numbers = #tpu.dot_dimension_numbers<[1], [0], [0], [1], [0, 0, 1, 1], [], []>} : vector<128x128xbf16>, vector<128x128xbf16>, vector<128x128xf32> -> vector<128x128xf32>
    %49 = arith.addf %43, %48 : vector<128x128xf32>
    %50 = vector.extract_strided_slice %42 {offsets = [0, 1, 0], sizes = [8, 16, 128], strides = [1, 1, 1]} : vector<10x18x128xbf16> to vector<8x16x128xbf16>
    %51 = vector.shape_cast %50 : vector<8x16x128xbf16> to vector<128x128xbf16>
    %c1 = arith.constant 1 : index
    %c0_25 = arith.constant 0 : index
    %c0_26 = arith.constant 0 : index
    %52 = vector.load %arg7[%c1, %c0_25, %c0_26] : memref<9x128x128xbf16, #tpu.memory_space<vmem>>, vector<1x128x128xbf16>
    %53 = vector.shape_cast %52 : vector<1x128x128xbf16> to vector<128x128xbf16>
    %cst_27 = arith.constant dense<0.000000e+00> : vector<128x128xf32>
    %54 = tpu.matmul %51, %53, %cst_27 {dimension_numbers = #tpu.dot_dimension_numbers<[1], [0], [0], [1], [0, 0, 1, 1], [], []>} : vector<128x128xbf16>, vector<128x128xbf16>, vector<128x128xf32> -> vector<128x128xf32>
    %55 = arith.addf %49, %54 : vector<128x128xf32>
    %56 = vector.extract_strided_slice %42 {offsets = [0, 2, 0], sizes = [8, 16, 128], strides = [1, 1, 1]} : vector<10x18x128xbf16> to vector<8x16x128xbf16>
    %57 = vector.shape_cast %56 : vector<8x16x128xbf16> to vector<128x128xbf16>
    %c2 = arith.constant 2 : index
    %c0_28 = arith.constant 0 : index
    %c0_29 = arith.constant 0 : index
    %58 = vector.load %arg7[%c2, %c0_28, %c0_29] : memref<9x128x128xbf16, #tpu.memory_space<vmem>>, vector<1x128x128xbf16>
    %59 = vector.shape_cast %58 : vector<1x128x128xbf16> to vector<128x128xbf16>
    %cst_30 = arith.constant dense<0.000000e+00> : vector<128x128xf32>
    %60 = tpu.matmul %57, %59, %cst_30 {dimension_numbers = #tpu.dot_dimension_numbers<[1], [0], [0], [1], [0, 0, 1, 1], [], []>} : vector<128x128xbf16>, vector<128x128xbf16>, vector<128x128xf32> -> vector<128x128xf32>
    %61 = arith.addf %55, %60 : vector<128x128xf32>
    %62 = vector.extract_strided_slice %42 {offsets = [1, 0, 0], sizes = [8, 16, 128], strides = [1, 1, 1]} : vector<10x18x128xbf16> to vector<8x16x128xbf16>
    %63 = vector.shape_cast %62 : vector<8x16x128xbf16> to vector<128x128xbf16>
    %c3 = arith.constant 3 : index
    %c0_31 = arith.constant 0 : index
    %c0_32 = arith.constant 0 : index
    %64 = vector.load %arg7[%c3, %c0_31, %c0_32] : memref<9x128x128xbf16, #tpu.memory_space<vmem>>, vector<1x128x128xbf16>
    %65 = vector.shape_cast %64 : vector<1x128x128xbf16> to vector<128x128xbf16>
    %cst_33 = arith.constant dense<0.000000e+00> : vector<128x128xf32>
    %66 = tpu.matmul %63, %65, %cst_33 {dimension_numbers = #tpu.dot_dimension_numbers<[1], [0], [0], [1], [0, 0, 1, 1], [], []>} : vector<128x128xbf16>, vector<128x128xbf16>, vector<128x128xf32> -> vector<128x128xf32>
    %67 = arith.addf %61, %66 : vector<128x128xf32>
    %68 = vector.extract_strided_slice %42 {offsets = [1, 1, 0], sizes = [8, 16, 128], strides = [1, 1, 1]} : vector<10x18x128xbf16> to vector<8x16x128xbf16>
    %69 = vector.shape_cast %68 : vector<8x16x128xbf16> to vector<128x128xbf16>
    %c4 = arith.constant 4 : index
    %c0_34 = arith.constant 0 : index
    %c0_35 = arith.constant 0 : index
    %70 = vector.load %arg7[%c4, %c0_34, %c0_35] : memref<9x128x128xbf16, #tpu.memory_space<vmem>>, vector<1x128x128xbf16>
    %71 = vector.shape_cast %70 : vector<1x128x128xbf16> to vector<128x128xbf16>
    %cst_36 = arith.constant dense<0.000000e+00> : vector<128x128xf32>
    %72 = tpu.matmul %69, %71, %cst_36 {dimension_numbers = #tpu.dot_dimension_numbers<[1], [0], [0], [1], [0, 0, 1, 1], [], []>} : vector<128x128xbf16>, vector<128x128xbf16>, vector<128x128xf32> -> vector<128x128xf32>
    %73 = arith.addf %67, %72 : vector<128x128xf32>
    %74 = vector.extract_strided_slice %42 {offsets = [1, 2, 0], sizes = [8, 16, 128], strides = [1, 1, 1]} : vector<10x18x128xbf16> to vector<8x16x128xbf16>
    %75 = vector.shape_cast %74 : vector<8x16x128xbf16> to vector<128x128xbf16>
    %c5 = arith.constant 5 : index
    %c0_37 = arith.constant 0 : index
    %c0_38 = arith.constant 0 : index
    %76 = vector.load %arg7[%c5, %c0_37, %c0_38] : memref<9x128x128xbf16, #tpu.memory_space<vmem>>, vector<1x128x128xbf16>
    %77 = vector.shape_cast %76 : vector<1x128x128xbf16> to vector<128x128xbf16>
    %cst_39 = arith.constant dense<0.000000e+00> : vector<128x128xf32>
    %78 = tpu.matmul %75, %77, %cst_39 {dimension_numbers = #tpu.dot_dimension_numbers<[1], [0], [0], [1], [0, 0, 1, 1], [], []>} : vector<128x128xbf16>, vector<128x128xbf16>, vector<128x128xf32> -> vector<128x128xf32>
    %79 = arith.addf %73, %78 : vector<128x128xf32>
    %80 = vector.extract_strided_slice %42 {offsets = [2, 0, 0], sizes = [8, 16, 128], strides = [1, 1, 1]} : vector<10x18x128xbf16> to vector<8x16x128xbf16>
    %81 = vector.shape_cast %80 : vector<8x16x128xbf16> to vector<128x128xbf16>
    %c6 = arith.constant 6 : index
    %c0_40 = arith.constant 0 : index
    %c0_41 = arith.constant 0 : index
    %82 = vector.load %arg7[%c6, %c0_40, %c0_41] : memref<9x128x128xbf16, #tpu.memory_space<vmem>>, vector<1x128x128xbf16>
    %83 = vector.shape_cast %82 : vector<1x128x128xbf16> to vector<128x128xbf16>
    %cst_42 = arith.constant dense<0.000000e+00> : vector<128x128xf32>
    %84 = tpu.matmul %81, %83, %cst_42 {dimension_numbers = #tpu.dot_dimension_numbers<[1], [0], [0], [1], [0, 0, 1, 1], [], []>} : vector<128x128xbf16>, vector<128x128xbf16>, vector<128x128xf32> -> vector<128x128xf32>
    %85 = arith.addf %79, %84 : vector<128x128xf32>
    %86 = vector.extract_strided_slice %42 {offsets = [2, 1, 0], sizes = [8, 16, 128], strides = [1, 1, 1]} : vector<10x18x128xbf16> to vector<8x16x128xbf16>
    %87 = vector.shape_cast %86 : vector<8x16x128xbf16> to vector<128x128xbf16>
    %c7 = arith.constant 7 : index
    %c0_43 = arith.constant 0 : index
    %c0_44 = arith.constant 0 : index
    %88 = vector.load %arg7[%c7, %c0_43, %c0_44] : memref<9x128x128xbf16, #tpu.memory_space<vmem>>, vector<1x128x128xbf16>
    %89 = vector.shape_cast %88 : vector<1x128x128xbf16> to vector<128x128xbf16>
    %cst_45 = arith.constant dense<0.000000e+00> : vector<128x128xf32>
    %90 = tpu.matmul %87, %89, %cst_45 {dimension_numbers = #tpu.dot_dimension_numbers<[1], [0], [0], [1], [0, 0, 1, 1], [], []>} : vector<128x128xbf16>, vector<128x128xbf16>, vector<128x128xf32> -> vector<128x128xf32>
    %91 = arith.addf %85, %90 : vector<128x128xf32>
    %92 = vector.extract_strided_slice %42 {offsets = [2, 2, 0], sizes = [8, 16, 128], strides = [1, 1, 1]} : vector<10x18x128xbf16> to vector<8x16x128xbf16>
    %93 = vector.shape_cast %92 : vector<8x16x128xbf16> to vector<128x128xbf16>
    %c8 = arith.constant 8 : index
    %c0_46 = arith.constant 0 : index
    %c0_47 = arith.constant 0 : index
    %94 = vector.load %arg7[%c8, %c0_46, %c0_47] : memref<9x128x128xbf16, #tpu.memory_space<vmem>>, vector<1x128x128xbf16>
    %95 = vector.shape_cast %94 : vector<1x128x128xbf16> to vector<128x128xbf16>
    %cst_48 = arith.constant dense<0.000000e+00> : vector<128x128xf32>
    %96 = tpu.matmul %93, %95, %cst_48 {dimension_numbers = #tpu.dot_dimension_numbers<[1], [0], [0], [1], [0, 0, 1, 1], [], []>} : vector<128x128xbf16>, vector<128x128xbf16>, vector<128x128xf32> -> vector<128x128xf32>
    %97 = arith.addf %91, %96 : vector<128x128xf32>
    %98 = vector.shape_cast %97 : vector<128x128xf32> to vector<8x16x128xf32>
    %99 = arith.truncf %98 : vector<8x16x128xf32> to vector<8x16x128xbf16>
    %c0_49 = arith.constant 0 : index
    %c0_50 = arith.constant 0 : index
    %c0_51 = arith.constant 0 : index
    %c0_52 = arith.constant 0 : index
    %100 = vector.load %arg8[%c0_49, %c0_50, %c0_51, %c0_52] : memref<1x8x16x128xbf16, #tpu.memory_space<vmem>>, vector<1x8x16x128xbf16>
    %101 = vector.shape_cast %100 : vector<1x8x16x128xbf16> to vector<8x16x128xbf16>
    %102 = vector.shape_cast %99 : vector<8x16x128xbf16> to vector<1x8x16x128xbf16>
    tpu.vector_store %arg8[%c0_49, %c0_50, %c0_51, %c0_52], %102 {strides = array<i32>} : memref<1x8x16x128xbf16, #tpu.memory_space<vmem>>, vector<1x8x16x128xbf16>,
    %cst_53 = arith.constant dense<0.000000e+00> : vector<128xf32>
    %103 = vector.multi_reduction <add>, %97, %cst_53 [0] : vector<128x128xf32> to vector<128xf32>
    %104 = vector.shape_cast %103 : vector<128xf32> to vector<1x128xf32>
    %105 = arith.mulf %97, %97 : vector<128x128xf32>
    %cst_54 = arith.constant dense<0.000000e+00> : vector<128xf32>
    %106 = vector.multi_reduction <add>, %105, %cst_54 [0] : vector<128x128xf32> to vector<128xf32>
    %107 = vector.shape_cast %106 : vector<128xf32> to vector<1x128xf32>
    %108 = tpu.concatenate %104, %107 in 0 : vector<1x128xf32>, vector<1x128xf32> -> vector<2x128xf32>
    %109 = vector.shape_cast %108 : vector<2x128xf32> to vector<1x2x128xf32>
    %c0_55 = arith.constant 0 : index
    %c0_56 = arith.constant 0 : index
    %c0_57 = arith.constant 0 : index
    %c0_58 = arith.constant 0 : index
    %110 = vector.load %arg9[%c0_55, %c0_56, %c0_57, %c0_58] : memref<1x1x2x128xf32, #tpu.memory_space<vmem>>, vector<1x1x2x128xf32>
    %111 = vector.shape_cast %110 : vector<1x1x2x128xf32> to vector<1x2x128xf32>
    %112 = vector.shape_cast %109 : vector<1x2x128xf32> to vector<1x1x2x128xf32>
    tpu.vector_store %arg9[%c0_55, %c0_56, %c0_57, %c0_58], %112 {strides = array<i32>} : memref<1x1x2x128xf32, #tpu.memory_space<vmem>>, vector<1x1x2x128xf32>,
    return
  }
  func.func @transform_0(%arg0: i32, %arg1: i32) -> (i32, i32, i32, i32) {
    %c8_i32 = arith.constant 8 : i32
    %0 = arith.muli %arg1, %c8_i32 : i32
    %c1_i32 = arith.constant 1 : i32
    %1 = arith.subi %0, %c1_i32 : i32
    %c0_i32 = arith.constant 0 : i32
    %2 = arith.maxsi %1, %c0_i32 : i32
    %c0_i32_0 = arith.constant 0 : i32
    %c0_i32_1 = arith.constant 0 : i32
    %c0_i32_2 = arith.constant 0 : i32
    return %arg0, %2, %c0_i32_0, %c0_i32_1 : i32, i32, i32, i32
  }
  func.func @transform_1(%arg0: i32, %arg1: i32) -> (i32, i32, i32, i32) {
    %c0_i32 = arith.constant 0 : i32
    %c0_i32_0 = arith.constant 0 : i32
    %c0_i32_1 = arith.constant 0 : i32
    return %arg0, %arg1, %c0_i32, %c0_i32_0 : i32, i32, i32, i32
  }
  func.func @transform_2(%arg0: i32, %arg1: i32) -> (i32, i32, i32, i32) {
    %c1_i32 = arith.constant 1 : i32
    %0 = arith.addi %arg1, %c1_i32 : i32
    %c8_i32 = arith.constant 8 : i32
    %1 = arith.muli %0, %c8_i32 : i32
    %c15_i32 = arith.constant 15 : i32
    %2 = arith.minsi %1, %c15_i32 : i32
    %c0_i32 = arith.constant 0 : i32
    %c0_i32_0 = arith.constant 0 : i32
    %c0_i32_1 = arith.constant 0 : i32
    return %arg0, %2, %c0_i32, %c0_i32_0 : i32, i32, i32, i32
  }
  func.func @transform_3(%arg0: i32, %arg1: i32) -> (i32, i32) {
    %c0_i32 = arith.constant 0 : i32
    %c0_i32_0 = arith.constant 0 : i32
    %c0_i32_1 = arith.constant 0 : i32
    return %c0_i32, %c0_i32_0 : i32, i32
  }
  func.func @transform_4(%arg0: i32, %arg1: i32) -> (i32, i32) {
    %c0_i32 = arith.constant 0 : i32
    %c0_i32_0 = arith.constant 0 : i32
    %c0_i32_1 = arith.constant 0 : i32
    return %c0_i32, %c0_i32_0 : i32, i32
  }
  func.func @transform_5(%arg0: i32, %arg1: i32) -> (i32, i32, i32) {
    %c0_i32 = arith.constant 0 : i32
    %c0_i32_0 = arith.constant 0 : i32
    %c0_i32_1 = arith.constant 0 : i32
    %c0_i32_2 = arith.constant 0 : i32
    return %c0_i32, %c0_i32_0, %c0_i32_1 : i32, i32, i32
  }
  func.func @transform_6(%arg0: i32, %arg1: i32) -> (i32, i32, i32, i32) {
    %c0_i32 = arith.constant 0 : i32
    %c0_i32_0 = arith.constant 0 : i32
    %c0_i32_1 = arith.constant 0 : i32
    return %arg0, %arg1, %c0_i32, %c0_i32_0 : i32, i32, i32, i32
  }
  func.func @transform_7(%arg0: i32, %arg1: i32) -> (i32, i32, i32, i32) {
    %c0_i32 = arith.constant 0 : i32
    %c0_i32_0 = arith.constant 0 : i32
    %c0_i32_1 = arith.constant 0 : i32
    return %arg0, %arg1, %c0_i32, %c0_i32_0 : i32, i32, i32, i32
  }
}

module attributes {stable_mosaic.version = 11 : i64} {
  func.func @kernel(%arg0: i32, %arg1: memref<256x128xbf16, #tpu.memory_space<vmem>>, %arg2: memref<1x128xf32, #tpu.memory_space<vmem>>, %arg3: memref<1x128xf32, #tpu.memory_space<vmem>>, %arg4: memref<128x128xbf16, #tpu.memory_space<vmem>>, %arg5: memref<256x128xbf16, #tpu.memory_space<vmem>>, %arg6: memref<1x2x128xf32, #tpu.memory_space<vmem>>) attributes {dimension_semantics = [#tpu.dimension_semantics<parallel>], iteration_bounds = array<i64: 2>, scalar_prefetch = 0 : i64, scratch_operands = 0 : i64, tpu.core_type = #tpu.core_type<tc>, window_params = [{transform_indices = @transform_0, window_bounds = array<i64: 256, 128>}, {pipeline_mode = #tpu.pipeline_mode<synchronous>, transform_indices = @transform_1, window_bounds = array<i64: 1, 128>}, {pipeline_mode = #tpu.pipeline_mode<synchronous>, transform_indices = @transform_2, window_bounds = array<i64: 1, 128>}, {pipeline_mode = #tpu.pipeline_mode<synchronous>, transform_indices = @transform_3, window_bounds = array<i64: 128, 128>}, {transform_indices = @transform_4, window_bounds = array<i64: 256, 128>}, {transform_indices = @transform_5, window_bounds = array<i64: 1, 2, 128>}]} {
    %c0 = arith.constant 0 : index
    %c0_0 = arith.constant 0 : index
    %0 = vector.load %arg1[%c0, %c0_0] : memref<256x128xbf16, #tpu.memory_space<vmem>>, vector<256x128xbf16>
    %1 = arith.extf %0 : vector<256x128xbf16> to vector<256x128xf32>
    %c0_1 = arith.constant 0 : index
    %c0_2 = arith.constant 0 : index
    %2 = vector.load %arg2[%c0_1, %c0_2] : memref<1x128xf32, #tpu.memory_space<vmem>>, vector<1x128xf32>
    %3 = vector.broadcast %2 : vector<1x128xf32> to vector<256x128xf32>
    %4 = arith.mulf %1, %3 : vector<256x128xf32>
    %c0_3 = arith.constant 0 : index
    %c0_4 = arith.constant 0 : index
    %5 = vector.load %arg3[%c0_3, %c0_4] : memref<1x128xf32, #tpu.memory_space<vmem>>, vector<1x128xf32>
    %6 = vector.broadcast %5 : vector<1x128xf32> to vector<256x128xf32>
    %7 = arith.addf %4, %6 : vector<256x128xf32>
    %cst = arith.constant 0.000000e+00 : f32
    %8 = vector.broadcast %cst : f32 to vector<256x128xf32>
    %9 = arith.maximumf %7, %8 : vector<256x128xf32>
    %10 = arith.truncf %9 : vector<256x128xf32> to vector<256x128xbf16>
    %c0_5 = arith.constant 0 : index
    %c0_6 = arith.constant 0 : index
    %11 = vector.load %arg4[%c0_5, %c0_6] : memref<128x128xbf16, #tpu.memory_space<vmem>>, vector<128x128xbf16>
    %cst_7 = arith.constant dense<0.000000e+00> : vector<256x128xf32>
    %12 = tpu.matmul %10, %11, %cst_7 {dimension_numbers = #tpu.dot_dimension_numbers<[1], [0], [0], [1], [0, 0, 1, 1], [], []>} : vector<256x128xbf16>, vector<128x128xbf16>, vector<256x128xf32> -> vector<256x128xf32>
    %13 = arith.truncf %12 : vector<256x128xf32> to vector<256x128xbf16>
    %c0_8 = arith.constant 0 : index
    %c0_9 = arith.constant 0 : index
    %14 = vector.load %arg5[%c0_8, %c0_9] : memref<256x128xbf16, #tpu.memory_space<vmem>>, vector<256x128xbf16>
    tpu.vector_store %arg5[%c0_8, %c0_9], %13 {strides = array<i32>} : memref<256x128xbf16, #tpu.memory_space<vmem>>, vector<256x128xbf16>,
    %cst_10 = arith.constant dense<0.000000e+00> : vector<128xf32>
    %15 = vector.multi_reduction <add>, %12, %cst_10 [0] : vector<256x128xf32> to vector<128xf32>
    %16 = vector.shape_cast %15 : vector<128xf32> to vector<1x128xf32>
    %17 = arith.mulf %12, %12 : vector<256x128xf32>
    %cst_11 = arith.constant dense<0.000000e+00> : vector<128xf32>
    %18 = vector.multi_reduction <add>, %17, %cst_11 [0] : vector<256x128xf32> to vector<128xf32>
    %19 = vector.shape_cast %18 : vector<128xf32> to vector<1x128xf32>
    %20 = tpu.concatenate %16, %19 in 0 : vector<1x128xf32>, vector<1x128xf32> -> vector<2x128xf32>
    %21 = vector.shape_cast %20 : vector<2x128xf32> to vector<1x2x128xf32>
    %c0_12 = arith.constant 0 : index
    %c0_13 = arith.constant 0 : index
    %c0_14 = arith.constant 0 : index
    %22 = vector.load %arg6[%c0_12, %c0_13, %c0_14] : memref<1x2x128xf32, #tpu.memory_space<vmem>>, vector<1x2x128xf32>
    tpu.vector_store %arg6[%c0_12, %c0_13, %c0_14], %21 {strides = array<i32>} : memref<1x2x128xf32, #tpu.memory_space<vmem>>, vector<1x2x128xf32>,
    return
  }
  func.func @transform_0(%arg0: i32) -> (i32, i32) {
    %c0_i32 = arith.constant 0 : i32
    %c0_i32_0 = arith.constant 0 : i32
    return %arg0, %c0_i32 : i32, i32
  }
  func.func @transform_1(%arg0: i32) -> (i32, i32) {
    %c0_i32 = arith.constant 0 : i32
    %c0_i32_0 = arith.constant 0 : i32
    %c0_i32_1 = arith.constant 0 : i32
    return %c0_i32, %c0_i32_0 : i32, i32
  }
  func.func @transform_2(%arg0: i32) -> (i32, i32) {
    %c0_i32 = arith.constant 0 : i32
    %c0_i32_0 = arith.constant 0 : i32
    %c0_i32_1 = arith.constant 0 : i32
    return %c0_i32, %c0_i32_0 : i32, i32
  }
  func.func @transform_3(%arg0: i32) -> (i32, i32) {
    %c0_i32 = arith.constant 0 : i32
    %c0_i32_0 = arith.constant 0 : i32
    %c0_i32_1 = arith.constant 0 : i32
    return %c0_i32, %c0_i32_0 : i32, i32
  }
  func.func @transform_4(%arg0: i32) -> (i32, i32) {
    %c0_i32 = arith.constant 0 : i32
    %c0_i32_0 = arith.constant 0 : i32
    return %arg0, %c0_i32 : i32, i32
  }
  func.func @transform_5(%arg0: i32) -> (i32, i32, i32) {
    %c0_i32 = arith.constant 0 : i32
    %c0_i32_0 = arith.constant 0 : i32
    %c0_i32_1 = arith.constant 0 : i32
    return %arg0, %c0_i32, %c0_i32_0 : i32, i32, i32
  }
}

module attributes {stable_mosaic.version = 11 : i64} {
  func.func @_bn_relu_add_relu_kernel(%arg0: i32, %arg1: memref<256x128xbf16, #tpu.memory_space<vmem>>, %arg2: memref<1x128xf32, #tpu.memory_space<vmem>>, %arg3: memref<1x128xf32, #tpu.memory_space<vmem>>, %arg4: memref<256x128xbf16, #tpu.memory_space<vmem>>, %arg5: memref<256x128xbf16, #tpu.memory_space<vmem>>) attributes {dimension_semantics = [#tpu.dimension_semantics<parallel>], iteration_bounds = array<i64: 2>, scalar_prefetch = 0 : i64, scratch_operands = 0 : i64, tpu.core_type = #tpu.core_type<tc>, window_params = [{transform_indices = @transform_0, window_bounds = array<i64: 256, 128>}, {pipeline_mode = #tpu.pipeline_mode<synchronous>, transform_indices = @transform_1, window_bounds = array<i64: 1, 128>}, {pipeline_mode = #tpu.pipeline_mode<synchronous>, transform_indices = @transform_2, window_bounds = array<i64: 1, 128>}, {transform_indices = @transform_3, window_bounds = array<i64: 256, 128>}, {transform_indices = @transform_4, window_bounds = array<i64: 256, 128>}]} {
    %c0 = arith.constant 0 : index
    %c0_0 = arith.constant 0 : index
    %0 = vector.load %arg1[%c0, %c0_0] : memref<256x128xbf16, #tpu.memory_space<vmem>>, vector<256x128xbf16>
    %1 = arith.extf %0 : vector<256x128xbf16> to vector<256x128xf32>
    %c0_1 = arith.constant 0 : index
    %c0_2 = arith.constant 0 : index
    %2 = vector.load %arg2[%c0_1, %c0_2] : memref<1x128xf32, #tpu.memory_space<vmem>>, vector<1x128xf32>
    %3 = vector.broadcast %2 : vector<1x128xf32> to vector<256x128xf32>
    %4 = arith.mulf %1, %3 : vector<256x128xf32>
    %c0_3 = arith.constant 0 : index
    %c0_4 = arith.constant 0 : index
    %5 = vector.load %arg3[%c0_3, %c0_4] : memref<1x128xf32, #tpu.memory_space<vmem>>, vector<1x128xf32>
    %6 = vector.broadcast %5 : vector<1x128xf32> to vector<256x128xf32>
    %7 = arith.addf %4, %6 : vector<256x128xf32>
    %cst = arith.constant 0.000000e+00 : f32
    %8 = vector.broadcast %cst : f32 to vector<256x128xf32>
    %9 = arith.maximumf %7, %8 : vector<256x128xf32>
    %c0_5 = arith.constant 0 : index
    %c0_6 = arith.constant 0 : index
    %10 = vector.load %arg4[%c0_5, %c0_6] : memref<256x128xbf16, #tpu.memory_space<vmem>>, vector<256x128xbf16>
    %11 = arith.extf %10 : vector<256x128xbf16> to vector<256x128xf32>
    %12 = arith.addf %9, %11 : vector<256x128xf32>
    %cst_7 = arith.constant 0.000000e+00 : f32
    %13 = vector.broadcast %cst_7 : f32 to vector<256x128xf32>
    %14 = arith.maximumf %12, %13 : vector<256x128xf32>
    %15 = arith.truncf %14 : vector<256x128xf32> to vector<256x128xbf16>
    %c0_8 = arith.constant 0 : index
    %c0_9 = arith.constant 0 : index
    %16 = vector.load %arg5[%c0_8, %c0_9] : memref<256x128xbf16, #tpu.memory_space<vmem>>, vector<256x128xbf16>
    tpu.vector_store %arg5[%c0_8, %c0_9], %15 {strides = array<i32>} : memref<256x128xbf16, #tpu.memory_space<vmem>>, vector<256x128xbf16>,
    return
  }
  func.func @transform_0(%arg0: i32) -> (i32, i32) {
    %c0_i32 = arith.constant 0 : i32
    %c0_i32_0 = arith.constant 0 : i32
    return %arg0, %c0_i32 : i32, i32
  }
  func.func @transform_1(%arg0: i32) -> (i32, i32) {
    %c0_i32 = arith.constant 0 : i32
    %c0_i32_0 = arith.constant 0 : i32
    %c0_i32_1 = arith.constant 0 : i32
    return %c0_i32, %c0_i32_0 : i32, i32
  }
  func.func @transform_2(%arg0: i32) -> (i32, i32) {
    %c0_i32 = arith.constant 0 : i32
    %c0_i32_0 = arith.constant 0 : i32
    %c0_i32_1 = arith.constant 0 : i32
    return %c0_i32, %c0_i32_0 : i32, i32
  }
  func.func @transform_3(%arg0: i32) -> (i32, i32) {
    %c0_i32 = arith.constant 0 : i32
    %c0_i32_0 = arith.constant 0 : i32
    return %arg0, %c0_i32 : i32, i32
  }
  func.func @transform_4(%arg0: i32) -> (i32, i32) {
    %c0_i32 = arith.constant 0 : i32
    %c0_i32_0 = arith.constant 0 : i32
    return %arg0, %c0_i32 : i32, i32
  }
}

</mosaic_0001>

<bundles_post_ra>
// kernel: bottleneck_forward.4
= control target key start
LH: loop header
LB: loop body
LE: loop exit
PB: predicated region body
PF: predicated region fallthrough
CT: control target
= control target key end

     0   :  { %s1013_s12 = smov 0   ;;  %s1219_s0 = inlined_call_operand.vmem [shape: bf16[512,128], index: 0, kind: input, shape index: {}]   ;;  %s1220_s1 = inlined_call_operand.vmem [shape: bf16[128,128], index: 1, kind: input, shape index: {}]   ;;  %s1221_s2 = inlined_call_operand.vmem [shape: bf16[512,128], index: 2, kind: output, shape index: {0}]   ;;  %s1222_s3 = inlined_call_operand.vmem [shape: f32[2,2,128], index: 3, kind: output, shape index: {1}]  }
   0x1 LB: > { %s1019_s13 = sadd.s32 4294967295, %s991_s12   ;;  %p730_p0 = scmp.ge.s32.totalorder %s991_s12, 1  ;;  %s991_s12 = sphi %s1013_s12, %s14_s12  }
   0x2   : > { %p141_p1 = scmp.lt.s32.totalorder %s991_s12, 3 }
   0x4   : > { %p142_p2 = pnand %p730_p0, %p141_p1 }
   0x5   : > { %s731_s22 = sshll.u32 (!%p142_p2), %s1019_s13, 5  ;;  %p181_p4 = scmp.lt.s32.totalorder (!%p142_p2), %s1019_s13, 1 }
   0x6   : > { %145 = sbr.rel (%p142_p2) target bundleno = 291 (0x123), region = 28  ;;  %p170_p3 = scmp.lt.s32.totalorder (!%p142_p2), %s731_s22, 63 }
   0xb   : > { %v857_v0 = vld [vmem:[%s1220_s1 + $0x38] sm:$0xff]  ;;  %v856_v1 = vld [vmem:[%s1220_s1 + $0x30] sm:$0xff]  ;;  %v855_v2 = vld [vmem:[%s1220_s1 + $0x28] sm:$0xff]  ;;  %s1224_s22 = smov (!%p170_p3, %s731_s22), 63  ;;  %s1226_s13 = smov (!%p181_p4, %s1019_s13), 1  ;;  %vm636_vm0 = vcmask 1040384  }
   0xc   : > { %377 = vmatpush.bf16.msra.mxu0 %v857_v0  ;;  %953 = vmatpush.bf16.msra.mxu1 %v857_v0  ;;  %v854_v3 = vld [vmem:[%s1220_s1 + $0x20] sm:$0xff]  ;;  %v853_v4 = vld [vmem:[%s1220_s1 + $0x18] sm:$0xff]  ;;  %v852_v5 = vld [vmem:[%s1220_s1 + $0x10] sm:$0xff]  ;;  %s732_s29 = sshll.u32 %s1224_s22, 2  ;;  %s735_s11 = sshll.u32 %s1226_s13, 1 }
   0xd   : > { %954 = vmatpush.bf16.msra.mxu2 %v857_v0  ;;  %955 = vmatpush.bf16.msra.mxu3 %v857_v0  ;;  %v851_v6 = vld [vmem:[%s1220_s1 + $0x8] sm:$0xff]  ;;  %v850_v7 = vld [vmem:[%s1220_s1] sm:$0xff]  ;;  %s1056_s7 = scalar_lea.vmem %s1219_s0, %s732_s29  ;;  %s1083_s10 = scalar_lea.vmem %s1221_s2, %s732_s29 }
   0xe   : > { %v834_v8 = vld [vmem:[%s1056_s7] sm:$0xff]  ;;  %v835_v12 = vld [vmem:[%s1056_s7 + $0x8] sm:$0xff]  ;;  %v836_v16 = vld [vmem:[%s1056_s7 + $0x10] sm:$0xff]  ;;  %s184_s16 = scalar_lea.vmem %s1222_s3, %s735_s11 }
   0xf   : > { %v838_v9 = vld [vmem:[%s1056_s7 + $0x20] sm:$0xff]  ;;  %v839_v13 = vld [vmem:[%s1056_s7 + $0x28] sm:$0xff]  ;;  %v840_v17 = vld [vmem:[%s1056_s7 + $0x30] sm:$0xff] }
  0x10   : > { %378 = vmatpush.bf16.msra.mxu0 %v856_v1  ;;  %956 = vmatpush.bf16.msra.mxu1 %v856_v1  ;;  %v842_v10 = vld [vmem:[%s1056_s7 + $0x40] sm:$0xff]  ;;  %v843_v14 = vld [vmem:[%s1056_s7 + $0x48] sm:$0xff]  ;;  %v844_v18 = vld [vmem:[%s1056_s7 + $0x50] sm:$0xff] }
  0x11   : > { %957 = vmatpush.bf16.msra.mxu2 %v856_v1  ;;  %958 = vmatpush.bf16.msra.mxu3 %v856_v1  ;;  %v846_v11 = vld [vmem:[%s1056_s7 + $0x60] sm:$0xff]  ;;  %v847_v15 = vld [vmem:[%s1056_s7 + $0x68] sm:$0xff]  ;;  %v848_v19 = vld [vmem:[%s1056_s7 + $0x70] sm:$0xff] }
  0x12   : > { %v837_v20 = vld [vmem:[%s1056_s7 + $0x18] sm:$0xff] }
  0x13   : > { %v841_v21 = vld [vmem:[%s1056_s7 + $0x38] sm:$0xff] }
  0x14   : > { %379 = vmatpush.bf16.msra.mxu0 %v855_v2  ;;  %959 = vmatpush.bf16.msra.mxu1 %v855_v2  ;;  %v845_v22 = vld [vmem:[%s1056_s7 + $0x58] sm:$0xff] }
  0x15   : > { %960 = vmatpush.bf16.msra.mxu2 %v855_v2  ;;  %961 = vmatpush.bf16.msra.mxu3 %v855_v2  ;;  %v849_v23 = vld [vmem:[%s1056_s7 + $0x78] sm:$0xff] }
  0x18   : > { %380 = vmatpush.bf16.msra.mxu0 %v854_v3  ;;  %962 = vmatpush.bf16.msra.mxu1 %v854_v3 }
  0x19   : > { %963 = vmatpush.bf16.msra.mxu2 %v854_v3  ;;  %964 = vmatpush.bf16.msra.mxu3 %v854_v3 }
  0x1c   : > { %381 = vmatpush.bf16.msra.mxu0 %v853_v4  ;;  %965 = vmatpush.bf16.msra.mxu1 %v853_v4 }
  0x1d   : > { %966 = vmatpush.bf16.msra.mxu2 %v853_v4  ;;  %967 = vmatpush.bf16.msra.mxu3 %v853_v4 }
  0x20   : > { %382 = vmatpush.bf16.msra.mxu0 %v852_v5  ;;  %968 = vmatpush.bf16.msra.mxu1 %v852_v5 }
  0x21   : > { %969 = vmatpush.bf16.msra.mxu2 %v852_v5  ;;  %970 = vmatpush.bf16.msra.mxu3 %v852_v5 }
  0x24   : > { %383 = vmatpush.bf16.msra.mxu0 %v851_v6  ;;  %971 = vmatpush.bf16.msra.mxu1 %v851_v6 }
  0x25   : > { %972 = vmatpush.bf16.msra.mxu2 %v851_v6  ;;  %973 = vmatpush.bf16.msra.mxu3 %v851_v6 }
  0x28   : > { %384 = vmatpush.bf16.msra.mxu0 %v850_v7  ;;  %974 = vmatpush.bf16.msra.mxu1 %v850_v7 }
  0x29   : > { %975 = vmatpush.bf16.msra.mxu2 %v850_v7  ;;  %976 = vmatpush.bf16.msra.mxu3 %v850_v7 }
  0x2b   : > { %385 = vmatmul.bf16.vlgmr.msra.gmra.mxu0 %v834_v8  ;;  %405 = vmatmul.bf16.vlgmr.msra.gmra.mxu1 %v838_v9 }
  0x2c   : > { %425 = vmatmul.bf16.vlgmr.msra.gmra.mxu2 %v842_v10  ;;  %445 = vmatmul.bf16.vlgmr.msra.gmra.mxu3 %v846_v11 }
  0x3b   : > { %390 = vmatmul.bf16.gmra.mxu0 %v835_v12  ;;  %410 = vmatmul.bf16.gmra.mxu1 %v839_v13 }
  0x3c   : > { %430 = vmatmul.bf16.gmra.mxu2 %v843_v14  ;;  %450 = vmatmul.bf16.gmra.mxu3 %v847_v15 }
  0x4b   : > { %395 = vmatmul.bf16.gmra.mxu0 %v836_v16  ;;  %415 = vmatmul.bf16.gmra.mxu1 %v840_v17 }
  0x4c   : > { %435 = vmatmul.bf16.gmra.mxu2 %v844_v18  ;;  %455 = vmatmul.bf16.gmra.mxu3 %v848_v19 }
  0x5b   : > { %400 = vmatmul.bf16.gmra.mxu0 %v837_v20  ;;  %420 = vmatmul.bf16.gmra.mxu1 %v841_v21 }
  0x5c   : > { %440 = vmatmul.bf16.gmra.mxu2 %v845_v22  ;;  %460 = vmatmul.bf16.gmra.mxu3 %v849_v23 }
  0xa8   : > { %v386_v24 = vpop.f32.mrf.mxu0  ;;  %v1074_v25 = vpop.f32.mrf.mxu1 }
  0xa9   : > { %v567_v57 = vmul.f32 %v386_v24, %v386_v24 }
  0xaf   : > { %v1076_v26 = vpop.f32.mrf.mxu2  ;;  %v1089_v31 = vpop.f32.mrf.mxu3 }
  0xb0   : > { %v388_v27 = vpop.f32.mrf.mxu0  ;;  %v1085_v28 = vpop.f32.mrf.mxu1 }
  0xb1   : > { %v861_v29 = vpack.c.bf16 %v388_v27, %v386_v24  ;;  %v881_v30 = vpack.c.bf16 %v1085_v28, %v1074_v25  ;;  %v568_v56 = vmul.f32 %v388_v27, %v388_v27  ;;  %v530_v59 = vadd.f32 %v388_v27, %v386_v24 }
  0xb2   : > { %v575_v27 = vmul.f32 %v1074_v25, %v1074_v25 }
  0xb3   : > { %862 = vst [vmem:[%s1083_s10] sm:$0xff] %v861_v29   ;;  %v599_v60 = vadd.f32 %v568_v56, %v567_v57 }
  0xb4   : > { %941 = vst [vmem:[%s1083_s10 + $0x20] sm:$0xff] %v881_v30  }
  0xb7   : > { %v1093_v32 = vpop.f32.mrf.mxu2  ;;  %v1099_v36 = vpop.f32.mrf.mxu3 }
  0xb8   : > { %v391_v33 = vpop.f32.mrf.mxu0  ;;  %v1095_v34 = vpop.f32.mrf.mxu1  ;;  %v901_v35 = vpack.c.bf16 %v1093_v32, %v1076_v26  ;;  %v921_v37 = vpack.c.bf16 %v1099_v36, %v1089_v31 }
  0xb9   : > { %v569_v58 = vmul.f32 %v391_v33, %v391_v33  ;;  %v531_v62 = vadd.f32 %v530_v59, %v391_v33 }
  0xba   : > { %945 = vst [vmem:[%s1083_s10 + $0x40] sm:$0xff] %v901_v35  }
  0xbb   : > { %949 = vst [vmem:[%s1083_s10 + $0x60] sm:$0xff] %v921_v37   ;;  %v600_v0 = vadd.f32 %v599_v60, %v569_v58 }
  0xbf   : > { %v1105_v38 = vpop.f32.mrf.mxu2  ;;  %v1111_v43 = vpop.f32.mrf.mxu3 }
  0xc0   : > { %v393_v39 = vpop.f32.mrf.mxu0  ;;  %v1107_v40 = vpop.f32.mrf.mxu1 }
  0xc1   : > { %v866_v41 = vpack.c.bf16 %v393_v39, %v391_v33  ;;  %v886_v42 = vpack.c.bf16 %v1107_v40, %v1095_v34  ;;  %v570_v61 = vmul.f32 %v393_v39, %v393_v39  ;;  %v532_v5 = vadd.f32 %v531_v62, %v393_v39 }
  0xc2   : > { %v576_v33 = vmul.f32 %v1085_v28, %v1085_v28  ;;  %v577_v39 = vmul.f32 %v1095_v34, %v1095_v34 }
  0xc3   : > { %938 = vst [vmem:[%s1083_s10 + $0x8] sm:$0xff] %v866_v41   ;;  %v601_v7 = vadd.f32 %v600_v0, %v570_v61 }
  0xc4   : > { %942 = vst [vmem:[%s1083_s10 + $0x28] sm:$0xff] %v886_v42  }
  0xc7   : > { %v1115_v44 = vpop.f32.mrf.mxu2  ;;  %v1121_v48 = vpop.f32.mrf.mxu3 }
  0xc8   : > { %v396_v45 = vpop.f32.mrf.mxu0  ;;  %v1117_v46 = vpop.f32.mrf.mxu1  ;;  %v906_v47 = vpack.c.bf16 %v1115_v44, %v1105_v38  ;;  %v926_v49 = vpack.c.bf16 %v1121_v48, %v1111_v43 }
  0xc9   : > { %v571_v1 = vmul.f32 %v396_v45, %v396_v45  ;;  %v533_v10 = vadd.f32 %v532_v5, %v396_v45  ;;  %v584_v5 = vmul.f32 %v1093_v32, %v1093_v32 }
  0xca   : > { %946 = vst [vmem:[%s1083_s10 + $0x48] sm:$0xff] %v906_v47  }
  0xcb   : > { %950 = vst [vmem:[%s1083_s10 + $0x68] sm:$0xff] %v926_v49   ;;  %v602_v11 = vadd.f32 %v601_v7, %v571_v1 }
  0xcf   : > { %v1127_v50 = vpop.f32.mrf.mxu2  ;;  %v1133_v55 = vpop.f32.mrf.mxu3 }
  0xd0   : > { %v398_v51 = vpop.f32.mrf.mxu0  ;;  %v1129_v52 = vpop.f32.mrf.mxu1 }
  0xd1   : > { %v871_v53 = vpack.c.bf16 %v398_v51, %v396_v45  ;;  %v891_v54 = vpack.c.bf16 %v1129_v52, %v1117_v46  ;;  %v572_v8 = vmul.f32 %v398_v51, %v398_v51  ;;  %v534_v13 = vadd.f32 %v533_v10, %v398_v51 }
  0xd2   : > { %v586_v10 = vmul.f32 %v1115_v44, %v1115_v44 }
  0xd3   : > { %939 = vst [vmem:[%s1083_s10 + $0x10] sm:$0xff] %v871_v53   ;;  %v603_v14 = vadd.f32 %v602_v11, %v572_v8 }
  0xd4   : > { %943 = vst [vmem:[%s1083_s10 + $0x30] sm:$0xff] %v891_v54   ;;  %v579_v54 = vmul.f32 %v1117_v46, %v1117_v46 }
  0xd7   : > { %v1137_v63 = vpop.f32.mrf.mxu2  ;;  %v1141_v6 = vpop.f32.mrf.mxu3 }
  0xd8   : > { %v401_v2 = vpop.f32.mrf.mxu0  ;;  %v421_v3 = vpop.f32.mrf.mxu1  ;;  %v911_v4 = vpack.c.bf16 %v1137_v63, %v1127_v50  ;;  %v931_v9 = vpack.c.bf16 %v1141_v6, %v1133_v55 }
  0xd9   : > { %v573_v12 = vmul.f32 %v401_v2, %v401_v2  ;;  %v535_v15 = vadd.f32 %v534_v13, %v401_v2  ;;  %v581_v61 = vmul.f32 %v421_v3, %v421_v3 }
  0xda   : > { %947 = vst [vmem:[%s1083_s10 + $0x50] sm:$0xff] %v911_v4  }
  0xdb   : > { %951 = vst [vmem:[%s1083_s10 + $0x70] sm:$0xff] %v931_v9   ;;  %v604_v17 = vadd.f32 %v603_v14, %v573_v12 }
  0xdf   : > { %v441_v16 = vpop.f32.mrf.mxu2  ;;  %v1147_v24 = vpop.f32.mrf.mxu3 }
  0xe0   : > { %v403_v18 = vpop.f32.mrf.mxu0  ;;  %v423_v19 = vpop.f32.mrf.mxu1 }
  0xe1   : > { %v876_v20 = vpack.c.bf16 %v403_v18, %v401_v2  ;;  %v536_v21 = vadd.f32 %v535_v15, %v403_v18  ;;  %v574_v22 = vmul.f32 %v403_v18, %v403_v18  ;;  %v896_v23 = vpack.c.bf16 %v423_v19, %v421_v3 }
  0xe2   : > { %v582_v1 = vmul.f32 %v423_v19, %v423_v19  ;;  %v583_v2 = vmul.f32 %v1076_v26, %v1076_v26  ;;  %v588_v15 = vmul.f32 %v1137_v63, %v1137_v63 }
  0xe3   : > { %940 = vst [vmem:[%s1083_s10 + $0x18] sm:$0xff] %v876_v20   ;;  %v537_v29 = vadd.f32 %v536_v21, %v1074_v25  ;;  %v605_v30 = vadd.f32 %v604_v17, %v574_v22  ;;  %v578_v25 = vmul.f32 %v1107_v40, %v1107_v40 }
  0xe4   : > { %944 = vst [vmem:[%s1083_s10 + $0x38] sm:$0xff] %v896_v23  }
  0xe5   : > { %v538_v35 = vadd.f32 %v537_v29, %v1085_v28  ;;  %v606_v37 = vadd.f32 %v605_v30, %v575_v27 }
  0xe7   : > { %v539_v41 = vadd.f32 %v538_v35, %v1095_v34  ;;  %v607_v42 = vadd.f32 %v606_v37, %v576_v33  ;;  %v443_v45 = vpop.f32.mrf.mxu2  ;;  %v463_v53 = vpop.f32.mrf.mxu3  ;;  %v580_v34 = vmul.f32 %v1129_v52, %v1129_v52  ;;  %v594_v35 = vmul.f32 %v1121_v48, %v1121_v48 }
  0xe8   : > { %v916_v47 = vpack.c.bf16 %v443_v45, %v441_v16  ;;  %v936_v28 = vpack.c.bf16 %v463_v53, %v1147_v24  ;;  %v590_v22 = vmul.f32 %v443_v45, %v443_v45 }
  0xe9   : > { %v608_v49 = vadd.f32 %v607_v42, %v577_v39  ;;  %v540_v51 = vadd.f32 %v539_v41, %v1107_v40  ;;  %v595_v39 = vmul.f32 %v1133_v55, %v1133_v55 }
  0xea   : > { %948 = vst [vmem:[%s1083_s10 + $0x58] sm:$0xff] %v916_v47  }
  0xeb   : > { %v541_v56 = vadd.f32 %v540_v51, %v1117_v46  ;;  %v609_v57 = vadd.f32 %v608_v49, %v578_v25  ;;  %952 = vst [vmem:[%s1083_s10 + $0x78] sm:$0xff] %v936_v28   ;;  %v597_v49 = vmul.f32 %v1147_v24, %v1147_v24  ;;  %v598_v28 = vmul.f32 %v463_v53, %v463_v53 }
  0xed   : > { %v542_v58 = vadd.f32 %v541_v56, %v1129_v52  ;;  %v610_v59 = vadd.f32 %v609_v57, %v579_v54  ;;  %v585_v52 = vmul.f32 %v1105_v38, %v1105_v38 }
  0xef   : > { %v543_v60 = vadd.f32 %v542_v58, %v421_v3  ;;  %v611_v40 = vadd.f32 %v610_v59, %v580_v34 }
  0xf1   : > { %v612_v62 = vadd.f32 %v611_v40, %v581_v61  ;;  %v544_v0 = vadd.f32 %v543_v60, %v423_v19  ;;  %v589_v19 = vmul.f32 %v441_v16, %v441_v16 }
  0xf3   : > { %v545_v4 = vadd.f32 %v544_v0, %v1076_v26  ;;  %v613_v46 = vadd.f32 %v612_v62, %v582_v1  ;;  %v587_v26 = vmul.f32 %v1127_v50, %v1127_v50 }
  0xf5   : > { %v546_v7 = vadd.f32 %v545_v4, %v1093_v32  ;;  %v614_v8 = vadd.f32 %v613_v46, %v583_v2 }
  0xf7   : > { %v547_v3 = vadd.f32 %v546_v7, %v1105_v38  ;;  %v615_v9 = vadd.f32 %v614_v8, %v584_v5 }
  0xf9   : > { %v616_v11 = vadd.f32 %v615_v9, %v585_v52  ;;  %v548_v12 = vadd.f32 %v547_v3, %v1115_v44  ;;  %v591_v44 = vmul.f32 %v1089_v31, %v1089_v31 }
  0xfb   : > { %v549_v13 = vadd.f32 %v548_v12, %v1127_v50  ;;  %v617_v14 = vadd.f32 %v616_v11, %v586_v10  ;;  %v592_v50 = vmul.f32 %v1099_v36, %v1099_v36 }
  0xfd   : > { %v550_v32 = vadd.f32 %v549_v13, %v1137_v63  ;;  %v618_v17 = vadd.f32 %v617_v14, %v587_v26  ;;  %v593_v63 = vmul.f32 %v1111_v43, %v1111_v43 }
  0xff   : > { %v619_v38 = vadd.f32 %v618_v17, %v588_v15  ;;  %v551_v18 = vadd.f32 %v550_v32, %v441_v16 }
 0x101   : > { %v620_v20 = vadd.f32 %v619_v38, %v589_v19  ;;  %v552_v21 = vadd.f32 %v551_v18, %v443_v45 }
 0x103   : > { %v553_v23 = vadd.f32 %v552_v21, %v1089_v31  ;;  %v621_v27 = vadd.f32 %v620_v20, %v590_v22 }
 0x105   : > { %v554_v29 = vadd.f32 %v553_v23, %v1099_v36  ;;  %v622_v30 = vadd.f32 %v621_v27, %v591_v44 }
 0x107   : > { %v555_v16 = vadd.f32 %v554_v29, %v1111_v43  ;;  %v623_v33 = vadd.f32 %v622_v30, %v592_v50  ;;  %v596_v43 = vmul.f32 %v1141_v6, %v1141_v6 }
 0x109   : > { %v624_v37 = vadd.f32 %v623_v33, %v593_v63  ;;  %v556_v31 = vadd.f32 %v555_v16, %v1121_v48 }
 0x10b   : > { %v557_v41 = vadd.f32 %v556_v31, %v1133_v55  ;;  %v625_v36 = vadd.f32 %v624_v37, %v594_v35 }
 0x10d   : > { %v558_v42 = vadd.f32 %v557_v41, %v1141_v6  ;;  %v626_v45 = vadd.f32 %v625_v36, %v595_v39 }
 0x10f   : > { %v627_v47 = vadd.f32 %v626_v45, %v596_v43  ;;  %v559_v25 = vadd.f32 %v558_v42, %v1147_v24 }
 0x111   : > { %v628_v48 = vadd.f32 %v627_v47, %v597_v49  ;;  %v560_v51 = vadd.f32 %v559_v25, %v463_v53 }
 0x113   : > { %v561_v54 = vrot.slane %v560_v51, 4  ;;  %v629_v56 = vadd.f32 %v628_v48, %v598_v28 }
 0x115   : > { %v562_v55 = vadd.f32 %v561_v54, %v560_v51  ;;  %v630_v57 = vrot.slane %v629_v56, 4 }
 0x117   : > { %v563_v34 = vrot.slane %v562_v55, 2  ;;  %v631_v58 = vadd.f32 %v630_v57, %v629_v56 }
 0x119   : > { %v564_v59 = vadd.f32 %v563_v34, %v562_v55  ;;  %v632_v6 = vrot.slane %v631_v58, 2 }
 0x11b   : > { %v565_v60 = vrot.slane %v564_v59, 1  ;;  %v633_v61 = vadd.f32 %v632_v6, %v631_v58 }
 0x11d   : > { %v634_v40 = vrot.slane %v633_v61, 1  ;;  %v566_v24 = vadd.f32 %v565_v60, %v564_v59 }
 0x11f   : > { %v635_v53 = vadd.f32 %v634_v40, %v633_v61 }
 0x121   : > { %v637_v62 = vsel %vm636_vm0, %v566_v24, %v635_v53 }
 0x122   : > { %638 = vst [vmem:[%s184_s16] sm:$0x3] %v637_v62 }
 0x123 PF: > { %s14_s12 = sadd.s32 1, %s991_s12  }
 0x124   : > { %p11_p5 = scmp.ge.s32.totalorder %s14_s12, 4  }
 0x126   :  { %13 = sbr.rel (!%p11_p5) target bundleno = 1 (0x1), region = 70 }

// kernel: bottleneck_forward.7
= control target key start
LH: loop header
LB: loop body
LE: loop exit
PB: predicated region body
PF: predicated region fallthrough
CT: control target
= control target key end

     0   :  { %s960_s15 = smov 0   ;;  %s1113_s0 = inlined_call_operand.vmem [shape: bf16[512,128], index: 0, kind: input, shape index: {}]   ;;  %s1114_s1 = inlined_call_operand.vmem [shape: f32[1,128], index: 1, kind: input, shape index: {}]   ;;  %s1115_s2 = inlined_call_operand.vmem [shape: f32[1,128], index: 2, kind: input, shape index: {}]   ;;  %s1116_s3 = inlined_call_operand.vmem [shape: bf16[512,128], index: 3, kind: input, shape index: {}]   ;;  %s1117_s4 = inlined_call_operand.vmem [shape: bf16[512,128], index: 4, kind: output, shape index: {}]  }
   0x1 LB: > { %s651_s16 = sadd.s32 4294967295, %s933_s15   ;;  %p655_p0 = scmp.ge.s32.totalorder %s933_s15, 1  ;;  %s933_s15 = sphi %s960_s15, %s14_s15  }
   0x2   : > { %p174_p1 = scmp.lt.s32.totalorder %s933_s15, 3 }
   0x4   : > { %p175_p2 = pnand %p655_p0, %p174_p1 }
   0x5   : > { %s656_s17 = sshll.u32 (!%p175_p2), %s651_s16, 5 }
   0x6   : > { %178 = sbr.rel (%p175_p2) target bundleno = 83 (0x53), region = 36  ;;  %p206_p3 = scmp.lt.s32.totalorder (!%p175_p2), %s656_s17, 63 }
   0xb   : > { %s1119_s17 = smov (!%p206_p3, %s656_s17), 63  ;;  %v985_v0 = vld [vmem:[%s1114_s1] ss:$0 sm:$0xff] }
   0xc   : > { %s968_s18 = sshll.u32 %s1119_s17, 2  ;;  %v990_v1 = vld [vmem:[%s1115_s2] ss:$0 sm:$0xff] }
   0xd   : > { %s974_s21 = scalar_lea.vmem %s1113_s0, %s968_s18  ;;  %s980_s24 = scalar_lea.vmem %s1116_s3, %s968_s18 }
   0xe   : > { %v665_v2 = vld [vmem:[%s974_s21] sm:$0xff]   ;;  %v872_v4 = vld [vmem:[%s974_s21 + $0x8] sm:$0xff]   ;;  %v873_v10 = vld [vmem:[%s974_s21 + $0x10] sm:$0xff]   ;;  %s1021_s5 = scalar_lea.vmem %s1117_s4, %s968_s18 }
   0xf   : > { %v729_v3 = vld [vmem:[%s980_s24] sm:$0xff]   ;;  %v666_v5 = vunpack.c.l.bf16 %v665_v2  ;;  %v667_v6 = vunpack.c.h.bf16 %v665_v2  ;;  %v887_v9 = vld [vmem:[%s980_s24 + $0x8] sm:$0xff]   ;;  %v888_v11 = vld [vmem:[%s980_s24 + $0x10] sm:$0xff]   ;;  %v670_v12 = vunpack.c.l.bf16 %v872_v4  ;;  %v671_v13 = vunpack.c.h.bf16 %v872_v4 }
  0x10   : > { %v730_v7 = vunpack.c.l.bf16 %v729_v3  ;;  %v731_v8 = vunpack.c.h.bf16 %v729_v3  ;;  %v734_v14 = vunpack.c.l.bf16 %v887_v9  ;;  %v735_v15 = vunpack.c.h.bf16 %v887_v9  ;;  %v874_v20 = vld [vmem:[%s974_s21 + $0x18] sm:$0xff]   ;;  %v875_v54 = vld [vmem:[%s974_s21 + $0x20] sm:$0xff]   ;;  %v876_v2 = vld [vmem:[%s974_s21 + $0x28] sm:$0xff]  }
  0x11   : > { %v291_v16 = vmul.f32 %v985_v0, %v666_v5  ;;  %v292_v17 = vmul.f32 %v985_v0, %v667_v6  ;;  %v674_v18 = vunpack.c.l.bf16 %v873_v10  ;;  %v675_v19 = vunpack.c.h.bf16 %v873_v10  ;;  %v889_v49 = vld [vmem:[%s980_s24 + $0x18] sm:$0xff]   ;;  %v890_v59 = vld [vmem:[%s980_s24 + $0x20] sm:$0xff]  }
  0x12   : > { %v293_v21 = vmul.f32 %v985_v0, %v670_v12  ;;  %v294_v22 = vmul.f32 %v985_v0, %v671_v13  ;;  %v738_v23 = vunpack.c.l.bf16 %v888_v11  ;;  %v739_v24 = vunpack.c.h.bf16 %v888_v11 }
  0x13   : > { %v327_v25 = vadd.f32 %v990_v1, %v291_v16  ;;  %v328_v26 = vadd.f32 %v990_v1, %v292_v17  ;;  %v295_v27 = vmul.f32 %v985_v0, %v674_v18  ;;  %v296_v28 = vmul.f32 %v985_v0, %v675_v19  ;;  %v877_v16 = vld [vmem:[%s974_s21 + $0x30] sm:$0xff]  }
  0x14   : > { %v329_v29 = vadd.f32 %v990_v1, %v293_v21  ;;  %v330_v30 = vadd.f32 %v990_v1, %v294_v22  ;;  %v678_v31 = vunpack.c.l.bf16 %v874_v20  ;;  %v679_v32 = vunpack.c.h.bf16 %v874_v20  ;;  %v892_v17 = vld [vmem:[%s980_s24 + $0x30] sm:$0xff]  }
  0x15   : > { %v359_v33 = vmax.f32 %v327_v25, 0.0  ;;  %v360_v34 = vmax.f32 %v328_v26, 0.0  ;;  %v331_v35 = vadd.f32 %v990_v1, %v295_v27  ;;  %v332_v36 = vadd.f32 %v990_v1, %v296_v28 }
  0x16   : > { %v361_v37 = vmax.f32 %v329_v29, 0.0  ;;  %v362_v38 = vmax.f32 %v330_v30, 0.0  ;;  %v297_v39 = vmul.f32 %v985_v0, %v678_v31  ;;  %v298_v40 = vmul.f32 %v985_v0, %v679_v32  ;;  %v878_v30 = vld [vmem:[%s974_s21 + $0x38] sm:$0xff]  }
  0x17   : > { %v455_v41 = vadd.f32 %v730_v7, %v359_v33  ;;  %v456_v42 = vadd.f32 %v731_v8, %v360_v34  ;;  %v363_v43 = vmax.f32 %v331_v35, 0.0  ;;  %v364_v44 = vmax.f32 %v332_v36, 0.0  ;;  %v891_v7 = vld [vmem:[%s980_s24 + $0x28] sm:$0xff]  }
  0x18   : > { %v457_v45 = vadd.f32 %v734_v14, %v361_v37  ;;  %v458_v46 = vadd.f32 %v735_v15, %v362_v38  ;;  %v333_v47 = vadd.f32 %v990_v1, %v297_v39  ;;  %v334_v48 = vadd.f32 %v990_v1, %v298_v40 }
  0x19   : > { %v487_v50 = vmax.f32 %v455_v41, 0.0  ;;  %v488_v51 = vmax.f32 %v456_v42, 0.0  ;;  %v459_v52 = vadd.f32 %v738_v23, %v363_v43  ;;  %v460_v53 = vadd.f32 %v739_v24, %v364_v44 }
  0x1a   : > { %v489_v55 = vmax.f32 %v457_v45, 0.0  ;;  %v490_v56 = vmax.f32 %v458_v46, 0.0  ;;  %v365_v57 = vmax.f32 %v333_v47, 0.0  ;;  %v366_v58 = vmax.f32 %v334_v48, 0.0  ;;  %v893_v47 = vld [vmem:[%s980_s24 + $0x38] sm:$0xff]  }
  0x1b   : > { %v795_v60 = vpack.c.bf16 %v488_v51, %v487_v50  ;;  %v491_v61 = vmax.f32 %v459_v52, 0.0  ;;  %v492_v62 = vmax.f32 %v460_v53, 0.0  ;;  %v742_v63 = vunpack.c.l.bf16 %v889_v49 }
  0x1c   : > { %v800_v3 = vpack.c.bf16 %v490_v56, %v489_v55  ;;  %v743_v4 = vunpack.c.h.bf16 %v889_v49  ;;  %v682_v5 = vunpack.c.l.bf16 %v875_v54  ;;  %v683_v6 = vunpack.c.h.bf16 %v875_v54  ;;  %v879_v56 = vld [vmem:[%s974_s21 + $0x40] sm:$0xff]  }
  0x1d   : > { %796 = vst [vmem:[%s1021_s5] sm:$0xff] %v795_v60   ;;  %v805_v8 = vpack.c.bf16 %v492_v62, %v491_v61  ;;  %v461_v9 = vadd.f32 %v742_v63, %v365_v57  ;;  %v746_v10 = vunpack.c.l.bf16 %v890_v59  ;;  %v747_v11 = vunpack.c.h.bf16 %v890_v59 }
  0x1e   : > { %902 = vst [vmem:[%s1021_s5 + $0x8] sm:$0xff] %v800_v3   ;;  %v462_v12 = vadd.f32 %v743_v4, %v366_v58  ;;  %v299_v13 = vmul.f32 %v985_v0, %v682_v5  ;;  %v300_v14 = vmul.f32 %v985_v0, %v683_v6  ;;  %v686_v15 = vunpack.c.l.bf16 %v876_v2  ;;  %v894_v3 = vld [vmem:[%s980_s24 + $0x40] sm:$0xff]  }
  0x1f   : > { %903 = vst [vmem:[%s1021_s5 + $0x10] sm:$0xff] %v805_v8   ;;  %v493_v18 = vmax.f32 %v461_v9, 0.0  ;;  %v687_v19 = vunpack.c.h.bf16 %v876_v2  ;;  %v750_v20 = vunpack.c.l.bf16 %v891_v7  ;;  %v751_v21 = vunpack.c.h.bf16 %v891_v7  ;;  %v880_v8 = vld [vmem:[%s974_s21 + $0x48] sm:$0xff]  }
  0x20   : > { %v494_v22 = vmax.f32 %v462_v12, 0.0  ;;  %v335_v23 = vadd.f32 %v990_v1, %v299_v13  ;;  %v336_v24 = vadd.f32 %v990_v1, %v300_v14  ;;  %v301_v25 = vmul.f32 %v985_v0, %v686_v15 }
  0x21   : > { %v302_v26 = vmul.f32 %v985_v0, %v687_v19  ;;  %v690_v27 = vunpack.c.l.bf16 %v877_v16  ;;  %v691_v28 = vunpack.c.h.bf16 %v877_v16  ;;  %v754_v29 = vunpack.c.l.bf16 %v892_v17 }
  0x22   : > { %v810_v31 = vpack.c.bf16 %v494_v22, %v493_v18  ;;  %v367_v32 = vmax.f32 %v335_v23, 0.0  ;;  %v368_v33 = vmax.f32 %v336_v24, 0.0  ;;  %v337_v34 = vadd.f32 %v990_v1, %v301_v25  ;;  %v881_v22 = vld [vmem:[%s974_s21 + $0x50] sm:$0xff]  }
  0x23   : > { %v338_v35 = vadd.f32 %v990_v1, %v302_v26  ;;  %v303_v36 = vmul.f32 %v985_v0, %v690_v27  ;;  %v304_v37 = vmul.f32 %v985_v0, %v691_v28  ;;  %v755_v38 = vunpack.c.h.bf16 %v892_v17  ;;  %v895_v17 = vld [vmem:[%s980_s24 + $0x48] sm:$0xff]   ;;  %v896_v27 = vld [vmem:[%s980_s24 + $0x50] sm:$0xff]  }
  0x24   : > { %904 = vst [vmem:[%s1021_s5 + $0x18] sm:$0xff] %v810_v31   ;;  %v463_v39 = vadd.f32 %v746_v10, %v367_v32  ;;  %v464_v40 = vadd.f32 %v747_v11, %v368_v33  ;;  %v369_v41 = vmax.f32 %v337_v34, 0.0  ;;  %v694_v42 = vunpack.c.l.bf16 %v878_v30 }
  0x25   : > { %v370_v43 = vmax.f32 %v338_v35, 0.0  ;;  %v339_v44 = vadd.f32 %v990_v1, %v303_v36  ;;  %v340_v45 = vadd.f32 %v990_v1, %v304_v37  ;;  %v695_v46 = vunpack.c.h.bf16 %v878_v30  ;;  %v882_v36 = vld [vmem:[%s974_s21 + $0x58] sm:$0xff]  }
  0x26   : > { %v495_v48 = vmax.f32 %v463_v39, 0.0  ;;  %v496_v49 = vmax.f32 %v464_v40, 0.0  ;;  %v465_v50 = vadd.f32 %v750_v20, %v369_v41  ;;  %v305_v51 = vmul.f32 %v985_v0, %v694_v42 }
  0x27   : > { %v466_v52 = vadd.f32 %v751_v21, %v370_v43  ;;  %v371_v53 = vmax.f32 %v339_v44, 0.0  ;;  %v372_v54 = vmax.f32 %v340_v45, 0.0  ;;  %v306_v55 = vmul.f32 %v985_v0, %v695_v46 }
  0x28   : > { %v815_v57 = vpack.c.bf16 %v496_v49, %v495_v48  ;;  %v497_v58 = vmax.f32 %v465_v50, 0.0  ;;  %v341_v59 = vadd.f32 %v990_v1, %v305_v51  ;;  %v758_v60 = vunpack.c.l.bf16 %v893_v47  ;;  %v897_v49 = vld [vmem:[%s980_s24 + $0x58] sm:$0xff]  }
  0x29   : > { %v498_v61 = vmax.f32 %v466_v52, 0.0  ;;  %v467_v62 = vadd.f32 %v754_v29, %v371_v53  ;;  %v468_v63 = vadd.f32 %v755_v38, %v372_v54  ;;  %v342_v2 = vadd.f32 %v990_v1, %v306_v55 }
  0x2a   : > { %905 = vst [vmem:[%s1021_s5 + $0x20] sm:$0xff] %v815_v57   ;;  %v373_v4 = vmax.f32 %v341_v59, 0.0  ;;  %v759_v5 = vunpack.c.h.bf16 %v893_v47  ;;  %v698_v6 = vunpack.c.l.bf16 %v879_v56  ;;  %v699_v7 = vunpack.c.h.bf16 %v879_v56 }
  0x2b   : > { %v820_v9 = vpack.c.bf16 %v498_v61, %v497_v58  ;;  %v499_v10 = vmax.f32 %v467_v62, 0.0  ;;  %v500_v11 = vmax.f32 %v468_v63, 0.0  ;;  %v374_v12 = vmax.f32 %v342_v2, 0.0  ;;  %v883_v58 = vld [vmem:[%s974_s21 + $0x60] sm:$0xff]  }
  0x2c   : > { %v469_v13 = vadd.f32 %v758_v60, %v373_v4  ;;  %v307_v14 = vmul.f32 %v985_v0, %v698_v6  ;;  %v308_v15 = vmul.f32 %v985_v0, %v699_v7  ;;  %v762_v16 = vunpack.c.l.bf16 %v894_v3 }
  0x2d   : > { %906 = vst [vmem:[%s1021_s5 + $0x28] sm:$0xff] %v820_v9   ;;  %v825_v18 = vpack.c.bf16 %v500_v11, %v499_v10  ;;  %v470_v19 = vadd.f32 %v759_v5, %v374_v12  ;;  %v763_v20 = vunpack.c.h.bf16 %v894_v3  ;;  %v702_v21 = vunpack.c.l.bf16 %v880_v8  ;;  %v898_v5 = vld [vmem:[%s980_s24 + $0x60] sm:$0xff]  }
  0x2e   : > { %v501_v23 = vmax.f32 %v469_v13, 0.0  ;;  %v343_v24 = vadd.f32 %v990_v1, %v307_v14  ;;  %v344_v25 = vadd.f32 %v990_v1, %v308_v15  ;;  %v703_v26 = vunpack.c.h.bf16 %v880_v8  ;;  %v884_v14 = vld [vmem:[%s974_s21 + $0x68] sm:$0xff]  }
  0x2f   : > { %907 = vst [vmem:[%s1021_s5 + $0x30] sm:$0xff] %v825_v18   ;;  %v502_v28 = vmax.f32 %v470_v19, 0.0  ;;  %v309_v29 = vmul.f32 %v985_v0, %v702_v21  ;;  %v766_v30 = vunpack.c.l.bf16 %v895_v17  ;;  %v767_v31 = vunpack.c.h.bf16 %v895_v17 }
  0x30   : > { %v375_v32 = vmax.f32 %v343_v24, 0.0  ;;  %v376_v33 = vmax.f32 %v344_v25, 0.0  ;;  %v310_v34 = vmul.f32 %v985_v0, %v703_v26  ;;  %v706_v35 = vunpack.c.l.bf16 %v881_v22 }
  0x31   : > { %v830_v37 = vpack.c.bf16 %v502_v28, %v501_v23  ;;  %v345_v38 = vadd.f32 %v990_v1, %v309_v29  ;;  %v707_v39 = vunpack.c.h.bf16 %v881_v22  ;;  %v770_v40 = vunpack.c.l.bf16 %v896_v27  ;;  %v899_v23 = vld [vmem:[%s980_s24 + $0x68] sm:$0xff]   ;;  %v885_v28 = vld [vmem:[%s974_s21 + $0x70] sm:$0xff]  }
  0x32   : > { %v471_v41 = vadd.f32 %v762_v16, %v375_v32  ;;  %v472_v42 = vadd.f32 %v763_v20, %v376_v33  ;;  %v346_v43 = vadd.f32 %v990_v1, %v310_v34  ;;  %v311_v44 = vmul.f32 %v985_v0, %v706_v35 }
  0x33   : > { %908 = vst [vmem:[%s1021_s5 + $0x38] sm:$0xff] %v830_v37   ;;  %v377_v45 = vmax.f32 %v345_v38, 0.0  ;;  %v312_v46 = vmul.f32 %v985_v0, %v707_v39  ;;  %v771_v47 = vunpack.c.h.bf16 %v896_v27  ;;  %v710_v48 = vunpack.c.l.bf16 %v882_v36  ;;  %v900_v37 = vld [vmem:[%s980_s24 + $0x70] sm:$0xff]  }
  0x34   : > { %v503_v50 = vmax.f32 %v471_v41, 0.0  ;;  %v504_v51 = vmax.f32 %v472_v42, 0.0  ;;  %v378_v52 = vmax.f32 %v346_v43, 0.0  ;;  %v347_v53 = vadd.f32 %v990_v1, %v311_v44 }
  0x35   : > { %v473_v54 = vadd.f32 %v766_v30, %v377_v45  ;;  %v348_v55 = vadd.f32 %v990_v1, %v312_v46  ;;  %v711_v56 = vunpack.c.h.bf16 %v882_v36  ;;  %v313_v57 = vmul.f32 %v985_v0, %v710_v48  ;;  %v886_v46 = vld [vmem:[%s974_s21 + $0x78] sm:$0xff]  }
  0x36   : > { %v835_v59 = vpack.c.bf16 %v504_v51, %v503_v50  ;;  %v474_v60 = vadd.f32 %v767_v31, %v378_v52  ;;  %v379_v61 = vmax.f32 %v347_v53, 0.0  ;;  %v774_v62 = vunpack.c.l.bf16 %v897_v49 }
  0x37   : > { %v505_v63 = vmax.f32 %v473_v54, 0.0  ;;  %v380_v2 = vmax.f32 %v348_v55, 0.0  ;;  %v314_v3 = vmul.f32 %v985_v0, %v711_v56  ;;  %v349_v4 = vadd.f32 %v990_v1, %v313_v57 }
  0x38   : > { %909 = vst [vmem:[%s1021_s5 + $0x40] sm:$0xff] %v835_v59   ;;  %v506_v6 = vmax.f32 %v474_v60, 0.0  ;;  %v475_v7 = vadd.f32 %v770_v40, %v379_v61  ;;  %v775_v8 = vunpack.c.h.bf16 %v897_v49  ;;  %v714_v9 = vunpack.c.l.bf16 %v883_v58 }
  0x39   : > { %v476_v10 = vadd.f32 %v771_v47, %v380_v2  ;;  %v350_v11 = vadd.f32 %v990_v1, %v314_v3  ;;  %v381_v12 = vmax.f32 %v349_v4, 0.0  ;;  %v715_v13 = vunpack.c.h.bf16 %v883_v58 }
  0x3a   : > { %v840_v15 = vpack.c.bf16 %v506_v6, %v505_v63  ;;  %v507_v16 = vmax.f32 %v475_v7, 0.0  ;;  %v315_v17 = vmul.f32 %v985_v0, %v714_v9  ;;  %v778_v18 = vunpack.c.l.bf16 %v898_v5  ;;  %v901_v63 = vld [vmem:[%s980_s24 + $0x78] sm:$0xff]  }
  0x3b   : > { %v508_v19 = vmax.f32 %v476_v10, 0.0  ;;  %v382_v20 = vmax.f32 %v350_v11, 0.0  ;;  %v477_v21 = vadd.f32 %v774_v62, %v381_v12  ;;  %v316_v22 = vmul.f32 %v985_v0, %v715_v13 }
  0x3c   : > { %910 = vst [vmem:[%s1021_s5 + $0x48] sm:$0xff] %v840_v15   ;;  %v351_v24 = vadd.f32 %v990_v1, %v315_v17  ;;  %v779_v25 = vunpack.c.h.bf16 %v898_v5  ;;  %v718_v26 = vunpack.c.l.bf16 %v884_v14  ;;  %v719_v27 = vunpack.c.h.bf16 %v884_v14 }
  0x3d   : > { %v845_v29 = vpack.c.bf16 %v508_v19, %v507_v16  ;;  %v478_v30 = vadd.f32 %v775_v8, %v382_v20  ;;  %v509_v31 = vmax.f32 %v477_v21, 0.0  ;;  %v352_v32 = vadd.f32 %v990_v1, %v316_v22 }
  0x3e   : > { %v383_v33 = vmax.f32 %v351_v24, 0.0  ;;  %v317_v34 = vmul.f32 %v985_v0, %v718_v26  ;;  %v318_v35 = vmul.f32 %v985_v0, %v719_v27  ;;  %v782_v36 = vunpack.c.l.bf16 %v899_v23 }
  0x3f   : > { %911 = vst [vmem:[%s1021_s5 + $0x50] sm:$0xff] %v845_v29   ;;  %v510_v38 = vmax.f32 %v478_v30, 0.0  ;;  %v384_v39 = vmax.f32 %v352_v32, 0.0  ;;  %v783_v40 = vunpack.c.h.bf16 %v899_v23  ;;  %v722_v41 = vunpack.c.l.bf16 %v885_v28 }
  0x40   : > { %v479_v42 = vadd.f32 %v778_v18, %v383_v33  ;;  %v353_v43 = vadd.f32 %v990_v1, %v317_v34  ;;  %v354_v44 = vadd.f32 %v990_v1, %v318_v35  ;;  %v723_v45 = vunpack.c.h.bf16 %v885_v28 }
  0x41   : > { %v850_v47 = vpack.c.bf16 %v510_v38, %v509_v31  ;;  %v480_v48 = vadd.f32 %v779_v25, %v384_v39  ;;  %v319_v49 = vmul.f32 %v985_v0, %v722_v41  ;;  %v786_v50 = vunpack.c.l.bf16 %v900_v37 }
  0x42   : > { %v511_v51 = vmax.f32 %v479_v42, 0.0  ;;  %v385_v52 = vmax.f32 %v353_v43, 0.0  ;;  %v386_v53 = vmax.f32 %v354_v44, 0.0  ;;  %v320_v54 = vmul.f32 %v985_v0, %v723_v45 }
  0x43   : > { %912 = vst [vmem:[%s1021_s5 + $0x58] sm:$0xff] %v850_v47   ;;  %v512_v55 = vmax.f32 %v480_v48, 0.0  ;;  %v355_v56 = vadd.f32 %v990_v1, %v319_v49  ;;  %v787_v57 = vunpack.c.h.bf16 %v900_v37  ;;  %v726_v58 = vunpack.c.l.bf16 %v886_v46 }
  0x44   : > { %v481_v59 = vadd.f32 %v782_v36, %v385_v52  ;;  %v482_v60 = vadd.f32 %v783_v40, %v386_v53  ;;  %v356_v61 = vadd.f32 %v990_v1, %v320_v54  ;;  %v727_v62 = vunpack.c.h.bf16 %v886_v46 }
  0x45   : > { %v855_v2 = vpack.c.bf16 %v512_v55, %v511_v51  ;;  %v387_v3 = vmax.f32 %v355_v56, 0.0  ;;  %v321_v4 = vmul.f32 %v985_v0, %v726_v58  ;;  %v790_v11 = vunpack.c.l.bf16 %v901_v63 }
  0x46   : > { %v513_v5 = vmax.f32 %v481_v59, 0.0  ;;  %v514_v6 = vmax.f32 %v482_v60, 0.0  ;;  %v388_v7 = vmax.f32 %v356_v61, 0.0  ;;  %v322_v8 = vmul.f32 %v985_v0, %v727_v62 }
  0x47   : > { %913 = vst [vmem:[%s1021_s5 + $0x60] sm:$0xff] %v855_v2   ;;  %v483_v9 = vadd.f32 %v786_v50, %v387_v3  ;;  %v357_v10 = vadd.f32 %v990_v1, %v321_v4  ;;  %v791_v15 = vunpack.c.h.bf16 %v901_v63 }
  0x48   : > { %v860_v12 = vpack.c.bf16 %v514_v6, %v513_v5  ;;  %v484_v13 = vadd.f32 %v787_v57, %v388_v7  ;;  %v358_v14 = vadd.f32 %v990_v1, %v322_v8 }
  0x49   : > { %v515_v16 = vmax.f32 %v483_v9, 0.0  ;;  %v389_v17 = vmax.f32 %v357_v10, 0.0 }
  0x4a   : > { %914 = vst [vmem:[%s1021_s5 + $0x68] sm:$0xff] %v860_v12   ;;  %v516_v18 = vmax.f32 %v484_v13, 0.0  ;;  %v390_v19 = vmax.f32 %v358_v14, 0.0 }
  0x4b   : > { %v485_v20 = vadd.f32 %v790_v11, %v389_v17 }
  0x4c   : > { %v865_v21 = vpack.c.bf16 %v516_v18, %v515_v16  ;;  %v486_v0 = vadd.f32 %v791_v15, %v390_v19 }
  0x4d   : > { %v517_v22 = vmax.f32 %v485_v20, 0.0 }
  0x4e   : > { %915 = vst [vmem:[%s1021_s5 + $0x70] sm:$0xff] %v865_v21   ;;  %v518_v23 = vmax.f32 %v486_v0, 0.0 }
  0x50   : > { %v870_v24 = vpack.c.bf16 %v518_v23, %v517_v22 }
  0x52   : > { %916 = vst [vmem:[%s1021_s5 + $0x78] sm:$0xff] %v870_v24  }
  0x53 PF: > { %s14_s15 = sadd.s32 1, %s933_s15  }
  0x54   : > { %p11_p4 = scmp.ge.s32.totalorder %s14_s15, 4  }
  0x56   :  { %13 = sbr.rel (!%p11_p4) target bundleno = 1 (0x1), region = 69 }

// kernel: bottleneck_forward.6
= control target key start
LH: loop header
LB: loop body
LE: loop exit
PB: predicated region body
PF: predicated region fallthrough
CT: control target
= control target key end

     0   :  { %s1134_s18 = smov 0   ;;  %s1414_s0 = inlined_call_operand.vmem [shape: bf16[512,128], index: 0, kind: input, shape index: {}]   ;;  %s1415_s1 = inlined_call_operand.vmem [shape: f32[1,128], index: 1, kind: input, shape index: {}]   ;;  %s1416_s2 = inlined_call_operand.vmem [shape: f32[1,128], index: 2, kind: input, shape index: {}]   ;;  %s1417_s3 = inlined_call_operand.vmem [shape: bf16[128,128], index: 3, kind: input, shape index: {}]   ;;  %s1418_s4 = inlined_call_operand.vmem [shape: bf16[512,128], index: 4, kind: output, shape index: {0}]   ;;  %s1419_s5 = inlined_call_operand.vmem [shape: f32[2,2,128], index: 5, kind: output, shape index: {1}]  }
   0x1 LB: > { %s1140_s19 = sadd.s32 4294967295, %s1102_s18   ;;  %p840_p0 = scmp.ge.s32.totalorder %s1102_s18, 1  ;;  %s1102_s18 = sphi %s1134_s18, %s16_s18  }
   0x2   : > { %p191_p1 = scmp.lt.s32.totalorder %s1102_s18, 3 }
   0x4   : > { %p192_p2 = pnand %p840_p0, %p191_p1 }
   0x5   : > { %s841_s22 = sshll.u32 (!%p192_p2), %s1140_s19, 5  ;;  %p235_p4 = scmp.lt.s32.totalorder (!%p192_p2), %s1140_s19, 1 }
   0x6   : > { %195 = sbr.rel (%p192_p2) target bundleno = 291 (0x123), region = 36  ;;  %p224_p3 = scmp.lt.s32.totalorder (!%p192_p2), %s841_s22, 63 }
   0xb   : > { %v887_v0 = vld [vmem:[%s1417_s3 + $0x38] sm:$0xff]  ;;  %v886_v1 = vld [vmem:[%s1417_s3 + $0x30] sm:$0xff]  ;;  %s1421_s22 = smov (!%p224_p3, %s841_s22), 63  ;;  %v885_v2 = vld [vmem:[%s1417_s3 + $0x28] sm:$0xff]  ;;  %s1423_s19 = smov (!%p235_p4, %s1140_s19), 1  ;;  %vm746_vm0 = vcmask 1040384  }
   0xc   : > { %487 = vmatpush.bf16.msra.mxu0 %v887_v0  ;;  %1062 = vmatpush.bf16.msra.mxu1 %v887_v0  ;;  %s842_s25 = sshll.u32 %s1421_s22, 2  ;;  %v884_v4 = vld [vmem:[%s1417_s3 + $0x20] sm:$0xff]  ;;  %v883_v12 = vld [vmem:[%s1417_s3 + $0x18] sm:$0xff]  ;;  %v882_v20 = vld [vmem:[%s1417_s3 + $0x10] sm:$0xff]  ;;  %s845_s22 = sshll.u32 %s1423_s19, 1 }
   0xd   : > { %1063 = vmatpush.bf16.msra.mxu2 %v887_v0  ;;  %1064 = vmatpush.bf16.msra.mxu3 %v887_v0  ;;  %s1162_s30 = scalar_lea.vmem %s1414_s0, %s842_s25  ;;  %v1173_v9 = vld [vmem:[%s1415_s1] ss:$0 sm:$0xff]  ;;  %v881_v27 = vld [vmem:[%s1417_s3 + $0x8] sm:$0xff]  ;;  %s1278_s26 = scalar_lea.vmem %s1418_s4, %s842_s25 }
   0xe   : > { %v889_v3 = vld [vmem:[%s1162_s30] sm:$0xff]   ;;  %v1032_v32 = vld [vmem:[%s1162_s30 + $0x8] sm:$0xff]   ;;  %s238_s28 = scalar_lea.vmem %s1419_s5, %s845_s22 }
   0xf   : > { %v1035_v5 = vld [vmem:[%s1162_s30 + $0x20] sm:$0xff]   ;;  %v890_v7 = vunpack.c.l.bf16 %v889_v3  ;;  %v891_v8 = vunpack.c.h.bf16 %v889_v3  ;;  %v1036_v36 = vld [vmem:[%s1162_s30 + $0x28] sm:$0xff]   ;;  %v894_v42 = vunpack.c.l.bf16 %v1032_v32  ;;  %v895_v45 = vunpack.c.h.bf16 %v1032_v32 }
  0x10   : > { %488 = vmatpush.bf16.msra.mxu0 %v886_v1  ;;  %1065 = vmatpush.bf16.msra.mxu1 %v886_v1  ;;  %v1039_v6 = vld [vmem:[%s1162_s30 + $0x40] sm:$0xff]   ;;  %v906_v10 = vunpack.c.l.bf16 %v1035_v5  ;;  %v907_v11 = vunpack.c.h.bf16 %v1035_v5  ;;  %v1040_v43 = vld [vmem:[%s1162_s30 + $0x48] sm:$0xff]   ;;  %v910_v46 = vunpack.c.l.bf16 %v1036_v36  ;;  %v911_v47 = vunpack.c.h.bf16 %v1036_v36 }
  0x11   : > { %1066 = vmatpush.bf16.msra.mxu2 %v886_v1  ;;  %1067 = vmatpush.bf16.msra.mxu3 %v886_v1  ;;  %v922_v13 = vunpack.c.l.bf16 %v1039_v6  ;;  %v923_v14 = vunpack.c.h.bf16 %v1039_v6  ;;  %v307_v15 = vmul.f32 %v1173_v9, %v890_v7  ;;  %v308_v16 = vmul.f32 %v1173_v9, %v891_v8  ;;  %v1183_v17 = vld [vmem:[%s1416_s2] ss:$0 sm:$0xff] }
  0x12   : > { %v315_v18 = vmul.f32 %v1173_v9, %v906_v10  ;;  %v316_v19 = vmul.f32 %v1173_v9, %v907_v11  ;;  %v1043_v33 = vld [vmem:[%s1162_s30 + $0x60] sm:$0xff]   ;;  %v926_v53 = vunpack.c.l.bf16 %v1040_v43  ;;  %v927_v54 = vunpack.c.h.bf16 %v1040_v43  ;;  %v1045_v43 = vld [vmem:[%s1162_s30 + $0x70] sm:$0xff]  }
  0x13   : > { %v323_v21 = vmul.f32 %v1173_v9, %v922_v13  ;;  %v324_v22 = vmul.f32 %v1173_v9, %v923_v14  ;;  %v343_v23 = vadd.f32 %v1183_v17, %v307_v15  ;;  %v344_v24 = vadd.f32 %v1183_v17, %v308_v16  ;;  %v880_v39 = vld [vmem:[%s1417_s3] sm:$0xff]  ;;  %v1033_v13 = vld [vmem:[%s1162_s30 + $0x10] sm:$0xff]  }
  0x14   : > { %489 = vmatpush.bf16.msra.mxu0 %v885_v2  ;;  %1068 = vmatpush.bf16.msra.mxu1 %v885_v2  ;;  %v351_v25 = vadd.f32 %v1183_v17, %v315_v18  ;;  %v352_v26 = vadd.f32 %v1183_v17, %v316_v19  ;;  %v938_v37 = vunpack.c.l.bf16 %v1043_v33  ;;  %v939_v38 = vunpack.c.h.bf16 %v1043_v33  ;;  %v1037_v19 = vld [vmem:[%s1162_s30 + $0x30] sm:$0xff]  }
  0x15   : > { %1069 = vmatpush.bf16.msra.mxu2 %v885_v2  ;;  %1070 = vmatpush.bf16.msra.mxu3 %v885_v2  ;;  %v359_v28 = vadd.f32 %v1183_v17, %v323_v21  ;;  %v360_v29 = vadd.f32 %v1183_v17, %v324_v22  ;;  %v375_v30 = vmax.f32 %v343_v23, 0.0  ;;  %v376_v31 = vmax.f32 %v344_v24, 0.0 }
  0x16   : > { %v383_v34 = vmax.f32 %v351_v25, 0.0  ;;  %v384_v35 = vmax.f32 %v352_v26, 0.0  ;;  %v331_v44 = vmul.f32 %v1173_v9, %v938_v37  ;;  %v332_v48 = vmul.f32 %v1173_v9, %v939_v38 }
  0x17   : > { %v391_v40 = vmax.f32 %v359_v28, 0.0  ;;  %v392_v41 = vmax.f32 %v360_v29, 0.0  ;;  %v407_v49 = vpack.c.bf16 %v376_v31, %v375_v30  ;;  %v309_v56 = vmul.f32 %v1173_v9, %v894_v42 }
  0x18   : > { %490 = vmatpush.bf16.msra.mxu0 %v884_v4  ;;  %1071 = vmatpush.bf16.msra.mxu1 %v884_v4  ;;  %v411_v50 = vpack.c.bf16 %v384_v35, %v383_v34  ;;  %v367_v51 = vadd.f32 %v1183_v17, %v331_v44  ;;  %v368_v55 = vadd.f32 %v1183_v17, %v332_v48  ;;  %v898_v25 = vunpack.c.l.bf16 %v1033_v13 }
  0x19   : > { %1072 = vmatpush.bf16.msra.mxu2 %v884_v4  ;;  %1073 = vmatpush.bf16.msra.mxu3 %v884_v4  ;;  %v415_v52 = vpack.c.bf16 %v392_v41, %v391_v40  ;;  %v310_v58 = vmul.f32 %v1173_v9, %v895_v45  ;;  %v317_v59 = vmul.f32 %v1173_v9, %v910_v46  ;;  %v899_v26 = vunpack.c.h.bf16 %v1033_v13 }
  0x1a   : > { %v399_v57 = vmax.f32 %v367_v51, 0.0  ;;  %v318_v60 = vmul.f32 %v1173_v9, %v911_v47  ;;  %v400_v61 = vmax.f32 %v368_v55, 0.0  ;;  %v325_v62 = vmul.f32 %v1173_v9, %v926_v53 }
  0x1b   : > { %v326_v63 = vmul.f32 %v1173_v9, %v927_v54  ;;  %v345_v1 = vadd.f32 %v1183_v17, %v309_v56  ;;  %v346_v2 = vadd.f32 %v1183_v17, %v310_v58  ;;  %v353_v3 = vadd.f32 %v1183_v17, %v317_v59 }
  0x1c   : > { %491 = vmatpush.bf16.msra.mxu0 %v883_v12  ;;  %1074 = vmatpush.bf16.msra.mxu1 %v883_v12  ;;  %v419_v0 = vpack.c.bf16 %v400_v61, %v399_v57  ;;  %v354_v4 = vadd.f32 %v1183_v17, %v318_v60  ;;  %v361_v5 = vadd.f32 %v1183_v17, %v325_v62  ;;  %v915_v28 = vunpack.c.h.bf16 %v1037_v19  ;;  %v1034_v60 = vld [vmem:[%s1162_s30 + $0x18] sm:$0xff]  }
  0x1d   : > { %1075 = vmatpush.bf16.msra.mxu2 %v883_v12  ;;  %1076 = vmatpush.bf16.msra.mxu3 %v883_v12  ;;  %v362_v6 = vadd.f32 %v1183_v17, %v326_v63  ;;  %v377_v7 = vmax.f32 %v345_v1, 0.0  ;;  %v378_v8 = vmax.f32 %v346_v2, 0.0  ;;  %v385_v10 = vmax.f32 %v353_v3, 0.0  ;;  %v1044_v12 = vld [vmem:[%s1162_s30 + $0x68] sm:$0xff]   ;;  %v1038_v63 = vld [vmem:[%s1162_s30 + $0x38] sm:$0xff]  }
  0x1e   : > { %v386_v11 = vmax.f32 %v354_v4, 0.0  ;;  %v942_v14 = vunpack.c.l.bf16 %v1044_v12  ;;  %v943_v15 = vunpack.c.h.bf16 %v1044_v12  ;;  %v393_v16 = vmax.f32 %v361_v5, 0.0 }
  0x1f   : > { %v394_v18 = vmax.f32 %v362_v6, 0.0  ;;  %v408_v23 = vpack.c.bf16 %v378_v8, %v377_v7  ;;  %v311_v36 = vmul.f32 %v1173_v9, %v898_v25  ;;  %v312_v37 = vmul.f32 %v1173_v9, %v899_v26 }
  0x20   : > { %492 = vmatpush.bf16.msra.mxu0 %v882_v20  ;;  %1077 = vmatpush.bf16.msra.mxu1 %v882_v20  ;;  %v333_v21 = vmul.f32 %v1173_v9, %v942_v14  ;;  %v334_v22 = vmul.f32 %v1173_v9, %v943_v15  ;;  %v412_v24 = vpack.c.bf16 %v386_v11, %v385_v10  ;;  %v946_v44 = vunpack.c.l.bf16 %v1045_v43  ;;  %v1046_v10 = vld [vmem:[%s1162_s30 + $0x78] sm:$0xff]  }
  0x21   : > { %1078 = vmatpush.bf16.msra.mxu2 %v882_v20  ;;  %1079 = vmatpush.bf16.msra.mxu3 %v882_v20  ;;  %v1041_v20 = vld [vmem:[%s1162_s30 + $0x50] sm:$0xff]   ;;  %v416_v31 = vpack.c.bf16 %v394_v18, %v393_v16  ;;  %v947_v45 = vunpack.c.h.bf16 %v1045_v43  ;;  %v347_v46 = vadd.f32 %v1183_v17, %v311_v36  ;;  %v348_v47 = vadd.f32 %v1183_v17, %v312_v37 }
  0x22   : > { %v369_v29 = vadd.f32 %v1183_v17, %v333_v21  ;;  %v370_v30 = vadd.f32 %v1183_v17, %v334_v22  ;;  %v930_v32 = vunpack.c.l.bf16 %v1041_v20  ;;  %v931_v33 = vunpack.c.h.bf16 %v1041_v20 }
  0x23   : > { %v336_v51 = vmul.f32 %v1173_v9, %v947_v45  ;;  %v379_v54 = vmax.f32 %v347_v46, 0.0  ;;  %v380_v55 = vmax.f32 %v348_v47, 0.0  ;;  %v902_v2 = vunpack.c.l.bf16 %v1034_v60 }
  0x24   : > { %493 = vmatpush.bf16.msra.mxu0 %v881_v27  ;;  %1080 = vmatpush.bf16.msra.mxu1 %v881_v27  ;;  %v401_v34 = vmax.f32 %v369_v29, 0.0  ;;  %v402_v35 = vmax.f32 %v370_v30, 0.0  ;;  %v327_v41 = vmul.f32 %v1173_v9, %v930_v32  ;;  %v328_v42 = vmul.f32 %v1173_v9, %v931_v33 }
  0x25   : > { %1081 = vmatpush.bf16.msra.mxu2 %v881_v27  ;;  %1082 = vmatpush.bf16.msra.mxu3 %v881_v27  ;;  %v914_v27 = vunpack.c.l.bf16 %v1037_v19  ;;  %v372_v57 = vadd.f32 %v1183_v17, %v336_v51  ;;  %v409_v1 = vpack.c.bf16 %v380_v55, %v379_v54  ;;  %v903_v6 = vunpack.c.h.bf16 %v1034_v60 }
  0x26   : > { %v420_v40 = vpack.c.bf16 %v402_v35, %v401_v34  ;;  %v364_v53 = vadd.f32 %v1183_v17, %v328_v42  ;;  %v918_v7 = vunpack.c.l.bf16 %v1038_v63  ;;  %v919_v8 = vunpack.c.h.bf16 %v1038_v63 }
  0x27   : > { %v319_v38 = vmul.f32 %v1173_v9, %v914_v27  ;;  %v404_v4 = vmax.f32 %v372_v57, 0.0  ;;  %v313_v14 = vmul.f32 %v1173_v9, %v902_v2  ;;  %v950_v16 = vunpack.c.l.bf16 %v1046_v10 }
  0x28   : > { %494 = vmatpush.bf16.msra.mxu0 %v880_v39  ;;  %1083 = vmatpush.bf16.msra.mxu1 %v880_v39  ;;  %v396_v62 = vmax.f32 %v364_v53, 0.0  ;;  %v951_v18 = vunpack.c.h.bf16 %v1046_v10  ;;  %v314_v19 = vmul.f32 %v1173_v9, %v903_v6  ;;  %v321_v20 = vmul.f32 %v1173_v9, %v918_v7 }
  0x29   : > { %1084 = vmatpush.bf16.msra.mxu2 %v880_v39  ;;  %1085 = vmatpush.bf16.msra.mxu3 %v880_v39  ;;  %v320_v39 = vmul.f32 %v1173_v9, %v915_v28  ;;  %v355_v48 = vadd.f32 %v1183_v17, %v319_v38  ;;  %v322_v21 = vmul.f32 %v1173_v9, %v919_v8 }
  0x2a   : > { %v338_v25 = vmul.f32 %v1173_v9, %v951_v18  ;;  %v349_v26 = vadd.f32 %v1183_v17, %v313_v14  ;;  %v350_v27 = vadd.f32 %v1183_v17, %v314_v19  ;;  %v357_v28 = vadd.f32 %v1183_v17, %v321_v20 }
  0x2b   : > { %495 = vmatmul.bf16.vlgmr.msra.gmra.mxu0 %v407_v49  ;;  %515 = vmatmul.bf16.vlgmr.msra.gmra.mxu1 %v411_v50  ;;  %v356_v49 = vadd.f32 %v1183_v17, %v320_v39  ;;  %v335_v50 = vmul.f32 %v1173_v9, %v946_v44  ;;  %v387_v58 = vmax.f32 %v355_v48, 0.0  ;;  %v358_v29 = vadd.f32 %v1183_v17, %v322_v21 }
  0x2c   : > { %535 = vmatmul.bf16.vlgmr.msra.gmra.mxu2 %v415_v52  ;;  %555 = vmatmul.bf16.vlgmr.msra.gmra.mxu3 %v419_v0  ;;  %v363_v52 = vadd.f32 %v1183_v17, %v327_v41  ;;  %v1042_v0 = vld [vmem:[%s1162_s30 + $0x58] sm:$0xff]   ;;  %v374_v33 = vadd.f32 %v1183_v17, %v338_v25  ;;  %v381_v34 = vmax.f32 %v349_v26, 0.0  ;;  %v382_v35 = vmax.f32 %v350_v27, 0.0 }
  0x2d   : > { %v371_v56 = vadd.f32 %v1183_v17, %v335_v50  ;;  %v388_v59 = vmax.f32 %v356_v49, 0.0  ;;  %v934_v12 = vunpack.c.l.bf16 %v1042_v0  ;;  %v935_v13 = vunpack.c.h.bf16 %v1042_v0 }
  0x2e   : > { %v395_v61 = vmax.f32 %v363_v52, 0.0  ;;  %v389_v36 = vmax.f32 %v357_v28, 0.0  ;;  %v410_v41 = vpack.c.bf16 %v382_v35, %v381_v34 }
  0x2f   : > { %v403_v3 = vmax.f32 %v371_v56, 0.0  ;;  %v413_v5 = vpack.c.bf16 %v388_v59, %v387_v58  ;;  %v329_v22 = vmul.f32 %v1173_v9, %v934_v12 }
  0x30   : > { %v417_v11 = vpack.c.bf16 %v396_v62, %v395_v61 }
  0x31   : > { %v421_v15 = vpack.c.bf16 %v404_v4, %v403_v3  ;;  %v365_v30 = vadd.f32 %v1183_v17, %v329_v22 }
  0x33   : > { %v397_v37 = vmax.f32 %v365_v30, 0.0 }
  0x3b   : > { %500 = vmatmul.bf16.gmra.mxu0 %v408_v23  ;;  %520 = vmatmul.bf16.gmra.mxu1 %v412_v24  ;;  %v330_v23 = vmul.f32 %v1173_v9, %v935_v13  ;;  %v337_v24 = vmul.f32 %v1173_v9, %v950_v16  ;;  %v390_v9 = vmax.f32 %v358_v29, 0.0 }
  0x3c   : > { %540 = vmatmul.bf16.gmra.mxu2 %v416_v31  ;;  %560 = vmatmul.bf16.gmra.mxu3 %v420_v40  ;;  %v406_v40 = vmax.f32 %v374_v33, 0.0 }
  0x3d   : > { %v366_v31 = vadd.f32 %v1183_v17, %v330_v23  ;;  %v373_v32 = vadd.f32 %v1183_v17, %v337_v24  ;;  %v414_v42 = vpack.c.bf16 %v390_v9, %v389_v36 }
  0x3f   : > { %v398_v38 = vmax.f32 %v366_v31, 0.0  ;;  %v405_v39 = vmax.f32 %v373_v32, 0.0 }
  0x41   : > { %v418_v43 = vpack.c.bf16 %v398_v38, %v397_v37  ;;  %v422_v44 = vpack.c.bf16 %v406_v40, %v405_v39 }
  0x4b   : > { %505 = vmatmul.bf16.gmra.mxu0 %v409_v1  ;;  %525 = vmatmul.bf16.gmra.mxu1 %v413_v5 }
  0x4c   : > { %545 = vmatmul.bf16.gmra.mxu2 %v417_v11  ;;  %565 = vmatmul.bf16.gmra.mxu3 %v421_v15 }
  0x5b   : > { %510 = vmatmul.bf16.gmra.mxu0 %v410_v41  ;;  %530 = vmatmul.bf16.gmra.mxu1 %v414_v42 }
  0x5c   : > { %550 = vmatmul.bf16.gmra.mxu2 %v418_v43  ;;  %570 = vmatmul.bf16.gmra.mxu3 %v422_v44 }
  0xa8   : > { %v496_v45 = vpop.f32.mrf.mxu0  ;;  %v1269_v46 = vpop.f32.mrf.mxu1 }
  0xa9   : > { %v677_v14 = vmul.f32 %v496_v45, %v496_v45 }
  0xaf   : > { %v1271_v17 = vpop.f32.mrf.mxu2  ;;  %v1284_v51 = vpop.f32.mrf.mxu3 }
  0xb0   : > { %v498_v47 = vpop.f32.mrf.mxu0  ;;  %v1280_v48 = vpop.f32.mrf.mxu1 }
  0xb1   : > { %v955_v49 = vpack.c.bf16 %v498_v47, %v496_v45  ;;  %v975_v50 = vpack.c.bf16 %v1280_v48, %v1269_v46  ;;  %v678_v13 = vmul.f32 %v498_v47, %v498_v47  ;;  %v640_v16 = vadd.f32 %v498_v47, %v496_v45 }
  0xb2   : > { %v685_v47 = vmul.f32 %v1269_v46, %v1269_v46 }
  0xb3   : > { %956 = vst [vmem:[%s1278_s26] sm:$0xff] %v955_v49   ;;  %v709_v18 = vadd.f32 %v678_v13, %v677_v14 }
  0xb4   : > { %1050 = vst [vmem:[%s1278_s26 + $0x20] sm:$0xff] %v975_v50  }
  0xb7   : > { %v1288_v52 = vpop.f32.mrf.mxu2  ;;  %v1294_v56 = vpop.f32.mrf.mxu3 }
  0xb8   : > { %v501_v53 = vpop.f32.mrf.mxu0  ;;  %v1290_v54 = vpop.f32.mrf.mxu1  ;;  %v995_v55 = vpack.c.bf16 %v1288_v52, %v1271_v17  ;;  %v1015_v57 = vpack.c.bf16 %v1294_v56, %v1284_v51 }
  0xb9   : > { %v679_v15 = vmul.f32 %v501_v53, %v501_v53  ;;  %v641_v20 = vadd.f32 %v640_v16, %v501_v53 }
  0xba   : > { %1054 = vst [vmem:[%s1278_s26 + $0x40] sm:$0xff] %v995_v55  }
  0xbb   : > { %1058 = vst [vmem:[%s1278_s26 + $0x60] sm:$0xff] %v1015_v57   ;;  %v710_v22 = vadd.f32 %v709_v18, %v679_v15 }
  0xbf   : > { %v1300_v58 = vpop.f32.mrf.mxu2  ;;  %v1306_v63 = vpop.f32.mrf.mxu3 }
  0xc0   : > { %v503_v59 = vpop.f32.mrf.mxu0  ;;  %v1302_v60 = vpop.f32.mrf.mxu1 }
  0xc1   : > { %v960_v61 = vpack.c.bf16 %v503_v59, %v501_v53  ;;  %v980_v62 = vpack.c.bf16 %v1302_v60, %v1290_v54  ;;  %v680_v19 = vmul.f32 %v503_v59, %v503_v59  ;;  %v642_v27 = vadd.f32 %v641_v20, %v503_v59 }
  0xc2   : > { %v686_v53 = vmul.f32 %v1280_v48, %v1280_v48  ;;  %v687_v59 = vmul.f32 %v1290_v54, %v1290_v54 }
  0xc3   : > { %1047 = vst [vmem:[%s1278_s26 + $0x8] sm:$0xff] %v960_v61   ;;  %v711_v29 = vadd.f32 %v710_v22, %v680_v19 }
  0xc4   : > { %1051 = vst [vmem:[%s1278_s26 + $0x28] sm:$0xff] %v980_v62  }
  0xc7   : > { %v1310_v0 = vpop.f32.mrf.mxu2  ;;  %v1316_v4 = vpop.f32.mrf.mxu3 }
  0xc8   : > { %v506_v1 = vpop.f32.mrf.mxu0  ;;  %v1312_v2 = vpop.f32.mrf.mxu1  ;;  %v1000_v3 = vpack.c.bf16 %v1310_v0, %v1300_v58  ;;  %v1020_v5 = vpack.c.bf16 %v1316_v4, %v1306_v63 }
  0xc9   : > { %v681_v23 = vmul.f32 %v506_v1, %v506_v1  ;;  %v643_v32 = vadd.f32 %v642_v27, %v506_v1  ;;  %v694_v27 = vmul.f32 %v1288_v52, %v1288_v52 }
  0xca   : > { %1055 = vst [vmem:[%s1278_s26 + $0x48] sm:$0xff] %v1000_v3  }
  0xcb   : > { %1059 = vst [vmem:[%s1278_s26 + $0x68] sm:$0xff] %v1020_v5   ;;  %v712_v33 = vadd.f32 %v711_v29, %v681_v23 }
  0xcf   : > { %v1322_v6 = vpop.f32.mrf.mxu2  ;;  %v1328_v12 = vpop.f32.mrf.mxu3 }
  0xd0   : > { %v508_v7 = vpop.f32.mrf.mxu0  ;;  %v1324_v8 = vpop.f32.mrf.mxu1 }
  0xd1   : > { %v965_v10 = vpack.c.bf16 %v508_v7, %v506_v1  ;;  %v985_v11 = vpack.c.bf16 %v1324_v8, %v1312_v2  ;;  %v682_v30 = vmul.f32 %v508_v7, %v508_v7  ;;  %v644_v35 = vadd.f32 %v643_v32, %v508_v7 }
  0xd2   : > { %v696_v32 = vmul.f32 %v1310_v0, %v1310_v0 }
  0xd3   : > { %1048 = vst [vmem:[%s1278_s26 + $0x10] sm:$0xff] %v965_v10   ;;  %v713_v36 = vadd.f32 %v712_v33, %v682_v30 }
  0xd4   : > { %1052 = vst [vmem:[%s1278_s26 + $0x30] sm:$0xff] %v985_v11   ;;  %v689_v11 = vmul.f32 %v1312_v2, %v1312_v2 }
  0xd7   : > { %v1332_v21 = vpop.f32.mrf.mxu2  ;;  %v1336_v28 = vpop.f32.mrf.mxu3 }
  0xd8   : > { %v511_v24 = vpop.f32.mrf.mxu0  ;;  %v531_v25 = vpop.f32.mrf.mxu1  ;;  %v1005_v26 = vpack.c.bf16 %v1332_v21, %v1322_v6  ;;  %v1025_v31 = vpack.c.bf16 %v1336_v28, %v1328_v12 }
  0xd9   : > { %v683_v34 = vmul.f32 %v511_v24, %v511_v24  ;;  %v645_v9 = vadd.f32 %v644_v35, %v511_v24  ;;  %v691_v19 = vmul.f32 %v531_v25, %v531_v25 }
  0xda   : > { %1056 = vst [vmem:[%s1278_s26 + $0x50] sm:$0xff] %v1005_v26  }
  0xdb   : > { %1060 = vst [vmem:[%s1278_s26 + $0x70] sm:$0xff] %v1025_v31   ;;  %v714_v38 = vadd.f32 %v713_v36, %v683_v34 }
  0xdf   : > { %v551_v37 = vpop.f32.mrf.mxu2  ;;  %v1342_v45 = vpop.f32.mrf.mxu3 }
  0xe0   : > { %v513_v39 = vpop.f32.mrf.mxu0  ;;  %v533_v40 = vpop.f32.mrf.mxu1 }
  0xe1   : > { %v970_v41 = vpack.c.bf16 %v513_v39, %v511_v24  ;;  %v646_v42 = vadd.f32 %v645_v9, %v513_v39  ;;  %v684_v43 = vmul.f32 %v513_v39, %v513_v39  ;;  %v990_v44 = vpack.c.bf16 %v533_v40, %v531_v25 }
  0xe2   : > { %v692_v23 = vmul.f32 %v533_v40, %v533_v40  ;;  %v693_v24 = vmul.f32 %v1271_v17, %v1271_v17  ;;  %v698_v9 = vmul.f32 %v1332_v21, %v1332_v21 }
  0xe3   : > { %1049 = vst [vmem:[%s1278_s26 + $0x18] sm:$0xff] %v970_v41   ;;  %v647_v49 = vadd.f32 %v646_v42, %v1269_v46  ;;  %v715_v50 = vadd.f32 %v714_v38, %v684_v43  ;;  %v688_v46 = vmul.f32 %v1302_v60, %v1302_v60 }
  0xe4   : > { %1053 = vst [vmem:[%s1278_s26 + $0x38] sm:$0xff] %v990_v44  }
  0xe5   : > { %v648_v55 = vadd.f32 %v647_v49, %v1280_v48  ;;  %v716_v57 = vadd.f32 %v715_v50, %v685_v47 }
  0xe7   : > { %v649_v61 = vadd.f32 %v648_v55, %v1290_v54  ;;  %v717_v62 = vadd.f32 %v716_v57, %v686_v53  ;;  %v553_v1 = vpop.f32.mrf.mxu2  ;;  %v573_v10 = vpop.f32.mrf.mxu3  ;;  %v690_v54 = vmul.f32 %v1324_v8, %v1324_v8  ;;  %v704_v55 = vmul.f32 %v1316_v4, %v1316_v4 }
  0xe8   : > { %v1010_v3 = vpack.c.bf16 %v553_v1, %v551_v37  ;;  %v1030_v48 = vpack.c.bf16 %v573_v10, %v1342_v45  ;;  %v700_v43 = vmul.f32 %v553_v1, %v553_v1 }
  0xe9   : > { %v718_v5 = vadd.f32 %v717_v62, %v687_v59  ;;  %v650_v7 = vadd.f32 %v649_v61, %v1302_v60  ;;  %v705_v59 = vmul.f32 %v1328_v12, %v1328_v12 }
  0xea   : > { %1057 = vst [vmem:[%s1278_s26 + $0x58] sm:$0xff] %v1010_v3  }
  0xeb   : > { %v651_v13 = vadd.f32 %v650_v7, %v1312_v2  ;;  %v719_v14 = vadd.f32 %v718_v5, %v688_v46  ;;  %1061 = vst [vmem:[%s1278_s26 + $0x78] sm:$0xff] %v1030_v48   ;;  %v707_v5 = vmul.f32 %v1342_v45, %v1342_v45  ;;  %v708_v48 = vmul.f32 %v573_v10, %v573_v10 }
  0xed   : > { %v652_v15 = vadd.f32 %v651_v13, %v1324_v8  ;;  %v720_v16 = vadd.f32 %v719_v14, %v689_v11  ;;  %v695_v8 = vmul.f32 %v1300_v58, %v1300_v58 }
  0xef   : > { %v653_v18 = vadd.f32 %v652_v15, %v531_v25  ;;  %v721_v60 = vadd.f32 %v720_v16, %v690_v54 }
  0xf1   : > { %v722_v20 = vadd.f32 %v721_v60, %v691_v19  ;;  %v654_v22 = vadd.f32 %v653_v18, %v533_v40  ;;  %v699_v40 = vmul.f32 %v551_v37, %v551_v37 }
  0xf3   : > { %v655_v26 = vadd.f32 %v654_v22, %v1271_v17  ;;  %v723_v2 = vadd.f32 %v722_v20, %v692_v23  ;;  %v697_v17 = vmul.f32 %v1322_v6, %v1322_v6 }
  0xf5   : > { %v656_v29 = vadd.f32 %v655_v26, %v1288_v52  ;;  %v724_v30 = vadd.f32 %v723_v2, %v693_v24 }
  0xf7   : > { %v657_v25 = vadd.f32 %v656_v29, %v1300_v58  ;;  %v725_v31 = vadd.f32 %v724_v30, %v694_v27 }
  0xf9   : > { %v726_v33 = vadd.f32 %v725_v31, %v695_v8  ;;  %v658_v34 = vadd.f32 %v657_v25, %v1310_v0  ;;  %v701_v0 = vmul.f32 %v1284_v51, %v1284_v51 }
  0xfb   : > { %v659_v35 = vadd.f32 %v658_v34, %v1322_v6  ;;  %v727_v36 = vadd.f32 %v726_v33, %v696_v32  ;;  %v702_v6 = vmul.f32 %v1294_v56, %v1294_v56 }
  0xfd   : > { %v660_v52 = vadd.f32 %v659_v35, %v1332_v21  ;;  %v728_v38 = vadd.f32 %v727_v36, %v697_v17  ;;  %v703_v21 = vmul.f32 %v1306_v63, %v1306_v63 }
  0xff   : > { %v729_v58 = vadd.f32 %v728_v38, %v698_v9  ;;  %v661_v39 = vadd.f32 %v660_v52, %v551_v37 }
 0x101   : > { %v730_v41 = vadd.f32 %v729_v58, %v699_v40  ;;  %v662_v42 = vadd.f32 %v661_v39, %v553_v1 }
 0x103   : > { %v663_v44 = vadd.f32 %v662_v42, %v1284_v51  ;;  %v731_v47 = vadd.f32 %v730_v41, %v700_v43 }
 0x105   : > { %v664_v49 = vadd.f32 %v663_v44, %v1294_v56  ;;  %v732_v50 = vadd.f32 %v731_v47, %v701_v0 }
 0x107   : > { %v665_v37 = vadd.f32 %v664_v49, %v1306_v63  ;;  %v733_v53 = vadd.f32 %v732_v50, %v702_v6  ;;  %v706_v63 = vmul.f32 %v1336_v28, %v1336_v28 }
 0x109   : > { %v734_v57 = vadd.f32 %v733_v53, %v703_v21  ;;  %v666_v51 = vadd.f32 %v665_v37, %v1316_v4 }
 0x10b   : > { %v667_v61 = vadd.f32 %v666_v51, %v1328_v12  ;;  %v735_v56 = vadd.f32 %v734_v57, %v704_v55 }
 0x10d   : > { %v668_v62 = vadd.f32 %v667_v61, %v1336_v28  ;;  %v736_v1 = vadd.f32 %v735_v56, %v705_v59 }
 0x10f   : > { %v737_v3 = vadd.f32 %v736_v1, %v706_v63  ;;  %v669_v46 = vadd.f32 %v668_v62, %v1342_v45 }
 0x111   : > { %v738_v4 = vadd.f32 %v737_v3, %v707_v5  ;;  %v670_v7 = vadd.f32 %v669_v46, %v573_v10 }
 0x113   : > { %v671_v11 = vrot.slane %v670_v7, 4  ;;  %v739_v13 = vadd.f32 %v738_v4, %v708_v48 }
 0x115   : > { %v672_v12 = vadd.f32 %v671_v11, %v670_v7  ;;  %v740_v14 = vrot.slane %v739_v13, 4 }
 0x117   : > { %v673_v54 = vrot.slane %v672_v12, 2  ;;  %v741_v15 = vadd.f32 %v740_v14, %v739_v13 }
 0x119   : > { %v674_v16 = vadd.f32 %v673_v54, %v672_v12  ;;  %v742_v28 = vrot.slane %v741_v15, 2 }
 0x11b   : > { %v675_v18 = vrot.slane %v674_v16, 1  ;;  %v743_v19 = vadd.f32 %v742_v28, %v741_v15 }
 0x11d   : > { %v744_v60 = vrot.slane %v743_v19, 1  ;;  %v676_v45 = vadd.f32 %v675_v18, %v674_v16 }
 0x11f   : > { %v745_v10 = vadd.f32 %v744_v60, %v743_v19 }
 0x121   : > { %v747_v20 = vsel %vm746_vm0, %v676_v45, %v745_v10 }
 0x122   : > { %748 = vst [vmem:[%s238_s28] sm:$0x3] %v747_v20 }
 0x123 PF: > { %s16_s18 = sadd.s32 1, %s1102_s18  }
 0x124   : > { %p13_p5 = scmp.ge.s32.totalorder %s16_s18, 4  }
 0x126   :  { %15 = sbr.rel (!%p13_p5) target bundleno = 1 (0x1), region = 78 }

// kernel: bottleneck_forward.5
= control target key start
LH: loop header
LB: loop body
LE: loop exit
PB: predicated region body
PF: predicated region fallthrough
CT: control target
= control target key end

     0   :  { %s3160_s24 = smov 0   ;;  %s3162_s25 = smov 0   ;;  %s3890_s0 = inlined_call_operand.vmem [shape: bf16[2,16,16,128], index: 0, kind: input, shape index: {}, may-alias: {0,1,2}]   ;;  %s3891_s1 = inlined_call_operand.vmem [shape: bf16[2,16,16,128], index: 1, kind: input, shape index: {}, may-alias: {0,1,2}]   ;;  %s3892_s2 = inlined_call_operand.vmem [shape: bf16[2,16,16,128], index: 2, kind: input, shape index: {}, may-alias: {0,1,2}]   ;;  %s3893_s3 = inlined_call_operand.vmem [shape: f32[1,128], index: 3, kind: input, shape index: {}]   ;;  %s3894_s4 = inlined_call_operand.vmem [shape: f32[1,128], index: 4, kind: input, shape index: {}]   ;;  %s3895_s5 = inlined_call_operand.vmem [shape: bf16[9,128,128], index: 5, kind: input, shape index: {}]   ;;  %s3896_s6 = inlined_call_operand.vmem [shape: bf16[2,16,16,128], index: 6, kind: output, shape index: {0}]   ;;  %s3897_s7 = inlined_call_operand.vmem [shape: f32[2,2,2,128], index: 7, kind: output, shape index: {1}]  }
   0x1   :  { %s3164_s26 = smov 0   ;;  %s3166_s27 = smov 0  }
   0x2   :  { %s3168_s28 = smov 0  }
   0x3 LB: > { %s27_s29 = sadd.s32 1, %s3110_s26  ;;  %s30_s30 = sadd.s32 1, %s3114_s27  ;;  %s3118_s28 = sphi %s3168_s28, %s18_s28   ;;  %s3114_s27 = sphi %s3166_s27, %s3906_s27   ;;  %s3110_s26 = sphi %s3164_s26, %s3905_s26   ;;  %s3106_s25 = sphi %s3162_s25, %s3904_s25   ;;  %s3102_s24 = sphi %s3160_s24, %s3903_s24  }
   0x4   : > { %p28_p0 = scmp.ge.s32.totalorder %s27_s29, 2  ;;  %p2392_p1 = scmp.ge.s32.totalorder %s3118_s28, 1 }
   0x5   : > { %p328_p2 = scmp.lt.s32.totalorder %s3118_s28, 5 }
   0x6   : > { %s3908_s29 = smov (%p28_p0, %s27_s29), 0  ;;  %s3910_s30 = smov (!%p28_p0, %s30_s30), %s3114_s27 }
   0x7   : > { %p329_p3 = pnand %p2392_p1, %p328_p2  ;;  %p32_p4 = scmp.ge.s32.totalorder %s3910_s30, 2 }
   0x8   : > { %s3196_s10 = sshll.u32 (!%p329_p3), %s3102_s24, 3  ;;  %p408_p5 = scmp.lt.s32.totalorder (!%p329_p3), %s3106_s25, 1 }
   0x9   : > { %s3912_s30 = smov (%p32_p4, %s3910_s30), 0  ;;  %332 = sbr.rel (%p329_p3) target bundleno = 500 (0x1f4), region = 44 }
   0xa   : > { %p424_p6 = scmp.lt.s32.totalorder (!%p329_p3), %s3196_s10, 15  ;;  %s3209_s15 = sadd.s32 (!%p329_p3), 4294967295, %s3196_s10 }
   0xb   : > { %p406_p7 = scmp.gt.s32.totalorder (!%p329_p3), %s3209_s15, 0  ;;  %p2395_p8 = scmp.lt.s32.totalorder (!%p329_p3), %s3209_s15, 15 }
   0xc   : > { %p573_p9 = scmp.eq.s32.totalorder (!%p329_p3), %s3102_s24, 0  ;;  %p591_p11 = scmp.eq.s32.totalorder (!%p329_p3), %s3102_s24, 1 }
   0xd   : > { %p462_p12 = scmp.lt.s32.totalorder (!%p329_p3), %s3102_s24, 1 }
   0xe   : > { %v2861_v0 = vld [vmem:[%s3895_s5 + $0x78] sm:$0xff]  ;;  %v2860_v1 = vld [vmem:[%s3895_s5 + $0x70] sm:$0xff]  ;;  %s3914_s25 = smov (!%p408_p5, %s3106_s25), 1  ;;  %v2859_v2 = vld [vmem:[%s3895_s5 + $0x68] sm:$0xff]  ;;  %vm749_vm1 = vcmask 1040384   ;;  %vm1120_vm5 = vcmask 1046528  }
   0xf   : > { %3012 = vmatpush.bf16.msra.mxu1 %v2861_v0  ;;  %3013 = vmatpush.bf16.msra.mxu2 %v2861_v0  ;;  %s425_s13 = scalar_select %p424_p6, %s3196_s10, 15  ;;  %v3231_v3 = vld [vmem:[%s3893_s3] ss:$0 sm:$0xff]  ;;  %v2857_v27 = vld [vmem:[%s3895_s5 + $0x58] sm:$0xff]  ;;  %vm750_vm2 = vsmask.f32 256 }
  0x10   : > { %3014 = vmatpush.bf16.msra.mxu3 %v2861_v0  ;;  %958 = vmatpush.bf16.msra.mxu0 %v2861_v0  ;;  %s3206_s14 = sshll.u32 %s3914_s25, 5  ;;  %v2858_v7 = vld [vmem:[%s3895_s5 + $0x60] sm:$0xff]  ;;  %v2856_v45 = vld [vmem:[%s3895_s5 + $0x50] sm:$0xff]  ;;  %v2855_v62 = vld [vmem:[%s3895_s5 + $0x48] sm:$0xff]  ;;  %vm788_vm3 = vsmask.f32 7424 }
  0x11   : > { %s2404_s16 = sshll.u32 %s425_s13, 1  ;;  %v3245_v10 = vld [vmem:[%s3894_s4] ss:$0 sm:$0xff]  ;;  %vm3306_vm4 = vmand %vm749_vm1, %vm750_vm2  ;;  %s3922_s24 = smov (!%p462_p12, %s3102_s24), 1 }
  0x12   : > { %s3216_s19 = sadd.s32 %s2404_s16, %s3206_s14 }
  0x13   : > { %3015 = vmatpush.bf16.msra.mxu1 %v2860_v1  ;;  %3016 = vmatpush.bf16.msra.mxu2 %v2860_v1  ;;  %s2406_s20 = sshll.u32 %s3216_s19, 2  ;;  %s2418_s19 = sshll.u32 %s3914_s25, 1 }
  0x14   : > { %3017 = vmatpush.bf16.msra.mxu3 %v2860_v1  ;;  %959 = vmatpush.bf16.msra.mxu0 %v2860_v1  ;;  %s3226_s23 = scalar_lea.vmem %s3891_s1, %s2406_s20  ;;  %s3845_s17 = scalar_lea.vmem %s3896_s6, %s2406_s20 }
  0x15   : > { %v2998_v4 = vld [vmem:[%s3226_s23 + $0x8] sm:$0xff]   ;;  %v3000_v5 = vld [vmem:[%s3226_s23 + $0x18] sm:$0xff]   ;;  %s407_s11 = scalar_select %p406_p7, %s3209_s15, 0  ;;  %v2999_v13 = vld [vmem:[%s3226_s23 + $0x10] sm:$0xff]  }
  0x16   : > { %v3002_v6 = vld [vmem:[%s3226_s23 + $0x28] sm:$0xff]   ;;  %v2924_v8 = vunpack.c.l.bf16 %v2998_v4  ;;  %v2925_v9 = vunpack.c.h.bf16 %v2998_v4  ;;  %v2932_v11 = vunpack.c.l.bf16 %v3000_v5  ;;  %v2933_v12 = vunpack.c.h.bf16 %v3000_v5  ;;  %s3249_s18 = scalar_select %p573_p9, 1, 0  ;;  %v3259_v22 = vld [vmem:[%s3226_s23 + $0x20] sm:$0xff]  }
  0x17   : > { %3018 = vmatpush.bf16.msra.mxu1 %v2859_v2  ;;  %3019 = vmatpush.bf16.msra.mxu2 %v2859_v2  ;;  %v2940_v14 = vunpack.c.l.bf16 %v3002_v6  ;;  %v2941_v15 = vunpack.c.h.bf16 %v3002_v6  ;;  %s3916_s11 = smov (!%p2395_p8, %s407_s11), 15  ;;  %v2928_v16 = vunpack.c.l.bf16 %v2999_v13  ;;  %v2929_v17 = vunpack.c.h.bf16 %v2999_v13  ;;  %s465_s20 = sadd.s32 %s2418_s19, %s3922_s24 }
  0x18   : > { %3020 = vmatpush.bf16.msra.mxu3 %v2859_v2  ;;  %960 = vmatpush.bf16.msra.mxu0 %v2859_v2  ;;  %v508_v18 = vmul.f32 %v3231_v3, %v2924_v8  ;;  %v509_v19 = vmul.f32 %v3231_v3, %v2925_v9  ;;  %v512_v20 = vmul.f32 %v3231_v3, %v2932_v11  ;;  %s2400_s21 = sshll.u32 %s3916_s11, 1  ;;  %v585_v25 = vstv %s3249_s18 }
  0x19   : > { %v513_v21 = vmul.f32 %v3231_v3, %v2933_v12  ;;  %v516_v23 = vmul.f32 %v3231_v3, %v2940_v14  ;;  %v517_v24 = vmul.f32 %v3231_v3, %v2941_v15  ;;  %v510_v26 = vmul.f32 %v3231_v3, %v2928_v16  ;;  %s414_s8 = sadd.s32 %s3206_s14, %s2400_s21 }
  0x1a   : > { %v527_v28 = vadd.f32 %v3245_v10, %v508_v18  ;;  %v528_v29 = vadd.f32 %v3245_v10, %v509_v19  ;;  %v531_v30 = vadd.f32 %v3245_v10, %v512_v20  ;;  %s2402_s9 = sshll.u32 %s414_s8, 2  ;;  %vm3275_vm0 = vcmp.eq.s32.totalorder %v585_v25, 1 }
  0x1b   : > { %3021 = vmatpush.bf16.msra.mxu1 %v2858_v7  ;;  %3022 = vmatpush.bf16.msra.mxu2 %v2858_v7  ;;  %v532_v31 = vadd.f32 %v3245_v10, %v513_v21  ;;  %v535_v32 = vadd.f32 %v3245_v10, %v516_v23  ;;  %v536_v33 = vadd.f32 %v3245_v10, %v517_v24  ;;  %v2936_v35 = vunpack.c.l.bf16 %v3259_v22  ;;  %s416_s13 = scalar_lea.vmem %s3890_s0, %s2402_s9 }
  0x1c   : > { %3023 = vmatpush.bf16.msra.mxu3 %v2858_v7  ;;  %961 = vmatpush.bf16.msra.mxu0 %v2858_v7  ;;  %v543_v36 = vmax.f32 %v527_v28, 0.0  ;;  %v544_v37 = vmax.f32 %v528_v29, 0.0  ;;  %v547_v38 = vmax.f32 %v531_v30, 0.0  ;;  %v511_v39 = vmul.f32 %v3231_v3, %v2929_v17  ;;  %v2951_v43 = vld [vmem:[%s416_s13] sm:$0xff]   ;;  %s602_s11 = scalar_select %p591_p11, 1, 0 }
  0x1d   : > { %v548_v40 = vmax.f32 %v532_v31, 0.0  ;;  %v551_v41 = vmax.f32 %v535_v32, 0.0  ;;  %v552_v42 = vmax.f32 %v536_v33, 0.0  ;;  %v529_v44 = vadd.f32 %v3245_v10, %v510_v26  ;;  %v2854_v17 = vld [vmem:[%s3895_s5 + $0x40] sm:$0xff]  ;;  %v2869_v26 = vld [vmem:[%s3895_s5 + $0xb8] sm:$0xff] }
  0x1e   : > { %v559_v46 = vpack.c.bf16 %v543_v36, %v543_v36  ;;  %v560_v47 = vpack.c.bf16 %v544_v37, %v544_v37  ;;  %v563_v48 = vpack.c.bf16 %v547_v38, %v547_v38  ;;  %v2952_v49 = vunpack.c.l.bf16 %v2951_v43  ;;  %v2853_v31 = vld [vmem:[%s3895_s5 + $0x38] sm:$0xff] }
  0x1f   : > { %3024 = vmatpush.bf16.msra.mxu1 %v2857_v27  ;;  %3025 = vmatpush.bf16.msra.mxu2 %v2857_v27  ;;  %v564_v50 = vpack.c.bf16 %v548_v40, %v548_v40  ;;  %v567_v51 = vpack.c.bf16 %v551_v41, %v551_v41  ;;  %v568_v52 = vpack.c.bf16 %v552_v42, %v552_v42  ;;  %v2953_v53 = vunpack.c.h.bf16 %v2951_v43  ;;  %v2877_v40 = vld [vmem:[%s3895_s5 + $0xf8] sm:$0xff] }
  0x20   : > { %3026 = vmatpush.bf16.msra.mxu3 %v2857_v27  ;;  %962 = vmatpush.bf16.msra.mxu0 %v2857_v27  ;;  %v633_v54 = vunpack.c.l.b16 %v559_v46  ;;  %v634_v55 = vunpack.c.l.b16 %v560_v47  ;;  %v637_v56 = vunpack.c.l.b16 %v563_v48  ;;  %v578_v57 = vmul.f32 %v3231_v3, %v2952_v49  ;;  %v2885_v41 = vld [vmem:[%s3895_s5 + $0x138] sm:$0xff]  ;;  %v2868_v49 = vld [vmem:[%s3895_s5 + $0xb0] sm:$0xff] }
  0x21   : > { %v638_v58 = vunpack.c.l.b16 %v564_v50  ;;  %v641_v59 = vunpack.c.l.b16 %v567_v51  ;;  %v642_v60 = vunpack.c.l.b16 %v568_v52  ;;  %v579_v61 = vmul.f32 %v3231_v3, %v2953_v53 }
  0x22   : > { %v651_v63 = vpack.c.b16 %v634_v55, %v633_v54  ;;  %v580_v0 = vadd.f32 %v3245_v10, %v578_v57  ;;  %v530_v1 = vadd.f32 %v3245_v10, %v511_v39  ;;  %v545_v2 = vmax.f32 %v529_v44, 0.0  ;;  %v2852_v54 = vld [vmem:[%s3895_s5 + $0x30] sm:$0xff] }
  0x23   : > { %3027 = vmatpush.bf16.msra.mxu1 %v2856_v45  ;;  %3028 = vmatpush.bf16.msra.mxu2 %v2856_v45  ;;  %v653_v4 = vpack.c.b16 %v638_v58, %v637_v56  ;;  %v655_v5 = vpack.c.b16 %v642_v60, %v641_v59  ;;  %v581_v6 = vadd.f32 %v3245_v10, %v579_v61  ;;  %v2937_v7 = vunpack.c.h.bf16 %v3259_v22  ;;  %v2876_v59 = vld [vmem:[%s3895_s5 + $0xf0] sm:$0xff] }
  0x24   : > { %3029 = vmatpush.bf16.msra.mxu3 %v2856_v45  ;;  %963 = vmatpush.bf16.msra.mxu0 %v2856_v45  ;;  %v674_v8 = vshrl.u32 %v651_v63, 16  ;;  %v677_v9 = vshll.u32 %v651_v63, 16  ;;  %v582_v11 = vmax.f32 %v580_v0, 0.0  ;;  %v546_v12 = vmax.f32 %v530_v1, 0.0  ;;  %v2884_v60 = vld [vmem:[%s3895_s5 + $0x130] sm:$0xff] }
  0x25   : > { %v688_v13 = vshrl.u32 %v653_v4, 16  ;;  %v691_v14 = vshll.u32 %v653_v4, 16  ;;  %v702_v15 = vshrl.u32 %v655_v5, 16  ;;  %v705_v16 = vshll.u32 %v655_v5, 16  ;;  %v3003_v1 = vld [vmem:[%s3226_s23 + $0x30] sm:$0xff]  }
  0x26   : > { %v676_v18 = vrot.slane %v674_v8, 7  ;;  %v583_v19 = vmax.f32 %v581_v6, 0.0  ;;  %v587_v20 = vsel %vm3275_vm0, 0.0, %v582_v11  ;;  %v3302_v21 = vpack.c.bf16 %v545_v2, %v545_v2  ;;  %v2867_v11 = vld [vmem:[%s3895_s5 + $0xa8] sm:$0xff] }
  0x27   : > { %3030 = vmatpush.bf16.msra.mxu1 %v2855_v62  ;;  %3031 = vmatpush.bf16.msra.mxu2 %v2855_v62  ;;  %v690_v24 = vrot.slane %v688_v13, 7  ;;  %v704_v25 = vrot.slane %v702_v15, 7  ;;  %v589_v27 = vpack.c.bf16 %v587_v20, %v587_v20  ;;  %v562_v28 = vpack.c.bf16 %v546_v12, %v546_v12  ;;  %v2883_v20 = vld [vmem:[%s3895_s5 + $0x128] sm:$0xff] }
  0x28   : > { %3032 = vmatpush.bf16.msra.mxu3 %v2855_v62  ;;  %964 = vmatpush.bf16.msra.mxu0 %v2855_v62  ;;  %v679_v29 = vor.u32 %v677_v9, %v676_v18  ;;  %v3315_v30 = vsel %vm3306_vm4, %v676_v18, 0  ;;  %v588_v32 = vsel %vm3275_vm0, 0.0, %v583_v19  ;;  %v635_v33 = vunpack.c.l.b16 %v3302_v21 }
  0x29   : > { %v821_v36 = vshll.u32 %v3315_v30, 16  ;;  %v693_v37 = vor.u32 %v691_v14, %v690_v24  ;;  %v3326_v38 = vsel %vm3306_vm4, %v690_v24, 0  ;;  %v707_v39 = vor.u32 %v705_v16, %v704_v25  ;;  %v2875_v16 = vld [vmem:[%s3895_s5 + $0xe8] sm:$0xff]  ;;  %v2919_v24 = vld [vmem:[%s3226_s23] sm:$0xff]  }
  0x2a   : > { %v3336_v34 = vsel %vm3306_vm4, 0, %v679_v29  ;;  %v845_v42 = vshll.u32 %v3326_v38, 16  ;;  %v3341_v43 = vsel %vm3306_vm4, %v704_v25, 0  ;;  %v590_v44 = vpack.c.bf16 %v588_v32, %v588_v32 }
  0x2b   : > { %3033 = vmatpush.bf16.msra.mxu1 %v2854_v17  ;;  %3034 = vmatpush.bf16.msra.mxu2 %v2854_v17  ;;  %v814_v45 = vshrl.u32 %v3336_v34, 16  ;;  %v816_v46 = vshll.u32 %v3336_v34, 16  ;;  %v823_v47 = vrot.slane %v821_v36, 1  ;;  %v3347_v48 = vsel %vm3306_vm4, 0, %v693_v37  ;;  %v2850_v37 = vld [vmem:[%s3895_s5 + $0x20] sm:$0xff] }
  0x2c   : > { %3035 = vmatpush.bf16.msra.mxu3 %v2854_v17  ;;  %v838_v50 = vshrl.u32 %v3347_v48, 16  ;;  %v840_v51 = vshll.u32 %v3347_v48, 16  ;;  %v847_v52 = vrot.slane %v845_v42, 1  ;;  %v3356_v53 = vsel %vm3306_vm4, 0, %v707_v39  ;;  %965 = vmatpush.bf16.msra.mxu0 %v2854_v17  ;;  %v2874_v39 = vld [vmem:[%s3895_s5 + $0xe0] sm:$0xff] }
  0x2d   : > { %v818_v55 = vrot.slane %v816_v46, 1  ;;  %v862_v56 = vshrl.u32 %v3356_v53, 16  ;;  %v864_v57 = vshll.u32 %v3356_v53, 16  ;;  %v869_v58 = vshll.u32 %v3341_v43, 16 }
  0x2e   : > { %v842_v61 = vrot.slane %v840_v51, 1  ;;  %v629_v62 = vunpack.c.l.b16 %v589_v27  ;;  %v630_v63 = vunpack.c.l.b16 %v590_v44  ;;  %v636_v0 = vunpack.c.l.b16 %v562_v28 }
  0x2f   : > { %1218 = vmatpush.bf16.msrb.mxu2 %v2869_v26  ;;  %1055 = vmatpush.bf16.msrb.mxu1 %v2853_v31  ;;  %v819_v2 = vor.u32 %v818_v55, %v814_v45  ;;  %v866_v4 = vrot.slane %v864_v57, 1  ;;  %v871_v5 = vrot.slane %v869_v58, 1  ;;  %v514_v6 = vmul.f32 %v3231_v3, %v2936_v35  ;;  %v2851_v35 = vld [vmem:[%s3895_s5 + $0x28] sm:$0xff]  ;;  %v2866_v31 = vld [vmem:[%s3895_s5 + $0xa0] sm:$0xff] }
  0x30   : > { %1348 = vmatpush.bf16.msrb.mxu3 %v2877_v40  ;;  %1491 = vmatpush.bf16.msrb.mxu0 %v2885_v41  ;;  %v843_v8 = vor.u32 %v842_v61, %v838_v50  ;;  %v649_v9 = vpack.c.b16 %v630_v63, %v629_v62  ;;  %v652_v12 = vpack.c.b16 %v636_v0, %v635_v33  ;;  %v2944_v22 = vunpack.c.l.bf16 %v3003_v1  ;;  %v2882_v50 = vld [vmem:[%s3895_s5 + $0x120] sm:$0xff]  ;;  %v2849_v0 = vld [vmem:[%s3895_s5 + $0x18] sm:$0xff] }
  0x31   : > { %v515_v13 = vmul.f32 %v3231_v3, %v2937_v7  ;;  %v3381_v14 = vsel %vm788_vm3, %v819_v2, %v823_v47  ;;  %v867_v15 = vor.u32 %v866_v4, %v862_v56  ;;  %v533_v17 = vadd.f32 %v3245_v10, %v514_v6 }
  0x32   : > { %976 = vmatmul.bf16.vlgmr.msra.gmra.mxu1 %v3381_v14  ;;  %v3392_v7 = vsel %vm788_vm3, %v843_v8, %v847_v52  ;;  %v660_v18 = vshrl.u32 %v649_v9, 16  ;;  %v663_v19 = vshll.u32 %v649_v9, 16  ;;  %v681_v21 = vshrl.u32 %v652_v12, 16  ;;  %v2881_v8 = vld [vmem:[%s3895_s5 + $0x118] sm:$0xff] }
  0x33   : > { %1219 = vmatpush.bf16.msrb.mxu2 %v2868_v49  ;;  %1056 = vmatpush.bf16.msrb.mxu1 %v2852_v54  ;;  %v3400_v25 = vsel %vm788_vm3, %v867_v15, %v871_v5  ;;  %v684_v26 = vshll.u32 %v652_v12, 16  ;;  %v534_v27 = vadd.f32 %v3245_v10, %v515_v13  ;;  %v549_v28 = vmax.f32 %v533_v17, 0.0 }
  0x34   : > { %1349 = vmatpush.bf16.msrb.mxu3 %v2876_v59  ;;  %1492 = vmatpush.bf16.msrb.mxu0 %v2884_v60  ;;  %v662_v29 = vrot.slane %v660_v18, 7  ;;  %v683_v32 = vrot.slane %v681_v21, 7  ;;  %v2945_v33 = vunpack.c.h.bf16 %v3003_v1  ;;  %v518_v36 = vmul.f32 %v3231_v3, %v2944_v22  ;;  %v2865_v60 = vld [vmem:[%s3895_s5 + $0x98] sm:$0xff]  ;;  %v2864_v22 = vld [vmem:[%s3895_s5 + $0x90] sm:$0xff] }
  0x35   : > { %986 = vmatmul.bf16.vlgmr.msra.gmra.mxu2 %v3392_v7  ;;  %996 = vmatmul.bf16.vlgmr.msra.gmra.mxu3 %v3400_v25  ;;  %v550_v40 = vmax.f32 %v534_v27, 0.0  ;;  %v565_v41 = vpack.c.bf16 %v549_v28, %v549_v28  ;;  %v2920_v42 = vunpack.c.l.bf16 %v2919_v24  ;;  %v2921_v44 = vunpack.c.h.bf16 %v2919_v24  ;;  %v2873_v1 = vld [vmem:[%s3895_s5 + $0xd8] sm:$0xff]  ;;  %v2848_v21 = vld [vmem:[%s3895_s5 + $0x10] sm:$0xff] }
  0x36   : > { %v665_v45 = vor.u32 %v663_v19, %v662_v29  ;;  %v3416_v46 = vsel %vm3306_vm4, %v662_v29, 0  ;;  %v686_v47 = vor.u32 %v684_v26, %v683_v32  ;;  %v3420_v49 = vsel %vm3306_vm4, %v683_v32, 0  ;;  %v2872_v24 = vld [vmem:[%s3895_s5 + $0xd0] sm:$0xff] }
  0x37   : > { %1220 = vmatpush.bf16.msrb.mxu2 %v2867_v11  ;;  %1057 = vmatpush.bf16.msrb.mxu1 %v2851_v35  ;;  %v797_v51 = vshll.u32 %v3416_v46, 16  ;;  %v833_v52 = vshll.u32 %v3420_v49, 16  ;;  %v566_v54 = vpack.c.bf16 %v550_v40, %v550_v40  ;;  %v639_v55 = vunpack.c.l.b16 %v565_v41 }
  0x38   : > { %1350 = vmatpush.bf16.msrb.mxu3 %v2875_v16  ;;  %1493 = vmatpush.bf16.msrb.mxu0 %v2883_v20  ;;  %v3429_v56 = vsel %vm3306_vm4, 0, %v665_v45  ;;  %v3433_v57 = vsel %vm3306_vm4, 0, %v686_v47  ;;  %v519_v58 = vmul.f32 %v3231_v3, %v2945_v33  ;;  %v537_v59 = vadd.f32 %v3245_v10, %v518_v36  ;;  %v2847_v47 = vld [vmem:[%s3895_s5 + $0x8] sm:$0xff] }
  0x39   : > { %v790_v61 = vshrl.u32 %v3429_v56, 16  ;;  %v792_v62 = vshll.u32 %v3429_v56, 16  ;;  %v799_v63 = vrot.slane %v797_v51, 1  ;;  %v826_v2 = vshrl.u32 %v3433_v57, 16 }
  0x3a   : > { %v828_v4 = vshll.u32 %v3433_v57, 16  ;;  %v640_v5 = vunpack.c.l.b16 %v566_v54  ;;  %v538_v6 = vadd.f32 %v3245_v10, %v519_v58  ;;  %v553_v11 = vmax.f32 %v537_v59, 0.0 }
  0x3b   : > { %1221 = vmatpush.bf16.msrb.mxu2 %v2866_v31  ;;  %1058 = vmatpush.bf16.msrb.mxu1 %v2850_v37  ;;  %v794_v9 = vrot.slane %v792_v62, 1  ;;  %v506_v12 = vmul.f32 %v3231_v3, %v2920_v42  ;;  %v507_v13 = vmul.f32 %v3231_v3, %v2921_v44  ;;  %v835_v35 = vrot.slane %v833_v52, 1  ;;  %v2880_v31 = vld [vmem:[%s3895_s5 + $0x110] sm:$0xff]  ;;  %v2863_v42 = vld [vmem:[%s3895_s5 + $0x88] sm:$0xff] }
  0x3c   : > { %1351 = vmatpush.bf16.msrb.mxu3 %v2874_v39  ;;  %1494 = vmatpush.bf16.msrb.mxu0 %v2882_v50  ;;  %v830_v15 = vrot.slane %v828_v4, 1  ;;  %v654_v16 = vpack.c.b16 %v640_v5, %v639_v55  ;;  %v554_v17 = vmax.f32 %v538_v6, 0.0  ;;  %v569_v19 = vpack.c.bf16 %v553_v11, %v553_v11  ;;  %v2871_v50 = vld [vmem:[%s3895_s5 + $0xc8] sm:$0xff]  ;;  %v2846_v5 = vld [vmem:[%s3895_s5] sm:$0xff] }
  0x3d   : > { %v795_v18 = vor.u32 %v794_v9, %v790_v61  ;;  %v525_v20 = vadd.f32 %v3245_v10, %v506_v12  ;;  %v526_v36 = vadd.f32 %v3245_v10, %v507_v13  ;;  %v2879_v55 = vld [vmem:[%s3895_s5 + $0x108] sm:$0xff]  ;;  %v2870_v6 = vld [vmem:[%s3895_s5 + $0xc0] sm:$0xff]  ;;  %v2901_v9 = vld [vmem:[%s3895_s5 + $0x1b8] sm:$0xff] }
  0x3e   : > { %v831_v26 = vor.u32 %v830_v15, %v826_v2  ;;  %v695_v27 = vshrl.u32 %v654_v16, 16  ;;  %v698_v28 = vshll.u32 %v654_v16, 16  ;;  %v570_v29 = vpack.c.bf16 %v554_v17, %v554_v17  ;;  %v2878_v11 = vld [vmem:[%s3895_s5 + $0x100] sm:$0xff] }
  0x3f   : > { %1222 = vmatpush.bf16.msrb.mxu2 %v2865_v60  ;;  %1059 = vmatpush.bf16.msrb.mxu1 %v2849_v0  ;;  %v800_v32 = vsel %vm788_vm3, %v795_v18, %v799_v63  ;;  %v643_v33 = vunpack.c.l.b16 %v569_v19  ;;  %v541_v37 = vmax.f32 %v525_v20, 0.0  ;;  %v542_v44 = vmax.f32 %v526_v36, 0.0  ;;  %v2862_v0 = vld [vmem:[%s3895_s5 + $0x80] sm:$0xff]  ;;  %v2917_v18 = vld [vmem:[%s3895_s5 + $0x238] sm:$0xff] }
  0x40   : > { %1352 = vmatpush.bf16.msrb.mxu3 %v2873_v1  ;;  %1495 = vmatpush.bf16.msrb.mxu0 %v2881_v8  ;;  %v3472_v39 = vsel %vm788_vm3, %v831_v26, %v835_v35  ;;  %v697_v40 = vrot.slane %v695_v27, 7  ;;  %v644_v41 = vunpack.c.l.b16 %v570_v29  ;;  %v2909_v35 = vld [vmem:[%s3895_s5 + $0x1f8] sm:$0xff] }
  0x41   : > { %966 = vmatmul.bf16.vlgmr.msra.gmra.mxu0 %v800_v32  ;;  %v557_v45 = vpack.c.bf16 %v541_v37, %v541_v37  ;;  %v558_v59 = vpack.c.bf16 %v542_v44, %v542_v44 }
  0x42   : > { %981 = vmatmul.bf16.gmra.mxu1 %v3472_v39  ;;  %v700_v51 = vor.u32 %v698_v28, %v697_v40  ;;  %v3486_v52 = vsel %vm3306_vm4, %v697_v40, 0  ;;  %v656_v54 = vpack.c.b16 %v644_v41, %v643_v33 }
  0x43   : > { %1223 = vmatpush.bf16.msrb.mxu2 %v2864_v22  ;;  %1060 = vmatpush.bf16.msrb.mxu1 %v2848_v21  ;;  %v857_v58 = vshll.u32 %v3486_v52, 16  ;;  %v631_v60 = vunpack.c.l.b16 %v557_v45  ;;  %v632_v4 = vunpack.c.l.b16 %v558_v59  ;;  %v2893_v22 = vld [vmem:[%s3895_s5 + $0x178] sm:$0xff]  ;;  %v1121_v59 = vrot.slane %v3429_v56, 1 }
  0x44   : > { %1353 = vmatpush.bf16.msrb.mxu3 %v2872_v24  ;;  %1496 = vmatpush.bf16.msrb.mxu0 %v2880_v31  ;;  %v3494_v61 = vsel %vm3306_vm4, 0, %v700_v51  ;;  %v709_v62 = vshrl.u32 %v656_v54, 16  ;;  %v712_v63 = vshll.u32 %v656_v54, 16  ;;  %v2908_v51 = vld [vmem:[%s3895_s5 + $0x1f0] sm:$0xff] }
  0x45   : > { %v850_v1 = vshrl.u32 %v3494_v61, 16  ;;  %v852_v2 = vshll.u32 %v3494_v61, 16  ;;  %v859_v13 = vrot.slane %v857_v58, 1  ;;  %v650_v15 = vpack.c.b16 %v632_v4, %v631_v60 }
  0x46   : > { %v711_v8 = vrot.slane %v709_v62, 7  ;;  %v1122_v60 = vrot.slane %v3416_v46, 1  ;;  %v2899_v46 = vld [vmem:[%s3895_s5 + $0x1a8] sm:$0xff] }
  0x47   : > { %1224 = vmatpush.bf16.msrb.mxu2 %v2863_v42  ;;  %1061 = vmatpush.bf16.msrb.mxu1 %v2847_v47  ;;  %v854_v12 = vrot.slane %v852_v2, 1  ;;  %v667_v21 = vshrl.u32 %v650_v15, 16  ;;  %v670_v26 = vshll.u32 %v650_v15, 16  ;;  %v2890_v15 = vld [vmem:[%s3895_s5 + $0x160] sm:$0xff] }
  0x48   : > { %1354 = vmatpush.bf16.msrb.mxu3 %v2871_v50  ;;  %1497 = vmatpush.bf16.msrb.mxu0 %v2879_v55  ;;  %v714_v16 = vor.u32 %v712_v63, %v711_v8  ;;  %v3518_v17 = vsel %vm3306_vm4, %v711_v8, 0  ;;  %v2900_v50 = vld [vmem:[%s3895_s5 + $0x1b0] sm:$0xff] }
  0x49   : > { %v855_v19 = vor.u32 %v854_v12, %v850_v1  ;;  %v881_v20 = vshll.u32 %v3518_v17, 16  ;;  %v669_v31 = vrot.slane %v667_v21, 7  ;;  %v2892_v63 = vld [vmem:[%s3895_s5 + $0x170] sm:$0xff]  ;;  %v1123_v1 = vsel %vm1120_vm5, %v1121_v59, %v1122_v60  ;;  %v2913_v21 = vld [vmem:[%s3895_s5 + $0x218] sm:$0xff] }
  0x4a   : > { %v3529_v24 = vsel %vm3306_vm4, 0, %v714_v16  ;;  %v1127_v12 = vrot.slane %v3336_v34, 1 }
  0x4b   : > { %1225 = vmatpush.bf16.msrb.mxu2 %v2862_v0  ;;  %1062 = vmatpush.bf16.msrb.mxu1 %v2846_v5  ;;  %v3532_v27 = vsel %vm788_vm3, %v855_v19, %v859_v13  ;;  %v874_v28 = vshrl.u32 %v3529_v24, 16  ;;  %v876_v29 = vshll.u32 %v3529_v24, 16  ;;  %v883_v33 = vrot.slane %v881_v20, 1  ;;  %v2916_v0 = vld [vmem:[%s3895_s5 + $0x230] sm:$0xff]  ;;  %v2891_v5 = vld [vmem:[%s3895_s5 + $0x168] sm:$0xff]  ;;  %v2889_v20 = vld [vmem:[%s3895_s5 + $0x158] sm:$0xff] }
  0x4c   : > { %1355 = vmatpush.bf16.msrb.mxu3 %v2870_v6  ;;  %1498 = vmatpush.bf16.msrb.mxu0 %v2878_v11  ;;  %v672_v36 = vor.u32 %v670_v26, %v669_v31  ;;  %v763_v37 = vsel %vm3306_vm4, %v669_v31, 0  ;;  %v2915_v6 = vld [vmem:[%s3895_s5 + $0x228] sm:$0xff]  ;;  %v2906_v11 = vld [vmem:[%s3895_s5 + $0x1e0] sm:$0xff]  ;;  %v1128_v13 = vrot.slane %v3315_v30, 1  ;;  %v2897_v30 = vld [vmem:[%s3895_s5 + $0x198] sm:$0xff]  ;;  %v1131_v19 = vrot.slane %v3420_v49, 1 }
  0x4d   : > { %991 = vmatmul.bf16.gmra.mxu2 %v3532_v27  ;;  %v878_v32 = vrot.slane %v876_v29, 1  ;;  %v809_v41 = vshll.u32 %v763_v37, 16  ;;  %v1125_v4 = vrot.slane %v763_v37, 1  ;;  %v2896_v49 = vld [vmem:[%s3895_s5 + $0x190] sm:$0xff]  ;;  %v1133_v29 = vrot.slane %v3347_v48, 1  ;;  %v3004_v37 = vld [vmem:[%s3226_s23 + $0x38] sm:$0xff]  }
  0x4e   : > { %v753_v42 = vsel %vm3306_vm4, 0, %v672_v36  ;;  %v3596_v16 = vsel %vm1120_vm5, %v1127_v12, %v1128_v13  ;;  %v1134_v31 = vrot.slane %v3326_v38, 1  ;;  %v2949_v38 = vunpack.c.h.bf16 %v3004_v37  ;;  %v2910_v13 = vld [vmem:[%s3895_s5 + $0x200] sm:$0xff]  ;;  %s2845_s23 = sadd.s32 8, %s3196_s10 }
  0x4f   : > { %1757 = vmatpush.bf16.msra.mxu2 %v2901_v9  ;;  %1627 = vmatpush.bf16.msra.mxu1 %v2893_v22  ;;  %v879_v40 = vor.u32 %v878_v32, %v874_v28  ;;  %v802_v45 = vshrl.u32 %v753_v42, 16  ;;  %v804_v47 = vshll.u32 %v753_v42, 16  ;;  %v811_v55 = vrot.slane %v809_v41, 1  ;;  %v2898_v9 = vld [vmem:[%s3895_s5 + $0x1a0] sm:$0xff]  ;;  %v2905_v22 = vld [vmem:[%s3895_s5 + $0x1d8] sm:$0xff]  ;;  %v2904_v28 = vld [vmem:[%s3895_s5 + $0x1d0] sm:$0xff] }
  0x50   : > { %1900 = vmatpush.bf16.msra.mxu3 %v2909_v35  ;;  %2036 = vmatpush.bf16.msra.mxu0 %v2917_v18  ;;  %v1124_v2 = vrot.slane %v753_v42, 1  ;;  %v2914_v35 = vld [vmem:[%s3895_s5 + $0x220] sm:$0xff]  ;;  %v1130_v18 = vrot.slane %v3433_v57, 1  ;;  %v2888_v32 = vld [vmem:[%s3895_s5 + $0x150] sm:$0xff]  ;;  %v3638_v36 = vsel %vm1120_vm5, %v1133_v29, %v1134_v31  ;;  %v2895_v41 = vld [vmem:[%s3895_s5 + $0x188] sm:$0xff]  ;;  %p3756_p10 = scmp.lt.s32.totalorder %s2845_s23, 15 }
  0x51   : > { %v3542_v44 = vsel %vm788_vm3, %v879_v40, %v883_v33  ;;  %v806_v54 = vrot.slane %v804_v47, 1  ;;  %v2912_v33 = vld [vmem:[%s3895_s5 + $0x210] sm:$0xff]  ;;  %v2948_v40 = vunpack.c.l.bf16 %v3004_v37  ;;  %v521_v47 = vmul.f32 %v3231_v3, %v2949_v38 }
  0x52   : > { %1001 = vmatmul.bf16.gmra.mxu3 %v3542_v44  ;;  %1063 = vmatmul.bf16.vlgmr.msrb.gmra.mxu1 %v3429_v56  ;;  %v2907_v56 = vld [vmem:[%s3895_s5 + $0x1e8] sm:$0xff]  ;;  %v3575_v8 = vsel %vm1120_vm5, %v1124_v2, %v1125_v4  ;;  %v3617_v26 = vsel %vm1120_vm5, %v1130_v18, %v1131_v19  ;;  %v1140_v2 = vrot.slane %v3341_v43, 1  ;;  %v2902_v4 = vld [vmem:[%s3895_s5 + $0x1c0] sm:$0xff]  ;;  %s3918_s23 = smov (!%p3756_p10, %s2845_s23), 15 }
  0x53   : > { %1758 = vmatpush.bf16.msra.mxu2 %v2900_v50  ;;  %v807_v58 = vor.u32 %v806_v54, %v802_v45  ;;  %1628 = vmatpush.bf16.msra.mxu1 %v2892_v63  ;;  %v520_v45 = vmul.f32 %v3231_v3, %v2948_v40  ;;  %v1136_v50 = vrot.slane %v3494_v61, 1  ;;  %v2911_v3 = vld [vmem:[%s3895_s5 + $0x208] sm:$0xff]  ;;  %s3920_s23 = smov (!%p3756_p10, %s3918_s23), 15 }
  0x54   : > { %1901 = vmatpush.bf16.msra.mxu3 %v2908_v51  ;;  %2037 = vmatpush.bf16.msra.mxu0 %v2916_v0  ;;  %v1137_v51 = vrot.slane %v3486_v52, 1  ;;  %s2411_s10 = sshll.u32 %s3920_s23, 1 }
  0x55   : > { %v812_v62 = vsel %vm788_vm3, %v807_v58, %v811_v55  ;;  %v539_v54 = vadd.f32 %v3245_v10, %v520_v45  ;;  %v540_v55 = vadd.f32 %v3245_v10, %v521_v47  ;;  %v2887_v58 = vld [vmem:[%s3895_s5 + $0x148] sm:$0xff]  ;;  %s442_s18 = sadd.s32 %s2411_s10, %s3206_s14  ;;  %s2419_s10 = sshll.u32 %s465_s20, 1 }
  0x56   : > { %971 = vmatmul.bf16.gmra.mxu0 %v812_v62  ;;  %v3664_v59 = vsel %vm1120_vm5, %v1136_v50, %v1137_v51  ;;  %s2413_s21 = sshll.u32 %s442_s18, 2  ;;  %s467_s15 = scalar_lea.vmem %s3897_s7, %s2419_s10 }
  0x57   : > { %1759 = vmatpush.bf16.msra.mxu2 %v2899_v46  ;;  %1629 = vmatpush.bf16.msra.mxu1 %v2891_v5  ;;  %v555_v52 = vmax.f32 %v539_v54, 0.0  ;;  %v556_v60 = vmax.f32 %v540_v55, 0.0  ;;  %v2894_v46 = vld [vmem:[%s3895_s5 + $0x180] sm:$0xff]  ;;  %s444_s8 = scalar_lea.vmem %s3892_s2, %s2413_s21 }
  0x58   : > { %1902 = vmatpush.bf16.msra.mxu3 %v2907_v56  ;;  %2038 = vmatpush.bf16.msra.mxu0 %v2915_v6  ;;  %v1139_v56 = vrot.slane %v3356_v53, 1 }
  0x59   : > { %v571_v10 = vpack.c.bf16 %v555_v52, %v555_v52 }
  0x5b   : > { %1760 = vmatpush.bf16.msra.mxu2 %v2898_v9  ;;  %1630 = vmatpush.bf16.msra.mxu1 %v2890_v15  ;;  %v645_v0 = vunpack.c.l.b16 %v571_v10  ;;  %v2886_v9 = vld [vmem:[%s3895_s5 + $0x140] sm:$0xff] }
  0x5c   : > { %1903 = vmatpush.bf16.msra.mxu3 %v2906_v11  ;;  %2039 = vmatpush.bf16.msra.mxu0 %v2914_v35  ;;  %v3686_v11 = vsel %vm1120_vm5, %v1139_v56, %v1140_v2 }
  0x5d   : > { %1226 = vmatmul.bf16.vlgmr.msrb.gmra.mxu2 %v1123_v1 }
  0x5f   : > { %1761 = vmatpush.bf16.msra.mxu2 %v2897_v30  ;;  %1631 = vmatpush.bf16.msra.mxu1 %v2889_v20 }
  0x60   : > { %1904 = vmatpush.bf16.msra.mxu3 %v2905_v22  ;;  %2040 = vmatpush.bf16.msra.mxu0 %v2913_v21  ;;  %v1142_v21 = vrot.slane %v3529_v24, 1 }
  0x62   : > { %1356 = vmatmul.bf16.vlgmr.msrb.gmra.mxu3 %v753_v42  ;;  %1068 = vmatmul.bf16.gmra.mxu1 %v753_v42  ;;  %v2903_v42 = vld [vmem:[%s3895_s5 + $0x1c8] sm:$0xff] }
  0x63   : > { %1762 = vmatpush.bf16.msra.mxu2 %v2896_v49  ;;  %1632 = vmatpush.bf16.msra.mxu1 %v2888_v32  ;;  %v1143_v49 = vrot.slane %v3518_v17, 1 }
  0x64   : > { %1905 = vmatpush.bf16.msra.mxu3 %v2904_v28  ;;  %2041 = vmatpush.bf16.msra.mxu0 %v2912_v33 }
  0x65   : > { %v3712_v31 = vsel %vm1120_vm5, %v1142_v21, %v1143_v49 }
  0x66   : > { %1499 = vmatmul.bf16.vlgmr.msrb.gmra.mxu0 %v812_v62  ;;  %v572_v62 = vpack.c.bf16 %v556_v60, %v556_v60 }
  0x67   : > { %1763 = vmatpush.bf16.msra.mxu2 %v2895_v41  ;;  %1633 = vmatpush.bf16.msra.mxu1 %v2887_v58 }
  0x68   : > { %1906 = vmatpush.bf16.msra.mxu3 %v2903_v42  ;;  %2042 = vmatpush.bf16.msra.mxu0 %v2911_v3  ;;  %v646_v1 = vunpack.c.l.b16 %v572_v62 }
  0x6a   : > { %v657_v5 = vpack.c.b16 %v646_v1, %v645_v0 }
  0x6b   : > { %1764 = vmatpush.bf16.msra.mxu2 %v2894_v46  ;;  %1634 = vmatpush.bf16.msra.mxu1 %v2886_v9 }
  0x6c   : > { %1907 = vmatpush.bf16.msra.mxu3 %v2902_v4  ;;  %v716_v12 = vshrl.u32 %v657_v5, 16  ;;  %v719_v35 = vshll.u32 %v657_v5, 16  ;;  %2043 = vmatpush.bf16.msra.mxu0 %v2910_v13 }
  0x6d   : > { %1231 = vmatmul.bf16.gmra.mxu2 %v3575_v8 }
  0x6e   : > { %v718_v15 = vrot.slane %v716_v12, 7 }
  0x70   : > { %v721_v19 = vor.u32 %v719_v35, %v718_v15  ;;  %v3717_v33 = vsel %vm3306_vm4, %v718_v15, 0 }
  0x71   : > { %v1421_v41 = vshll.u32 %v3717_v33, 16 }
  0x72   : > { %1361 = vmatmul.bf16.gmra.mxu3 %v3336_v34  ;;  %1073 = vmatmul.bf16.gmra.mxu1 %v3336_v34  ;;  %v3706_v28 = vsel %vm3306_vm4, 0, %v721_v19 }
  0x73   : > { %v1416_v32 = vshll.u32 %v3706_v28, 16  ;;  %v1414_v17 = vshrl.u32 %v3706_v28, 16  ;;  %v1423_v51 = vrot.slane %v1421_v41, 1 }
  0x75   : > { %v1418_v38 = vrot.slane %v1416_v32, 1 }
  0x76   : > { %1504 = vmatmul.bf16.gmra.mxu0 %v3381_v14 }
  0x77   : > { %v1419_v50 = vor.u32 %v1418_v38, %v1414_v17 }
  0x79   : > { %v3731_v58 = vsel %vm788_vm3, %v1419_v50, %v1423_v51 }
  0x7d   : > { %1236 = vmatmul.bf16.gmra.mxu2 %v3596_v16 }
  0x82   : > { %1366 = vmatmul.bf16.gmra.mxu3 %v3433_v57  ;;  %1078 = vmatmul.bf16.gmra.mxu1 %v3433_v57 }
  0x86   : > { %1509 = vmatmul.bf16.gmra.mxu0 %v3472_v39 }
  0x8d   : > { %1241 = vmatmul.bf16.gmra.mxu2 %v3617_v26 }
  0x92   : > { %1371 = vmatmul.bf16.gmra.mxu3 %v3347_v48  ;;  %1083 = vmatmul.bf16.gmra.mxu1 %v3347_v48 }
  0x96   : > { %1514 = vmatmul.bf16.gmra.mxu0 %v3392_v7 }
  0x9d   : > { %1246 = vmatmul.bf16.gmra.mxu2 %v3638_v36 }
  0xa2   : > { %1376 = vmatmul.bf16.gmra.mxu3 %v3494_v61  ;;  %1088 = vmatmul.bf16.gmra.mxu1 %v3494_v61 }
  0xa6   : > { %1519 = vmatmul.bf16.gmra.mxu0 %v3532_v27 }
  0xad   : > { %1251 = vmatmul.bf16.gmra.mxu2 %v3664_v59 }
  0xaf   : > { %v3667_v63 = vpop.f32.mrf.mxu1 }
  0xb2   : > { %1381 = vmatmul.bf16.gmra.mxu3 %v3356_v53  ;;  %1093 = vmatmul.bf16.gmra.mxu1 %v3356_v53 }
  0xb6   : > { %1524 = vmatmul.bf16.gmra.mxu0 %v3400_v25 }
  0xb7   : > { %v3679_v6 = vpop.f32.mrf.mxu1 }
  0xb8   : > { %v3688_v43 = vpop.f32.mrf.mxu2  ;;  %v3696_v18 = vpop.f32.mrf.mxu3 }
  0xbd   : > { %1256 = vmatmul.bf16.gmra.mxu2 %v3686_v11 }
  0xbe   : > { %v967_v22 = vpop.f32.mrf.mxu0 }
  0xbf   : > { %v3694_v30 = vpop.f32.mrf.mxu1 }
  0xc0   : > { %v3700_v20 = vpop.f32.mrf.mxu2  ;;  %v3719_v40 = vpop.f32.mrf.mxu3 }
  0xc2   : > { %1386 = vmatmul.bf16.gmra.mxu3 %v3529_v24  ;;  %1098 = vmatmul.bf16.gmra.mxu1 %v3529_v24 }
  0xc6   : > { %1529 = vmatmul.bf16.gmra.mxu0 %v3542_v44  ;;  %v969_v37 = vpop.f32.mrf.mxu0 }
  0xc7   : > { %v3708_v29 = vpop.f32.mrf.mxu1 }
  0xcd   : > { %1261 = vmatmul.bf16.gmra.mxu2 %v3712_v31 }
  0xcf   : > { %v1064_v45 = vpop.f32.mrf.mxu1 }
  0xd0   : > { %v3724_v42 = vpop.f32.mrf.mxu2  ;;  %v1065_v47 = vadd.f32 %v1064_v45, %v967_v22 }
  0xd2   : > { %1391 = vmatmul.bf16.gmra.mxu3 %v3706_v28  ;;  %1635 = vmatmul.bf16.vlgmr.msra.gmra.mxu1 %v3575_v8 }
  0xd3   : > { %v972_v54 = vpop.f32.mrf.mxu0 }
  0xd5   : > { %v3728_v55 = vpop.f32.mrf.mxu3 }
  0xd6   : > { %1534 = vmatmul.bf16.gmra.mxu0 %v3731_v58 }
  0xd7   : > { %v1066_v52 = vpop.f32.mrf.mxu1 }
  0xd8   : > { %v3733_v3 = vpop.f32.mrf.mxu2  ;;  %v1067_v60 = vadd.f32 %v1066_v52, %v969_v37 }
  0xdb   : > { %v974_v10 = vpop.f32.mrf.mxu0 }
  0xdd   : > { %1765 = vmatmul.bf16.vlgmr.msra.gmra.mxu2 %v3336_v34  ;;  %v3737_v62 = vpop.f32.mrf.mxu3 }
  0xdf   : > { %v1069_v1 = vpop.f32.mrf.mxu1 }
  0xe0   : > { %v1227_v0 = vpop.f32.mrf.mxu2  ;;  %v1070_v46 = vadd.f32 %v1069_v1, %v972_v54 }
  0xe1   : > { %v1267_v8 = vadd.f32 %v1227_v0, %v1065_v47 }
  0xe2   : > { %1908 = vmatmul.bf16.vlgmr.msra.gmra.mxu3 %v3381_v14  ;;  %1640 = vmatmul.bf16.gmra.mxu1 %v3596_v16 }
  0xe3   : > { %v1500_v56 = vpop.f32.mrf.mxu0 }
  0xe5   : > { %v1357_v2 = vpop.f32.mrf.mxu3 }
  0xe6   : > { %v1397_v4 = vadd.f32 %v1357_v2, %v1267_v8  ;;  %2044 = vmatmul.bf16.vlgmr.msra.gmra.mxu0 %v3596_v16 }
  0xe7   : > { %v1071_v9 = vpop.f32.mrf.mxu1 }
  0xe8   : > { %v1229_v5 = vpop.f32.mrf.mxu2  ;;  %v1072_v34 = vadd.f32 %v1071_v9, %v974_v10  ;;  %v3742_v13 = vadd.f32 %v1500_v56, %v1397_v4 }
  0xe9   : > { %v1268_v12 = vadd.f32 %v1229_v5, %v1067_v60 }
  0xeb   : > { %v1502_v15 = vpop.f32.mrf.mxu0 }
  0xed   : > { %1770 = vmatmul.bf16.gmra.mxu2 %v3433_v57  ;;  %v1359_v35 = vpop.f32.mrf.mxu3 }
  0xee   : > { %v1398_v22 = vadd.f32 %v1359_v35, %v1268_v12 }
  0xef   : > { %v1074_v14 = vpop.f32.mrf.mxu1 }
  0xf0   : > { %v1232_v19 = vpop.f32.mrf.mxu2  ;;  %v1075_v49 = vadd.f32 %v1074_v14, %v3667_v63  ;;  %v3746_v32 = vadd.f32 %v1502_v15, %v1398_v22 }
  0xf1   : > { %v1269_v21 = vadd.f32 %v1232_v19, %v1070_v46 }
  0xf2   : > { %1913 = vmatmul.bf16.gmra.mxu3 %v3472_v39  ;;  %1645 = vmatmul.bf16.gmra.mxu1 %v3617_v26 }
  0xf3   : > { %v1505_v16 = vpop.f32.mrf.mxu0 }
  0xf5   : > { %v1362_v37 = vpop.f32.mrf.mxu3 }
  0xf6   : > { %v1399_v17 = vadd.f32 %v1362_v37, %v1269_v21  ;;  %2049 = vmatmul.bf16.gmra.mxu0 %v3617_v26 }
  0xf7   : > { %v1076_v57 = vpop.f32.mrf.mxu1 }
  0xf8   : > { %v1234_v38 = vpop.f32.mrf.mxu2  ;;  %v1077_v45 = vadd.f32 %v1076_v57, %v3679_v6  ;;  %v3752_v47 = vadd.f32 %v1505_v16, %v1399_v17 }
  0xf9   : > { %v1270_v41 = vadd.f32 %v1234_v38, %v1072_v34  ;;  %v2955_v34 = vld [vmem:[%s444_s8] sm:$0xff]  }
  0xfa   : > { %v2956_v22 = vunpack.c.l.bf16 %v2955_v34  ;;  %v2957_v19 = vunpack.c.h.bf16 %v2955_v34  ;;  %v3079_v38 = vld [vmem:[%s3894_s4] ss:$0 sm:$0xff] }
  0xfb   : > { %v1507_v63 = vpop.f32.mrf.mxu0 }
  0xfd   : > { %1775 = vmatmul.bf16.gmra.mxu2 %v3347_v48  ;;  %v1364_v50 = vpop.f32.mrf.mxu3 }
  0xfe   : > { %v1400_v39 = vadd.f32 %v1364_v50, %v1270_v41 }
  0xff   : > { %v1079_v54 = vpop.f32.mrf.mxu1 }
 0x100   : > { %v1237_v51 = vpop.f32.mrf.mxu2  ;;  %v1080_v52 = vadd.f32 %v1079_v54, %v3694_v30  ;;  %v3761_v6 = vadd.f32 %v1507_v63, %v1400_v39  ;;  %v603_v39 = vstv %s602_s11 }
 0x101   : > { %v1271_v26 = vadd.f32 %v1237_v51, %v1075_v49  ;;  %vm604_vm6 = vcmp.eq.s32.totalorder %v603_v39, 1 }
 0x102   : > { %1918 = vmatmul.bf16.gmra.mxu3 %v3392_v7  ;;  %1650 = vmatmul.bf16.gmra.mxu1 %v3638_v36 }
 0x103   : > { %v1510_v48 = vpop.f32.mrf.mxu0 }
 0x105   : > { %v1367_v60 = vpop.f32.mrf.mxu3 }
 0x106   : > { %v1401_v10 = vadd.f32 %v1367_v60, %v1271_v26  ;;  %2054 = vmatmul.bf16.gmra.mxu0 %v3638_v36 }
 0x107   : > { %v1081_v1 = vpop.f32.mrf.mxu1 }
 0x108   : > { %v1239_v0 = vpop.f32.mrf.mxu2  ;;  %v1082_v30 = vadd.f32 %v1081_v1, %v3708_v29  ;;  %v3771_v46 = vadd.f32 %v1510_v48, %v1401_v10 }
 0x109   : > { %v1272_v8 = vadd.f32 %v1239_v0, %v1077_v45 }
 0x10b   : > { %v1512_v7 = vpop.f32.mrf.mxu0 }
 0x10d   : > { %1780 = vmatmul.bf16.gmra.mxu2 %v3494_v61  ;;  %v1369_v56 = vpop.f32.mrf.mxu3 }
 0x10e   : > { %v1402_v2 = vadd.f32 %v1369_v56, %v1272_v8 }
 0x10f   : > { %v1084_v5 = vpop.f32.mrf.mxu1 }
 0x110   : > { %v1242_v4 = vpop.f32.mrf.mxu2  ;;  %v3775_v12 = vadd.f32 %v1512_v7, %v1402_v2  ;;  %v1085_v45 = vadd.f32 %v1084_v5, %v3688_v43 }
 0x111   : > { %v1273_v9 = vadd.f32 %v1242_v4, %v1080_v52 }
 0x112   : > { %1923 = vmatmul.bf16.gmra.mxu3 %v3532_v27  ;;  %1655 = vmatmul.bf16.gmra.mxu1 %v3664_v59  ;;  %v3078_v27 = vld [vmem:[%s3893_s3] ss:$0 sm:$0xff] }
 0x113   : > { %v1515_v61 = vpop.f32.mrf.mxu0  ;;  %v596_v49 = vmul.f32 %v3078_v27, %v2956_v22  ;;  %v597_v16 = vmul.f32 %v3078_v27, %v2957_v19 }
 0x115   : > { %v1372_v36 = vpop.f32.mrf.mxu3  ;;  %v598_v57 = vadd.f32 %v3079_v38, %v596_v49 }
 0x116   : > { %v1403_v29 = vadd.f32 %v1372_v36, %v1273_v9  ;;  %2059 = vmatmul.bf16.gmra.mxu0 %v3664_v59  ;;  %v599_v59 = vadd.f32 %v3079_v38, %v597_v16 }
 0x117   : > { %v1086_v35 = vpop.f32.mrf.mxu1  ;;  %v600_v54 = vmax.f32 %v598_v57, 0.0 }
 0x118   : > { %v1244_v15 = vpop.f32.mrf.mxu2  ;;  %v3784_v21 = vadd.f32 %v1515_v61, %v1403_v29  ;;  %v601_v26 = vmax.f32 %v599_v59, 0.0  ;;  %v1087_v43 = vadd.f32 %v1086_v35, %v3700_v20  ;;  %v1558_v59 = vrot.slane %v3706_v28, 1 }
 0x119   : > { %v1274_v14 = vadd.f32 %v1244_v15, %v1082_v30  ;;  %v605_v60 = vsel %vm604_vm6, 0.0, %v600_v54 }
 0x11a   : > { %v606_v10 = vsel %vm604_vm6, 0.0, %v601_v26  ;;  %v607_v7 = vpack.c.bf16 %v605_v60, %v605_v60 }
 0x11b   : > { %v1517_v37 = vpop.f32.mrf.mxu0  ;;  %v608_v56 = vpack.c.bf16 %v606_v10, %v606_v10 }
 0x11d   : > { %1785 = vmatmul.bf16.gmra.mxu2 %v3356_v53  ;;  %v1374_v17 = vpop.f32.mrf.mxu3  ;;  %v648_v4 = vunpack.c.l.b16 %v608_v56 }
 0x11e   : > { %v1404_v41 = vadd.f32 %v1374_v17, %v1274_v14 }
 0x11f   : > { %v1089_v50 = vpop.f32.mrf.mxu1 }
 0x120   : > { %v1247_v63 = vpop.f32.mrf.mxu2  ;;  %v3794_v52 = vadd.f32 %v1517_v37, %v1404_v41  ;;  %v1090_v36 = vadd.f32 %v1089_v50, %v3724_v42  ;;  %v1559_v41 = vrot.slane %v3717_v33, 1 }
 0x121   : > { %v1275_v51 = vadd.f32 %v1247_v63, %v1085_v45 }
 0x122   : > { %1928 = vmatmul.bf16.gmra.mxu3 %v3400_v25  ;;  %1660 = vmatmul.bf16.gmra.mxu1 %v3686_v11  ;;  %v647_v25 = vunpack.c.l.b16 %v607_v7  ;;  %v1560_v54 = vsel %vm1120_vm5, %v1558_v59, %v1559_v41 }
 0x123   : > { %v1520_v53 = vpop.f32.mrf.mxu0 }
 0x124   : > { %v658_v15 = vpack.c.b16 %v648_v4, %v647_v25 }
 0x125   : > { %v1377_v48 = vpop.f32.mrf.mxu3 }
 0x126   : > { %v1405_v0 = vadd.f32 %v1377_v48, %v1275_v51  ;;  %2064 = vmatmul.bf16.gmra.mxu0 %v3686_v11  ;;  %v723_v11 = vshrl.u32 %v658_v15, 16  ;;  %v726_v37 = vshll.u32 %v658_v15, 16 }
 0x127   : > { %v1091_v8 = vpop.f32.mrf.mxu1 }
 0x128   : > { %v1249_v1 = vpop.f32.mrf.mxu2  ;;  %v3800_v2 = vadd.f32 %v1520_v53, %v1405_v0  ;;  %v1092_v14 = vadd.f32 %v1091_v8, %v3733_v3  ;;  %v725_v16 = vrot.slane %v723_v11, 7 }
 0x129   : > { %v1276_v30 = vadd.f32 %v1249_v1, %v1087_v43 }
 0x12b   : > { %v1522_v5 = vpop.f32.mrf.mxu0 }
 0x12d   : > { %1790 = vmatmul.bf16.gmra.mxu2 %v3529_v24  ;;  %v1379_v9 = vpop.f32.mrf.mxu3 }
 0x12e   : > { %v1406_v61 = vadd.f32 %v1379_v9, %v1276_v30 }
 0x12f   : > { %v1094_v20 = vpop.f32.mrf.mxu1 }
 0x130   : > { %v1252_v29 = vpop.f32.mrf.mxu2  ;;  %v3804_v35 = vadd.f32 %v1522_v5, %v1406_v61  ;;  %v1095_v3 = vadd.f32 %v1094_v20, %v3696_v18 }
 0x131   : > { %v1277_v34 = vadd.f32 %v1252_v29, %v1090_v36 }
 0x132   : > { %1933 = vmatmul.bf16.gmra.mxu3 %v3542_v44  ;;  %1665 = vmatmul.bf16.gmra.mxu1 %v3712_v31  ;;  %v728_v44 = vor.u32 %v726_v37, %v725_v16 }
 0x133   : > { %v1525_v22 = vpop.f32.mrf.mxu0 }
 0x134   : > { %v761_v39 = vsel %vm3306_vm4, 0, %v728_v44 }
 0x135   : > { %v1382_v24 = vpop.f32.mrf.mxu3  ;;  %v1825_v26 = vshll.u32 %v761_v39, 16  ;;  %v1823_v10 = vshrl.u32 %v761_v39, 16  ;;  %v1967_v29 = vrot.slane %v761_v39, 1 }
 0x136   : > { %v1407_v19 = vadd.f32 %v1382_v24, %v1277_v34  ;;  %2069 = vmatmul.bf16.gmra.mxu0 %v3712_v31 }
 0x137   : > { %v1096_v49 = vpop.f32.mrf.mxu1  ;;  %v1827_v0 = vrot.slane %v1825_v26, 1 }
 0x138   : > { %v1254_v27 = vpop.f32.mrf.mxu2  ;;  %v3810_v17 = vadd.f32 %v1525_v22, %v1407_v19  ;;  %v1097_v48 = vadd.f32 %v1096_v49, %v3719_v40 }
 0x139   : > { %v1278_v42 = vadd.f32 %v1254_v27, %v1092_v14 }
 0x13b   : > { %v1527_v38 = vpop.f32.mrf.mxu0 }
 0x13d   : > { %1795 = vmatmul.bf16.gmra.mxu2 %v3706_v28  ;;  %v1384_v57 = vpop.f32.mrf.mxu3  ;;  %v771_v28 = vsel %vm3306_vm4, %v725_v16, 0 }
 0x13e   : > { %v1408_v45 = vadd.f32 %v1384_v57, %v1278_v42  ;;  %v1830_v43 = vshll.u32 %v771_v28, 16  ;;  %v1968_v20 = vrot.slane %v771_v28, 1 }
 0x13f   : > { %v1099_v50 = vpop.f32.mrf.mxu1 }
 0x140   : > { %v1257_v63 = vpop.f32.mrf.mxu2  ;;  %v3818_v51 = vadd.f32 %v1527_v38, %v1408_v45  ;;  %v1832_v7 = vrot.slane %v1830_v43, 1  ;;  %v1100_v4 = vadd.f32 %v1099_v50, %v3728_v55  ;;  %v1969_v11 = vsel %vm1120_vm5, %v1967_v29, %v1968_v20 }
 0x141   : > { %v1279_v31 = vadd.f32 %v1257_v63, %v1095_v3 }
 0x142   : > { %1938 = vmatmul.bf16.gmra.mxu3 %v3731_v58  ;;  %1670 = vmatmul.bf16.gmra.mxu1 %v1560_v54  ;;  %v1828_v58 = vor.u32 %v1827_v0, %v1823_v10 }
 0x143   : > { %v1530_v33 = vpop.f32.mrf.mxu0 }
 0x144   : > { %v1833_v5 = vsel %vm788_vm3, %v1828_v58, %v1832_v7 }
 0x145   : > { %v1387_v53 = vpop.f32.mrf.mxu3 }
 0x146   : > { %v1409_v18 = vadd.f32 %v1387_v53, %v1279_v31  ;;  %2074 = vmatmul.bf16.gmra.mxu0 %v1560_v54 }
 0x147   : > { %v1101_v1 = vpop.f32.mrf.mxu1 }
 0x148   : > { %v1259_v60 = vpop.f32.mrf.mxu2  ;;  %v3825_v30 = vadd.f32 %v1530_v33, %v1409_v18  ;;  %v1102_v24 = vadd.f32 %v1101_v1, %v3737_v62 }
 0x149   : > { %v1280_v8 = vadd.f32 %v1259_v60, %v1097_v48 }
 0x14b   : > { %v1532_v56 = vpop.f32.mrf.mxu0 }
 0x14d   : > { %1800 = vmatmul.bf16.gmra.mxu2 %v761_v39  ;;  %v1389_v23 = vpop.f32.mrf.mxu3 }
 0x14e   : > { %v1410_v25 = vadd.f32 %v1389_v23, %v1280_v8 }
 0x14f   : > { %v1636_v9 = vpop.f32.mrf.mxu1 }
 0x150   : > { %v1262_v40 = vpop.f32.mrf.mxu2  ;;  %v3829_v36 = vadd.f32 %v1532_v56, %v1410_v25  ;;  %v1676_v57 = vadd.f32 %v1636_v9, %v3742_v13 }
 0x151   : > { %v1281_v61 = vadd.f32 %v1262_v40, %v1100_v4 }
 0x152   : > { %1943 = vmatmul.bf16.gmra.mxu3 %v1833_v5 }
 0x153   : > { %v1535_v34 = vpop.f32.mrf.mxu0 }
 0x155   : > { %v1392_v15 = vpop.f32.mrf.mxu3 }
 0x156   : > { %v1411_v22 = vadd.f32 %v1392_v15, %v1281_v61  ;;  %2079 = vmatmul.bf16.gmra.mxu0 %v1969_v11 }
 0x157   : > { %v1638_v14 = vpop.f32.mrf.mxu1 }
 0x158   : > { %v1264_v19 = vpop.f32.mrf.mxu2  ;;  %v3833_v27 = vadd.f32 %v1535_v34, %v1411_v22  ;;  %v1677_v63 = vadd.f32 %v1638_v14, %v3746_v32 }
 0x159   : > { %v1282_v55 = vadd.f32 %v1264_v19, %v1102_v24 }
 0x15b   : > { %v1537_v49 = vpop.f32.mrf.mxu0 }
 0x15d   : > { %v1394_v42 = vpop.f32.mrf.mxu3 }
 0x15e   : > { %v1412_v16 = vadd.f32 %v1394_v42, %v1282_v55 }
 0x15f   : > { %v1641_v44 = vpop.f32.mrf.mxu1 }
 0x160   : > { %v1766_v37 = vpop.f32.mrf.mxu2  ;;  %v3835_v38 = vadd.f32 %v1537_v49, %v1412_v16  ;;  %v1678_v48 = vadd.f32 %v1641_v44, %v3752_v47 }
 0x161   : > { %v1806_v41 = vadd.f32 %v1766_v37, %v1676_v57 }
 0x163   : > { %v2045_v59 = vpop.f32.mrf.mxu0 }
 0x165   : > { %v1909_v45 = vpop.f32.mrf.mxu3 }
 0x166   : > { %v1949_v50 = vadd.f32 %v1909_v45, %v1806_v41 }
 0x167   : > { %v1643_v3 = vpop.f32.mrf.mxu1 }
 0x168   : > { %v1768_v62 = vpop.f32.mrf.mxu2  ;;  %v2085_v39 = vadd.f32 %v2045_v59, %v1949_v50  ;;  %v1679_v23 = vadd.f32 %v1643_v3, %v3761_v6 }
 0x169   : > { %v1807_v31 = vadd.f32 %v1768_v62, %v1677_v63 }
 0x16a   : > { %v2154_v13 = vmul.f32 %v2085_v39, %v2085_v39 }
 0x16b   : > { %v2047_v54 = vpop.f32.mrf.mxu0 }
 0x16d   : > { %v1911_v26 = vpop.f32.mrf.mxu3 }
 0x16e   : > { %v1950_v28 = vadd.f32 %v1911_v26, %v1807_v31 }
 0x16f   : > { %v1646_v53 = vpop.f32.mrf.mxu1 }
 0x170   : > { %v1771_v33 = vpop.f32.mrf.mxu2  ;;  %v2086_v18 = vadd.f32 %v2047_v54, %v1950_v28  ;;  %v1680_v11 = vadd.f32 %v1646_v53, %v3771_v46 }
 0x171   : > { %v1808_v0 = vadd.f32 %v1771_v33, %v1678_v48 }
 0x172   : > { %v2961_v32 = vpack.c.bf16 %v2086_v18, %v2085_v39  ;;  %v2133_v60 = vadd.f32 %v2086_v18, %v2085_v39  ;;  %v2155_v10 = vmul.f32 %v2086_v18, %v2086_v18 }
 0x173   : > { %v2050_v1 = vpop.f32.mrf.mxu0 }
 0x174   : > { %2962 = vst [vmem:[%s3845_s17] sm:$0xff] %v2961_v32   ;;  %v2170_v43 = vadd.f32 %v2155_v10, %v2154_v13 }
 0x175   : > { %v1914_v8 = vpop.f32.mrf.mxu3 }
 0x176   : > { %v1951_v58 = vadd.f32 %v1914_v8, %v1808_v0 }
 0x177   : > { %v1648_v56 = vpop.f32.mrf.mxu1 }
 0x178   : > { %v1773_v7 = vpop.f32.mrf.mxu2  ;;  %v2087_v47 = vadd.f32 %v2050_v1, %v1951_v58  ;;  %v1681_v57 = vadd.f32 %v1648_v56, %v3775_v12 }
 0x179   : > { %v1809_v5 = vadd.f32 %v1773_v7, %v1679_v23 }
 0x17a   : > { %v2134_v25 = vadd.f32 %v2133_v60, %v2087_v47  ;;  %v2156_v4 = vmul.f32 %v2087_v47, %v2087_v47 }
 0x17b   : > { %v2052_v9 = vpop.f32.mrf.mxu0 }
 0x17c   : > { %v2171_v40 = vadd.f32 %v2170_v43, %v2156_v4 }
 0x17d   : > { %v1916_v61 = vpop.f32.mrf.mxu3 }
 0x17e   : > { %v1952_v29 = vadd.f32 %v1916_v61, %v1809_v5 }
 0x17f   : > { %v1651_v34 = vpop.f32.mrf.mxu1 }
 0x180   : > { %v1776_v20 = vpop.f32.mrf.mxu2  ;;  %v2088_v15 = vadd.f32 %v2052_v9, %v1952_v29  ;;  %v1682_v54 = vadd.f32 %v1651_v34, %v3784_v21 }
 0x181   : > { %v1810_v14 = vadd.f32 %v1776_v20, %v1680_v11 }
 0x182   : > { %v2966_v22 = vpack.c.bf16 %v2088_v15, %v2087_v47  ;;  %v2135_v24 = vadd.f32 %v2134_v25, %v2088_v15  ;;  %v2157_v19 = vmul.f32 %v2088_v15, %v2088_v15 }
 0x183   : > { %v2055_v6 = vpop.f32.mrf.mxu0 }
 0x184   : > { %3005 = vst [vmem:[%s3845_s17 + $0x8] sm:$0xff] %v2966_v22   ;;  %v2172_v55 = vadd.f32 %v2171_v40, %v2157_v19 }
 0x185   : > { %v1919_v49 = vpop.f32.mrf.mxu3 }
 0x186   : > { %v1953_v42 = vadd.f32 %v1919_v49, %v1810_v14 }
 0x187   : > { %v1653_v37 = vpop.f32.mrf.mxu1 }
 0x188   : > { %v1778_v16 = vpop.f32.mrf.mxu2  ;;  %v2089_v44 = vadd.f32 %v2055_v6, %v1953_v42  ;;  %v1683_v10 = vadd.f32 %v1653_v37, %v3794_v52 }
 0x189   : > { %v1811_v45 = vadd.f32 %v1778_v16, %v1681_v57 }
 0x18a   : > { %v2136_v59 = vadd.f32 %v2135_v24, %v2089_v44  ;;  %v2158_v41 = vmul.f32 %v2089_v44, %v2089_v44 }
 0x18b   : > { %v2057_v46 = vpop.f32.mrf.mxu0 }
 0x18c   : > { %v2173_v62 = vadd.f32 %v2172_v55, %v2158_v41 }
 0x18d   : > { %v1921_v3 = vpop.f32.mrf.mxu3 }
 0x18e   : > { %v1954_v63 = vadd.f32 %v1921_v3, %v1811_v45 }
 0x18f   : > { %v1656_v31 = vpop.f32.mrf.mxu1 }
 0x190   : > { %v1781_v50 = vpop.f32.mrf.mxu2  ;;  %v2090_v39 = vadd.f32 %v2057_v46, %v1954_v63  ;;  %v1684_v25 = vadd.f32 %v1656_v31, %v3800_v2 }
 0x191   : > { %v1812_v53 = vadd.f32 %v1781_v50, %v1682_v54 }
 0x192   : > { %v2971_v26 = vpack.c.bf16 %v2090_v39, %v2089_v44  ;;  %v2137_v28 = vadd.f32 %v2136_v59, %v2090_v39  ;;  %v2159_v33 = vmul.f32 %v2090_v39, %v2090_v39 }
 0x193   : > { %v2060_v12 = vpop.f32.mrf.mxu0 }
 0x194   : > { %3006 = vst [vmem:[%s3845_s17 + $0x10] sm:$0xff] %v2971_v26   ;;  %v2174_v18 = vadd.f32 %v2173_v62, %v2159_v33 }
 0x195   : > { %v1924_v48 = vpop.f32.mrf.mxu3 }
 0x196   : > { %v1955_v13 = vadd.f32 %v1924_v48, %v1812_v53 }
 0x197   : > { %v1658_v0 = vpop.f32.mrf.mxu1 }
 0x198   : > { %v1783_v32 = vpop.f32.mrf.mxu2  ;;  %v2091_v60 = vadd.f32 %v2060_v12, %v1955_v13  ;;  %v1685_v22 = vadd.f32 %v1658_v0, %v3804_v35 }
 0x199   : > { %v1813_v8 = vadd.f32 %v1783_v32, %v1683_v10 }
 0x19a   : > { %v2138_v43 = vadd.f32 %v2137_v28, %v2091_v60  ;;  %v2160_v1 = vmul.f32 %v2091_v60, %v2091_v60 }
 0x19b   : > { %v2062_v21 = vpop.f32.mrf.mxu0 }
 0x19c   : > { %v2175_v58 = vadd.f32 %v2174_v18, %v2160_v1 }
 0x19d   : > { %v1926_v7 = vpop.f32.mrf.mxu3 }
 0x19e   : > { %v1956_v56 = vadd.f32 %v1926_v7, %v1813_v8 }
 0x19f   : > { %v1661_v61 = vpop.f32.mrf.mxu1 }
 0x1a0   : > { %v1786_v47 = vpop.f32.mrf.mxu2  ;;  %v2092_v23 = vadd.f32 %v2062_v21, %v1956_v56  ;;  %v1686_v44 = vadd.f32 %v1661_v61, %v3810_v17 }
 0x1a1   : > { %v1814_v9 = vadd.f32 %v1786_v47, %v1684_v25 }
 0x1a2   : > { %v2976_v4 = vpack.c.bf16 %v2092_v23, %v2091_v60  ;;  %v2139_v5 = vadd.f32 %v2138_v43, %v2092_v23  ;;  %v2161_v40 = vmul.f32 %v2092_v23, %v2092_v23 }
 0x1a3   : > { %v2065_v29 = vpop.f32.mrf.mxu0 }
 0x1a4   : > { %3007 = vst [vmem:[%s3845_s17 + $0x18] sm:$0xff] %v2976_v4   ;;  %v2176_v52 = vadd.f32 %v2175_v58, %v2161_v40 }
 0x1a5   : > { %v1929_v20 = vpop.f32.mrf.mxu3 }
 0x1a6   : > { %v1957_v34 = vadd.f32 %v1929_v20, %v1814_v9 }
 0x1a7   : > { %v1663_v2 = vpop.f32.mrf.mxu1 }
 0x1a8   : > { %v1788_v15 = vpop.f32.mrf.mxu2  ;;  %v2093_v11 = vadd.f32 %v2065_v29, %v1957_v34  ;;  %v1687_v39 = vadd.f32 %v1663_v2, %v3818_v51 }
 0x1a9   : > { %v1815_v14 = vadd.f32 %v1788_v15, %v1685_v22 }
 0x1aa   : > { %v2140_v24 = vadd.f32 %v2139_v5, %v2093_v11  ;;  %v2162_v19 = vmul.f32 %v2093_v11, %v2093_v11 }
 0x1ab   : > { %v2067_v6 = vpop.f32.mrf.mxu0 }
 0x1ac   : > { %v2177_v55 = vadd.f32 %v2176_v52, %v2162_v19 }
 0x1ad   : > { %v1931_v49 = vpop.f32.mrf.mxu3 }
 0x1ae   : > { %v1958_v42 = vadd.f32 %v1931_v49, %v1815_v14 }
 0x1af   : > { %v1666_v63 = vpop.f32.mrf.mxu1 }
 0x1b0   : > { %v1791_v16 = vpop.f32.mrf.mxu2  ;;  %v2094_v37 = vadd.f32 %v2067_v6, %v1958_v42  ;;  %v1688_v13 = vadd.f32 %v1666_v63, %v3825_v30 }
 0x1b1   : > { %v1816_v45 = vadd.f32 %v1791_v16, %v1686_v44 }
 0x1b2   : > { %v2981_v57 = vpack.c.bf16 %v2094_v37, %v2093_v11  ;;  %v2141_v59 = vadd.f32 %v2140_v24, %v2094_v37  ;;  %v2163_v41 = vmul.f32 %v2094_v37, %v2094_v37 }
 0x1b3   : > { %v2070_v35 = vpop.f32.mrf.mxu0 }
 0x1b4   : > { %3008 = vst [vmem:[%s3845_s17 + $0x20] sm:$0xff] %v2981_v57   ;;  %v2178_v62 = vadd.f32 %v2177_v55, %v2163_v41 }
 0x1b5   : > { %v1934_v46 = vpop.f32.mrf.mxu3 }
 0x1b6   : > { %v1959_v3 = vadd.f32 %v1934_v46, %v1816_v45 }
 0x1b7   : > { %v1668_v32 = vpop.f32.mrf.mxu1 }
 0x1b8   : > { %v1793_v50 = vpop.f32.mrf.mxu2  ;;  %v2095_v31 = vadd.f32 %v2070_v35, %v1959_v3  ;;  %v1689_v56 = vadd.f32 %v1668_v32, %v3829_v36 }
 0x1b9   : > { %v1817_v28 = vadd.f32 %v1793_v50, %v1687_v39 }
 0x1ba   : > { %v2142_v54 = vadd.f32 %v2141_v59, %v2095_v31  ;;  %v2164_v26 = vmul.f32 %v2095_v31, %v2095_v31 }
 0x1bb   : > { %v2072_v17 = vpop.f32.mrf.mxu0 }
 0x1bc   : > { %v2179_v33 = vadd.f32 %v2178_v62, %v2164_v26 }
 0x1bd   : > { %v1936_v53 = vpop.f32.mrf.mxu3 }
 0x1be   : > { %v1960_v18 = vadd.f32 %v1936_v53, %v1817_v28 }
 0x1bf   : > { %v1671_v4 = vpop.f32.mrf.mxu1 }
 0x1c0   : > { %v1796_v12 = vpop.f32.mrf.mxu2  ;;  %v2096_v48 = vadd.f32 %v2072_v17, %v1960_v18  ;;  %v1690_v29 = vadd.f32 %v1671_v4, %v3833_v27 }
 0x1c1   : > { %v1818_v43 = vadd.f32 %v1796_v12, %v1688_v13 }
 0x1c2   : > { %v2986_v60 = vpack.c.bf16 %v2096_v48, %v2095_v31  ;;  %v2143_v10 = vadd.f32 %v2142_v54, %v2096_v48  ;;  %v2165_v0 = vmul.f32 %v2096_v48, %v2096_v48 }
 0x1c3   : > { %v2075_v51 = vpop.f32.mrf.mxu0 }
 0x1c4   : > { %3009 = vst [vmem:[%s3845_s17 + $0x28] sm:$0xff] %v2986_v60   ;;  %v2180_v1 = vadd.f32 %v2179_v33, %v2165_v0 }
 0x1c5   : > { %v1939_v8 = vpop.f32.mrf.mxu3 }
 0x1c6   : > { %v1961_v58 = vadd.f32 %v1939_v8, %v1818_v43 }
 0x1c7   : > { %v1673_v36 = vpop.f32.mrf.mxu1 }
 0x1c8   : > { %v1798_v21 = vpop.f32.mrf.mxu2  ;;  %v2097_v7 = vadd.f32 %v2075_v51, %v1961_v58  ;;  %v1691_v6 = vadd.f32 %v1673_v36, %v3835_v38 }
 0x1c9   : > { %v1819_v25 = vadd.f32 %v1798_v21, %v1689_v56 }
 0x1ca   : > { %v2144_v47 = vadd.f32 %v2143_v10, %v2097_v7  ;;  %v2166_v23 = vmul.f32 %v2097_v7, %v2097_v7 }
 0x1cb   : > { %v2077_v5 = vpop.f32.mrf.mxu0 }
 0x1cc   : > { %v2181_v30 = vadd.f32 %v2180_v1, %v2166_v23 }
 0x1cd   : > { %v1941_v40 = vpop.f32.mrf.mxu3 }
 0x1ce   : > { %v1962_v9 = vadd.f32 %v1941_v40, %v1819_v25 }
 0x1d0   : > { %v1801_v61 = vpop.f32.mrf.mxu2  ;;  %v2098_v52 = vadd.f32 %v2077_v5, %v1962_v9 }
 0x1d1   : > { %v1820_v11 = vadd.f32 %v1801_v61, %v1690_v29 }
 0x1d2   : > { %v2991_v20 = vpack.c.bf16 %v2098_v52, %v2097_v7  ;;  %v2145_v34 = vadd.f32 %v2144_v47, %v2098_v52  ;;  %v2167_v15 = vmul.f32 %v2098_v52, %v2098_v52 }
 0x1d3   : > { %v2080_v24 = vpop.f32.mrf.mxu0 }
 0x1d4   : > { %3010 = vst [vmem:[%s3845_s17 + $0x30] sm:$0xff] %v2991_v20   ;;  %v2182_v22 = vadd.f32 %v2181_v30, %v2167_v15 }
 0x1d5   : > { %v1944_v19 = vpop.f32.mrf.mxu3 }
 0x1d6   : > { %v1963_v14 = vadd.f32 %v1944_v19, %v1820_v11 }
 0x1d8   : > { %v1803_v55 = vpop.f32.mrf.mxu2  ;;  %v2099_v2 = vadd.f32 %v2080_v24, %v1963_v14 }
 0x1d9   : > { %v1821_v27 = vadd.f32 %v1803_v55, %v1691_v6 }
 0x1da   : > { %v2146_v49 = vadd.f32 %v2145_v34, %v2099_v2  ;;  %v2168_v42 = vmul.f32 %v2099_v2, %v2099_v2 }
 0x1db   : > { %v2082_v57 = vpop.f32.mrf.mxu0 }
 0x1dc   : > { %v2183_v16 = vadd.f32 %v2182_v22, %v2168_v42 }
 0x1dd   : > { %v1946_v37 = vpop.f32.mrf.mxu3 }
 0x1de   : > { %v1964_v44 = vadd.f32 %v1946_v37, %v1821_v27 }
 0x1e0   : > { %v2100_v59 = vadd.f32 %v2082_v57, %v1964_v44 }
 0x1e2   : > { %v2996_v41 = vpack.c.bf16 %v2100_v59, %v2099_v2  ;;  %v2147_v45 = vadd.f32 %v2146_v49, %v2100_v59  ;;  %v2169_v62 = vmul.f32 %v2100_v59, %v2100_v59 }
 0x1e4   : > { %3011 = vst [vmem:[%s3845_s17 + $0x38] sm:$0xff] %v2996_v41   ;;  %v2148_v35 = vrot.slane %v2147_v45, 4  ;;  %v2184_v46 = vadd.f32 %v2183_v16, %v2169_v62 }
 0x1e6   : > { %v2149_v3 = vadd.f32 %v2148_v35, %v2147_v45  ;;  %v2185_v38 = vrot.slane %v2184_v46, 4 }
 0x1e8   : > { %v2150_v63 = vrot.slane %v2149_v3, 2  ;;  %v2186_v50 = vadd.f32 %v2185_v38, %v2184_v46 }
 0x1ea   : > { %v2151_v31 = vadd.f32 %v2150_v63, %v2149_v3  ;;  %v2187_v39 = vrot.slane %v2186_v50, 2 }
 0x1ec   : > { %v2152_v54 = vrot.slane %v2151_v31, 1  ;;  %v2188_v26 = vadd.f32 %v2187_v39, %v2186_v50 }
 0x1ee   : > { %v2189_v28 = vrot.slane %v2188_v26, 1  ;;  %v2153_v33 = vadd.f32 %v2152_v54, %v2151_v31 }
 0x1f0   : > { %v2190_v17 = vadd.f32 %v2189_v28, %v2188_v26 }
 0x1f2   : > { %v2192_v53 = vsel %vm749_vm1, %v2153_v33, %v2190_v17 }
 0x1f3   : > { %2193 = vst [vmem:[%s467_s15] sm:$0x3] %v2192_v53 }
 0x1f4 PF: > { %s18_s28 = sadd.s32 1, %s3118_s28   ;;  %s3903_s24 = smov %s3110_s26 }
 0x1f5   : > { %p15_p13 = scmp.ge.s32.totalorder %s18_s28, 6   ;;  %s3904_s25 = smov %s3114_s27 }
 0x1f6   : > { %s3905_s26 = smov %s3908_s29  ;;  %s3906_s27 = smov %s3912_s30 }
 0x1f7   :  { %17 = sbr.rel (!%p15_p13) target bundleno = 3 (0x3), region = 100 }

</bundles_post_ra>
